<compile_context>
chip_gen: v5e
topology: v5e:2x2
jax: 0.10.0
libtpu: 0.0.40
codegen_flags: <defaults>
</compile_context>

<pallas_src>
import functools

import jax
import jax.numpy as jnp
from jax import lax
from jax.experimental import pallas as pl
from jax.experimental.pallas import tpu as pltpu


_DN = (((1,), (1,)), ((), ()))  # contract dim 1 of W[out,in] with dim 1 of x[n,in]


def _attention_predictor_kernel(src_ref, dst_ref,
                                w_src_ref, b_src_ref,
                                w_dst_ref, b_dst_ref,
                                out_ref):
    """One tile of edges, transposed layout: edges on lanes, embed_dim on sublanes.

    src_ref / dst_ref : (tile_n, d)  activations (f32 or bf16)
    w_*_ref           : (d, d)       PyTorch [out, in] weights (same dtype as acts)
    b_*_ref           : (d, 1)       f32 bias, broadcast along lanes
    out_ref           : (1, tile_n)  f32 scores (lane-dense)
    """
    # h^T = relu(W @ x^T + b) without materializing x^T: dot_general contracts
    # the embed axis of both operands directly -> (d, tile_n), f32 accumulation.
    src_h = lax.dot_general(w_src_ref[...], src_ref[...], _DN,
                            preferred_element_type=jnp.float32)
    src_h = jnp.maximum(src_h + b_src_ref[...], 0.0)

    dst_h = lax.dot_general(w_dst_ref[...], dst_ref[...], _DN,
                            preferred_element_type=jnp.float32)
    dst_h = jnp.maximum(dst_h + b_dst_ref[...], 0.0)

    # dropout: identity in eval mode.
    # Sum over embed_dim == sublane reduce; result is lane-dense (1, tile_n).
    out_ref[...] = jnp.sum(src_h * dst_h, axis=0, keepdims=True)


def _attention_predictor_edge_kernel(src_ref, dst_ref, e_ref,
                                      w_src_ref, b_src_ref,
                                      w_dst_ref, b_dst_ref,
                                      out_ref):
    """Same as above, with the precomputed edge projection fused in-kernel."""
    e = e_ref[...]
    src_h = lax.dot_general(w_src_ref[...], src_ref[...] + e, _DN,
                            preferred_element_type=jnp.float32)
    src_h = jnp.maximum(src_h + b_src_ref[...], 0.0)

    dst_h = lax.dot_general(w_dst_ref[...], dst_ref[...] + e, _DN,
                            preferred_element_type=jnp.float32)
    dst_h = jnp.maximum(dst_h + b_dst_ref[...], 0.0)

    out_ref[...] = jnp.sum(src_h * dst_h, axis=0, keepdims=True)


def _pick_tile_n(n, itemsize, num_tiled_inputs):
    """Largest 128-multiple edge tile whose double-buffered, lane-padded input
    buffers stay within ~16 MiB (fits the explicit 32 MiB vmem limit with
    headroom for the (d, tile_n) f32 temporaries on every generation)."""
    budget = 16 * 1024 * 1024
    per_row = 2 * num_tiled_inputs * 128 * itemsize   # 2 buffers, lane-padded to 128
    t = (budget // per_row) // 128 * 128
    t = max(128, min(int(t), 16384))
    n_up = ((n + 127) // 128) * 128                   # don't allocate beyond the data
    return min(t, n_up)


@functools.partial(jax.jit, static_argnames=("tile_n",))
def attention_predictor_forward(src_embeddings, dst_embeddings, params,
                                edge_attr=None, tile_n=None):
    """Pallas implementation of AttentionPredictor.forward (dot_product path).

    src_embeddings, dst_embeddings : [num_edges, embed_dim] (f32 or bf16)
    params : dict with 'w_src','b_src','w_dst','b_dst' in PyTorch Linear layout
             (W is [out, in], b is [out]); optionally 'w_edge','b_edge'.
    edge_attr : optional [num_edges, edge_dim] (or {'attr': ...}).
    Returns scores [num_edges] float32.
    """
    n, d = src_embeddings.shape
    if n == 0:
        # Mirrors the PyTorch empty-input early return.
        return jnp.zeros((0,), jnp.float32)

    compute_dtype = src_embeddings.dtype
    dst_embeddings = dst_embeddings.astype(compute_dtype)

    use_edge = edge_attr is not None and "w_edge" in params
    if use_edge:
        if isinstance(edge_attr, dict):
            edge_attr = edge_attr["attr"]
        # Tiny [n, edge_dim] x [edge_dim, d] projection done once in plain JAX,
        # cast back to the compute dtype so the kernel inputs stay bf16-capable.
        edge_proj = (edge_attr.astype(jnp.float32) @ params["w_edge"].T.astype(jnp.float32)
                     + params["b_edge"].astype(jnp.float32)).astype(compute_dtype)

    itemsize = jnp.dtype(compute_dtype).itemsize
    num_tiled = 3 if use_edge else 2
    if tile_n is None:
        tile_n = _pick_tile_n(n, itemsize, num_tiled)
    assert tile_n % 128 == 0, "tile_n must be a multiple of 128 (lane width)"

    # Weights stay in PyTorch [out, in] layout (kernel contracts the 'in' axis).
    w_src = params["w_src"].astype(compute_dtype)
    w_dst = params["w_dst"].astype(compute_dtype)
    b_src = params["b_src"].astype(jnp.float32).reshape(d, 1)
    b_dst = params["b_dst"].astype(jnp.float32).reshape(d, 1)

    grid = (pl.cdiv(n, tile_n),)   # ragged last tile handled by Pallas masking

    act_spec = pl.BlockSpec((tile_n, d), lambda i: (i, 0))
    in_specs = [act_spec, act_spec]
    if use_edge:
        in_specs.append(act_spec)
    in_specs += [
        pl.BlockSpec((d, d), lambda i: (0, 0)),   # W_src (resident)
        pl.BlockSpec((d, 1), lambda i: (0, 0)),   # b_src
        pl.BlockSpec((d, d), lambda i: (0, 0)),   # W_dst (resident)
        pl.BlockSpec((d, 1), lambda i: (0, 0)),   # b_dst
    ]

    # Advisory cost hint: 2 (or 3) MXU contractions + elementwise epilogue.
    flops = (4 + (2 if use_edge else 0)) * n * d * d + 6 * n * d
    bytes_accessed = num_tiled * n * d * itemsize + 4 * n + 2 * d * d * itemsize + 8 * d

    kernel = _attention_predictor_edge_kernel if use_edge else _attention_predictor_kernel
    args = ((src_embeddings, dst_embeddings, edge_proj) if use_edge
            else (src_embeddings, dst_embeddings)) + (w_src, b_src, w_dst, b_dst)

    scores_row = pl.pallas_call(
        kernel,
        out_shape=jax.ShapeDtypeStruct((1, n), jnp.float32),
        grid_spec=pltpu.PrefetchScalarGridSpec(
            num_scalar_prefetch=0,
            grid=grid,
            in_specs=in_specs,
            # Lane-dense output block: (1, tile_n) row slab per grid step.
            out_specs=pl.BlockSpec((1, tile_n), lambda i: (0, i)),
        ),
        compiler_params=pltpu.CompilerParams(
            dimension_semantics=("parallel",),
            # Raise v5e's 16 MiB scoped default; well under v7x's 64 MiB physical.
            vmem_limit_bytes=32 * 1024 * 1024,
        ),
        cost_estimate=pl.CostEstimate(flops=flops, transcendentals=0,
                                      bytes_accessed=bytes_accessed),
    )(*args)

    return scores_row[0, :]


def init_params(embed_dim, edge_dim, key):
    """Deterministic PyTorch-style init: uniform(-1/sqrt(fan_in), 1/sqrt(fan_in))."""
    k1, k2, k3, k4, k5, k6 = jax.random.split(key, 6)
    b = 1.0 / jnp.sqrt(embed_dim)
    be = 1.0 / jnp.sqrt(edge_dim)
    return {
        "w_src": jax.random.uniform(k1, (embed_dim, embed_dim), jnp.float32, -b, b),
        "b_src": jax.random.uniform(k2, (embed_dim,), jnp.float32, -b, b),
        "w_dst": jax.random.uniform(k3, (embed_dim, embed_dim), jnp.float32, -b, b),
        "b_dst": jax.random.uniform(k4, (embed_dim,), jnp.float32, -b, b),
        "w_edge": jax.random.uniform(k5, (embed_dim, edge_dim), jnp.float32, -be, be),
        "b_edge": jax.random.uniform(k6, (embed_dim,), jnp.float32, -be, be),
    }


def reference_forward(src, dst, params, edge_attr=None):
    """Pure-JAX reference matching the PyTorch module (eval mode, dot_product)."""
    if edge_attr is not None and "w_edge" in params:
        e = edge_attr @ params["w_edge"].T + params["b_edge"]
        src = src + e
        dst = dst + e
    src_h = jnp.maximum(src @ params["w_src"].T + params["b_src"], 0.0)
    dst_h = jnp.maximum(dst @ params["w_dst"].T + params["b_dst"], 0.0)
    return jnp.sum(src_h * dst_h, axis=-1)


if __name__ == "__main__":
    embed_dim = 32
    edge_dim = 8
    num_edges = 2000   # not a multiple of 128 -> exercises the masked ragged tail

    key = jax.random.PRNGKey(0)
    kp, ks, kd, ke = jax.random.split(key, 4)

    params = init_params(embed_dim, edge_dim, kp)
    src = jax.random.normal(ks, (num_edges, embed_dim), jnp.float32)
    dst = jax.random.normal(kd, (num_edges, embed_dim), jnp.float32)
    edge_attr = jax.random.normal(ke, (num_edges, edge_dim), jnp.float32)

    ref = reference_forward(src, dst, params)

    # 1) Default tile (single ragged block) -- tight f32 check.
    out = jax.block_until_ready(attention_predictor_forward(src, dst, params))
    assert out.shape == (num_edges,)
    assert jnp.allclose(out, ref, atol=1e-4, rtol=1e-4), "f32 mismatch vs reference"

    # 2) Small tile -> multi-step grid with a masked ragged last tile.
    out_small = jax.block_until_ready(
        attention_predictor_forward(src, dst, params, tile_n=512))
    assert jnp.allclose(out_small, ref, atol=1e-4, rtol=1e-4), "tiled mismatch vs reference"

    # 3) bf16 inputs (halves HBM traffic on this mem-bound kernel); f32 accumulation.
    #    Weights and activations are both bf16-quantized -> loose tolerance.
    out_bf16 = jax.block_until_ready(
        attention_predictor_forward(src.astype(jnp.bfloat16),
                                    dst.astype(jnp.bfloat16), params))
    assert jnp.allclose(out_bf16, ref, atol=0.3, rtol=0.06), "bf16 mismatch vs reference"

    # 4) Fused edge_attr path.
    ref_e = reference_forward(src, dst, params, edge_attr)
    out_e = jax.block_until_ready(
        attention_predictor_forward(src, dst, params, edge_attr))
    assert jnp.allclose(out_e, ref_e, atol=1e-4, rtol=1e-4), "edge_attr mismatch vs reference"

    # 5) Empty-input early return mirrors the PyTorch module.
    empty = attention_predictor_forward(jnp.zeros((0, embed_dim), jnp.float32),
                                        jnp.zeros((0, embed_dim), jnp.float32), params)
    assert empty.shape == (0,)

    print("KERNEL_OK")
</pallas_src>

<mosaic_0001>
module attributes {stable_mosaic.version = 11 : i64} {
  func.func @_attention_predictor_kernel(%arg0: i32, %arg1: memref<2048x32xf32, #tpu.memory_space<vmem>>, %arg2: memref<2048x32xf32, #tpu.memory_space<vmem>>, %arg3: memref<32x32xf32, #tpu.memory_space<vmem>>, %arg4: memref<32x1xf32, #tpu.memory_space<vmem>>, %arg5: memref<32x32xf32, #tpu.memory_space<vmem>>, %arg6: memref<32x1xf32, #tpu.memory_space<vmem>>, %arg7: memref<1x2048xf32, #tpu.memory_space<vmem>>) attributes {dimension_semantics = [#tpu.dimension_semantics<parallel>], iteration_bounds = array<i64: 1>, scalar_prefetch = 0 : i64, scratch_operands = 0 : i64, tpu.core_type = #tpu.core_type<tc>, window_params = [{transform_indices = @transform_0, window_bounds = array<i64: 2048, 32>}, {transform_indices = @transform_1, window_bounds = array<i64: 2048, 32>}, {pipeline_mode = #tpu.pipeline_mode<synchronous>, transform_indices = @transform_2, window_bounds = array<i64: 32, 32>}, {pipeline_mode = #tpu.pipeline_mode<synchronous>, transform_indices = @transform_3, window_bounds = array<i64: 32, 1>}, {pipeline_mode = #tpu.pipeline_mode<synchronous>, transform_indices = @transform_4, window_bounds = array<i64: 32, 32>}, {pipeline_mode = #tpu.pipeline_mode<synchronous>, transform_indices = @transform_5, window_bounds = array<i64: 32, 1>}, {transform_indices = @transform_6, window_bounds = array<i64: 1, 2048>}]} {
    %c0 = arith.constant 0 : index
    %c0_0 = arith.constant 0 : index
    %0 = vector.load %arg3[%c0, %c0_0] : memref<32x32xf32, #tpu.memory_space<vmem>>, vector<32x32xf32>
    %c0_1 = arith.constant 0 : index
    %c0_2 = arith.constant 0 : index
    %1 = vector.load %arg1[%c0_1, %c0_2] : memref<2048x32xf32, #tpu.memory_space<vmem>>, vector<2048x32xf32>
    %cst = arith.constant dense<0.000000e+00> : vector<32x2048xf32>
    %2 = tpu.matmul %0, %1, %cst {dimension_numbers = #tpu.dot_dimension_numbers<[1], [1], [0], [0], [0, 0, 1, 0], [], []>} : vector<32x32xf32>, vector<2048x32xf32>, vector<32x2048xf32> -> vector<32x2048xf32>
    %c0_3 = arith.constant 0 : index
    %c0_4 = arith.constant 0 : index
    %3 = vector.load %arg4[%c0_3, %c0_4] : memref<32x1xf32, #tpu.memory_space<vmem>>, vector<32x1xf32>
    %4 = vector.broadcast %3 : vector<32x1xf32> to vector<32x2048xf32>
    %5 = arith.addf %2, %4 : vector<32x2048xf32>
    %cst_5 = arith.constant 0.000000e+00 : f32
    %6 = vector.broadcast %cst_5 : f32 to vector<32x2048xf32>
    %7 = arith.maximumf %5, %6 : vector<32x2048xf32>
    %c0_6 = arith.constant 0 : index
    %c0_7 = arith.constant 0 : index
    %8 = vector.load %arg5[%c0_6, %c0_7] : memref<32x32xf32, #tpu.memory_space<vmem>>, vector<32x32xf32>
    %c0_8 = arith.constant 0 : index
    %c0_9 = arith.constant 0 : index
    %9 = vector.load %arg2[%c0_8, %c0_9] : memref<2048x32xf32, #tpu.memory_space<vmem>>, vector<2048x32xf32>
    %cst_10 = arith.constant dense<0.000000e+00> : vector<32x2048xf32>
    %10 = tpu.matmul %8, %9, %cst_10 {dimension_numbers = #tpu.dot_dimension_numbers<[1], [1], [0], [0], [0, 0, 1, 0], [], []>} : vector<32x32xf32>, vector<2048x32xf32>, vector<32x2048xf32> -> vector<32x2048xf32>
    %c0_11 = arith.constant 0 : index
    %c0_12 = arith.constant 0 : index
    %11 = vector.load %arg6[%c0_11, %c0_12] : memref<32x1xf32, #tpu.memory_space<vmem>>, vector<32x1xf32>
    %12 = vector.broadcast %11 : vector<32x1xf32> to vector<32x2048xf32>
    %13 = arith.addf %10, %12 : vector<32x2048xf32>
    %cst_13 = arith.constant 0.000000e+00 : f32
    %14 = vector.broadcast %cst_13 : f32 to vector<32x2048xf32>
    %15 = arith.maximumf %13, %14 : vector<32x2048xf32>
    %16 = arith.mulf %7, %15 : vector<32x2048xf32>
    %cst_14 = arith.constant dense<0.000000e+00> : vector<2048xf32>
    %17 = vector.multi_reduction <add>, %16, %cst_14 [0] : vector<32x2048xf32> to vector<2048xf32>
    %18 = vector.shape_cast %17 : vector<2048xf32> to vector<1x2048xf32>
    %c0_15 = arith.constant 0 : index
    %c0_16 = arith.constant 0 : index
    %19 = vector.load %arg7[%c0_15, %c0_16] : memref<1x2048xf32, #tpu.memory_space<vmem>>, vector<1x2048xf32>
    tpu.vector_store %arg7[%c0_15, %c0_16], %18 {strides = array<i32>} : memref<1x2048xf32, #tpu.memory_space<vmem>>, vector<1x2048xf32>,
    return
  }
  func.func @transform_0(%arg0: i32) -> (i32, i32) {
    %c0_i32 = arith.constant 0 : i32
    %c0_i32_0 = arith.constant 0 : i32
    return %arg0, %c0_i32 : i32, i32
  }
  func.func @transform_1(%arg0: i32) -> (i32, i32) {
    %c0_i32 = arith.constant 0 : i32
    %c0_i32_0 = arith.constant 0 : i32
    return %arg0, %c0_i32 : i32, i32
  }
  func.func @transform_2(%arg0: i32) -> (i32, i32) {
    %c0_i32 = arith.constant 0 : i32
    %c0_i32_0 = arith.constant 0 : i32
    %c0_i32_1 = arith.constant 0 : i32
    return %c0_i32, %c0_i32_0 : i32, i32
  }
  func.func @transform_3(%arg0: i32) -> (i32, i32) {
    %c0_i32 = arith.constant 0 : i32
    %c0_i32_0 = arith.constant 0 : i32
    %c0_i32_1 = arith.constant 0 : i32
    return %c0_i32, %c0_i32_0 : i32, i32
  }
  func.func @transform_4(%arg0: i32) -> (i32, i32) {
    %c0_i32 = arith.constant 0 : i32
    %c0_i32_0 = arith.constant 0 : i32
    %c0_i32_1 = arith.constant 0 : i32
    return %c0_i32, %c0_i32_0 : i32, i32
  }
  func.func @transform_5(%arg0: i32) -> (i32, i32) {
    %c0_i32 = arith.constant 0 : i32
    %c0_i32_0 = arith.constant 0 : i32
    %c0_i32_1 = arith.constant 0 : i32
    return %c0_i32, %c0_i32_0 : i32, i32
  }
  func.func @transform_6(%arg0: i32) -> (i32, i32) {
    %c0_i32 = arith.constant 0 : i32
    %c0_i32_0 = arith.constant 0 : i32
    return %c0_i32, %arg0 : i32, i32
  }
}

</mosaic_0001>

<bundles_post_ra>
// kernel: attention_predictor_forward.1
= control target key start
LH: loop header
LB: loop body
LE: loop exit
PB: predicated region body
PF: predicated region fallthrough
CT: control target
= control target key end

     0   :  { %vm308_vm0 = vcmask 261120   ;;  %s7134_s0 = inlined_call_operand.vmem [shape: f32[2000,32], index: 0, kind: input, shape index: {}]   ;;  %s7135_s1 = inlined_call_operand.vmem [shape: f32[2000,32], index: 1, kind: input, shape index: {}]   ;;  %s7136_s2 = inlined_call_operand.vmem [shape: f32[32,32], index: 2, kind: input, shape index: {}]   ;;  %s7137_s3 = inlined_call_operand.vmem [shape: f32[32,1], index: 3, kind: input, shape index: {}]   ;;  %s7138_s4 = inlined_call_operand.vmem [shape: f32[32,32], index: 4, kind: input, shape index: {}]   ;;  %s7139_s5 = inlined_call_operand.vmem [shape: f32[32,1], index: 5, kind: input, shape index: {}]   ;;  %s7140_s6 = inlined_call_operand.hbm [shape: f32[1,2000], index: 6, kind: output, shape index: {}]  }
   0x1   :  { %v43_v0 = vld [vmem:[%s7134_s0 + $0x78] sm:$0xff]  ;;  %v42_v4 = vld [vmem:[%s7134_s0 + $0x70] sm:$0xff]  ;;  %v41_v8 = vld [vmem:[%s7134_s0 + $0x68] sm:$0xff] }
   0x2   :  { %v59_v1 = vld [vmem:[%s7134_s0 + $0xf8] sm:$0xff]  ;;  %3488 = vmatpush.xpose.msk.msra.mxu0 %vm308_vm0, %v43_v0  ;;  %v58_v5 = vld [vmem:[%s7134_s0 + $0xf0] sm:$0xff]  ;;  %v57_v9 = vld [vmem:[%s7134_s0 + $0xe8] sm:$0xff] }
   0x3   :  { %v75_v2 = vld [vmem:[%s7134_s0 + $0x178] sm:$0xff]  ;;  %3508 = vmatpush.xpose.msk.msra.mxu1 %vm308_vm0, %v59_v1  ;;  %v74_v6 = vld [vmem:[%s7134_s0 + $0x170] sm:$0xff]  ;;  %v73_v10 = vld [vmem:[%s7134_s0 + $0x168] sm:$0xff] }
   0x4   :  { %v91_v3 = vld [vmem:[%s7134_s0 + $0x1f8] sm:$0xff]  ;;  %3528 = vmatpush.xpose.msk.msra.mxu2 %vm308_vm0, %v75_v2  ;;  %v90_v7 = vld [vmem:[%s7134_s0 + $0x1f0] sm:$0xff]  ;;  %v89_v11 = vld [vmem:[%s7134_s0 + $0x1e8] sm:$0xff] }
   0x5   :  { %3548 = vmatpush.xpose.msk.msra.mxu3 %vm308_vm0, %v91_v3  ;;  %v40_v12 = vld [vmem:[%s7134_s0 + $0x60] sm:$0xff]  ;;  %v39_v16 = vld [vmem:[%s7134_s0 + $0x58] sm:$0xff] }
   0x6   :  { %3489 = vmatpush.xpose.msk.msra.mxu0 %vm308_vm0, %v42_v4  ;;  %v56_v13 = vld [vmem:[%s7134_s0 + $0xe0] sm:$0xff]  ;;  %v55_v17 = vld [vmem:[%s7134_s0 + $0xd8] sm:$0xff] }
   0x7   :  { %3509 = vmatpush.xpose.msk.msra.mxu1 %vm308_vm0, %v58_v5  ;;  %v72_v14 = vld [vmem:[%s7134_s0 + $0x160] sm:$0xff]  ;;  %v71_v18 = vld [vmem:[%s7134_s0 + $0x158] sm:$0xff] }
   0x8   :  { %3529 = vmatpush.xpose.msk.msra.mxu2 %vm308_vm0, %v74_v6  ;;  %v88_v15 = vld [vmem:[%s7134_s0 + $0x1e0] sm:$0xff]  ;;  %v87_v19 = vld [vmem:[%s7134_s0 + $0x1d8] sm:$0xff] }
   0x9   :  { %3549 = vmatpush.xpose.msk.msra.mxu3 %vm308_vm0, %v90_v7 }
   0xa   :  { %3490 = vmatpush.xpose.msk.msra.mxu0 %vm308_vm0, %v41_v8 }
   0xb   :  { %3510 = vmatpush.xpose.msk.msra.mxu1 %vm308_vm0, %v57_v9 }
   0xc   :  { %3530 = vmatpush.xpose.msk.msra.mxu2 %vm308_vm0, %v73_v10 }
   0xd   :  { %3550 = vmatpush.xpose.msk.msra.mxu3 %vm308_vm0, %v89_v11 }
   0xe   :  { %3491 = vmatpush.xpose.msk.msra.mxu0 %vm308_vm0, %v40_v12 }
   0xf   :  { %3511 = vmatpush.xpose.msk.msra.mxu1 %vm308_vm0, %v56_v13 }
  0x10   :  { %3531 = vmatpush.xpose.msk.msra.mxu2 %vm308_vm0, %v72_v14 }
  0x11   :  { %3551 = vmatpush.xpose.msk.msra.mxu3 %vm308_vm0, %v88_v15 }
  0x12   :  { %11 = vsyncpa [#allocation3], 0  ;;  %3492 = vmatpush.xpose.msk.msra.mxu0 %vm308_vm0, %v39_v16  ;;  %v38_v20 = vld [vmem:[%s7134_s0 + $0x50] sm:$0xff]  ;;  %v37_v24 = vld [vmem:[%s7134_s0 + $0x48] sm:$0xff]  ;;  %vm3447_vm1 = vcmask 1040384   ;;  %vm3449_vm2 = vcmask 1042434  }
  0x13   :  { %3512 = vmatpush.xpose.msk.msra.mxu1 %vm308_vm0, %v55_v17  ;;  %v54_v21 = vld [vmem:[%s7134_s0 + $0xd0] sm:$0xff]  ;;  %v53_v25 = vld [vmem:[%s7134_s0 + $0xc8] sm:$0xff]  ;;  %v36_v28 = vld [vmem:[%s7134_s0 + $0x40] sm:$0xff]  ;;  %vm3451_vm3 = vcmask 1041408   ;;  %vm3453_vm4 = vcmask 1044484   ;;  %vm3455_vm5 = vcmask 1046534  }
  0x14   :  { %3532 = vmatpush.xpose.msk.msra.mxu2 %vm308_vm0, %v71_v18  ;;  %v70_v22 = vld [vmem:[%s7134_s0 + $0x150] sm:$0xff]  ;;  %v69_v26 = vld [vmem:[%s7134_s0 + $0x148] sm:$0xff]  ;;  %v52_v29 = vld [vmem:[%s7134_s0 + $0xc0] sm:$0xff]  ;;  %vm3457_vm6 = vcmask 1045508   ;;  %vm3459_vm7 = vcmask 1043456   ;;  %s3479_s17 = sshll.u32 %s7140_s6, 4  ;;  %s3480_s17 = int_to_ptr.hbm [resolvable:$true] %s3479_s17 }
  0x15   :  { %3552 = vmatpush.xpose.msk.msra.mxu3 %vm308_vm0, %v87_v19  ;;  %v86_v23 = vld [vmem:[%s7134_s0 + $0x1d0] sm:$0xff]  ;;  %v85_v27 = vld [vmem:[%s7134_s0 + $0x1c8] sm:$0xff]  ;;  %v68_v30 = vld [vmem:[%s7134_s0 + $0x140] sm:$0xff] }
  0x16   :  { %3493 = vmatpush.xpose.msk.msra.mxu0 %vm308_vm0, %v38_v20  ;;  %v84_v31 = vld [vmem:[%s7134_s0 + $0x1c0] sm:$0xff]  ;;  %v35_v32 = vld [vmem:[%s7134_s0 + $0x38] sm:$0xff]  ;;  %v34_v36 = vld [vmem:[%s7134_s0 + $0x30] sm:$0xff] }
  0x17   :  { %3513 = vmatpush.xpose.msk.msra.mxu1 %vm308_vm0, %v54_v21  ;;  %v51_v33 = vld [vmem:[%s7134_s0 + $0xb8] sm:$0xff]  ;;  %v50_v37 = vld [vmem:[%s7134_s0 + $0xb0] sm:$0xff]  ;;  %v33_v40 = vld [vmem:[%s7134_s0 + $0x28] sm:$0xff] }
  0x18   :  { %3533 = vmatpush.xpose.msk.msra.mxu2 %vm308_vm0, %v70_v22  ;;  %v67_v34 = vld [vmem:[%s7134_s0 + $0x138] sm:$0xff]  ;;  %v66_v38 = vld [vmem:[%s7134_s0 + $0x130] sm:$0xff]  ;;  %v49_v41 = vld [vmem:[%s7134_s0 + $0xa8] sm:$0xff] }
  0x19   :  { %3553 = vmatpush.xpose.msk.msra.mxu3 %vm308_vm0, %v86_v23  ;;  %v83_v35 = vld [vmem:[%s7134_s0 + $0x1b8] sm:$0xff]  ;;  %v82_v39 = vld [vmem:[%s7134_s0 + $0x1b0] sm:$0xff]  ;;  %v65_v42 = vld [vmem:[%s7134_s0 + $0x128] sm:$0xff] }
  0x1a   :  { %3494 = vmatpush.xpose.msk.msra.mxu0 %vm308_vm0, %v37_v24  ;;  %v81_v43 = vld [vmem:[%s7134_s0 + $0x1a8] sm:$0xff]  ;;  %v32_v44 = vld [vmem:[%s7134_s0 + $0x20] sm:$0xff]  ;;  %v31_v48 = vld [vmem:[%s7134_s0 + $0x18] sm:$0xff] }
  0x1b   :  { %3514 = vmatpush.xpose.msk.msra.mxu1 %vm308_vm0, %v53_v25  ;;  %v48_v45 = vld [vmem:[%s7134_s0 + $0xa0] sm:$0xff]  ;;  %v47_v49 = vld [vmem:[%s7134_s0 + $0x98] sm:$0xff]  ;;  %v30_v52 = vld [vmem:[%s7134_s0 + $0x10] sm:$0xff] }
  0x1c   :  { %3534 = vmatpush.xpose.msk.msra.mxu2 %vm308_vm0, %v69_v26  ;;  %v64_v46 = vld [vmem:[%s7134_s0 + $0x120] sm:$0xff]  ;;  %v63_v50 = vld [vmem:[%s7134_s0 + $0x118] sm:$0xff]  ;;  %v46_v53 = vld [vmem:[%s7134_s0 + $0x90] sm:$0xff] }
  0x1d   :  { %3554 = vmatpush.xpose.msk.msra.mxu3 %vm308_vm0, %v85_v27  ;;  %v80_v47 = vld [vmem:[%s7134_s0 + $0x1a0] sm:$0xff]  ;;  %v79_v51 = vld [vmem:[%s7134_s0 + $0x198] sm:$0xff]  ;;  %v62_v54 = vld [vmem:[%s7134_s0 + $0x110] sm:$0xff] }
  0x1e   :  { %3495 = vmatpush.xpose.msk.msra.mxu0 %vm308_vm0, %v36_v28  ;;  %v78_v55 = vld [vmem:[%s7134_s0 + $0x190] sm:$0xff]  ;;  %v29_v56 = vld [vmem:[%s7134_s0 + $0x8] sm:$0xff]  ;;  %v28_v60 = vld [vmem:[%s7134_s0] sm:$0xff] }
  0x1f   :  { %3515 = vmatpush.xpose.msk.msra.mxu1 %vm308_vm0, %v52_v29  ;;  %v45_v57 = vld [vmem:[%s7134_s0 + $0x88] sm:$0xff]  ;;  %v44_v61 = vld [vmem:[%s7134_s0 + $0x80] sm:$0xff]  ;;  %v107_v0 = vld [vmem:[%s7134_s0 + $0x278] sm:$0xff] }
  0x20   :  { %3535 = vmatpush.xpose.msk.msra.mxu2 %vm308_vm0, %v68_v30  ;;  %v61_v58 = vld [vmem:[%s7134_s0 + $0x108] sm:$0xff]  ;;  %v60_v62 = vld [vmem:[%s7134_s0 + $0x100] sm:$0xff]  ;;  %v123_v1 = vld [vmem:[%s7134_s0 + $0x2f8] sm:$0xff] }
  0x21   :  { %3555 = vmatpush.xpose.msk.msra.mxu3 %vm308_vm0, %v84_v31  ;;  %v77_v59 = vld [vmem:[%s7134_s0 + $0x188] sm:$0xff]  ;;  %v76_v63 = vld [vmem:[%s7134_s0 + $0x180] sm:$0xff]  ;;  %v139_v2 = vld [vmem:[%s7134_s0 + $0x378] sm:$0xff] }
  0x22   :  { %3496 = vmatpush.xpose.msk.msra.mxu0 %vm308_vm0, %v35_v32  ;;  %v155_v3 = vld [vmem:[%s7134_s0 + $0x3f8] sm:$0xff]  ;;  %v106_v4 = vld [vmem:[%s7134_s0 + $0x270] sm:$0xff]  ;;  %v105_v8 = vld [vmem:[%s7134_s0 + $0x268] sm:$0xff] }
  0x23   :  { %3516 = vmatpush.xpose.msk.msra.mxu1 %vm308_vm0, %v51_v33  ;;  %v122_v5 = vld [vmem:[%s7134_s0 + $0x2f0] sm:$0xff]  ;;  %v121_v9 = vld [vmem:[%s7134_s0 + $0x2e8] sm:$0xff]  ;;  %v104_v12 = vld [vmem:[%s7134_s0 + $0x260] sm:$0xff] }
  0x24   :  { %3536 = vmatpush.xpose.msk.msra.mxu2 %vm308_vm0, %v67_v34  ;;  %v138_v6 = vld [vmem:[%s7134_s0 + $0x370] sm:$0xff]  ;;  %v137_v10 = vld [vmem:[%s7134_s0 + $0x368] sm:$0xff]  ;;  %v120_v13 = vld [vmem:[%s7134_s0 + $0x2e0] sm:$0xff] }
  0x25   :  { %3556 = vmatpush.xpose.msk.msra.mxu3 %vm308_vm0, %v83_v35  ;;  %v154_v7 = vld [vmem:[%s7134_s0 + $0x3f0] sm:$0xff]  ;;  %v153_v11 = vld [vmem:[%s7134_s0 + $0x3e8] sm:$0xff]  ;;  %v136_v14 = vld [vmem:[%s7134_s0 + $0x360] sm:$0xff] }
  0x26   :  { %3497 = vmatpush.xpose.msk.msra.mxu0 %vm308_vm0, %v34_v36  ;;  %v152_v15 = vld [vmem:[%s7134_s0 + $0x3e0] sm:$0xff]  ;;  %v103_v16 = vld [vmem:[%s7134_s0 + $0x258] sm:$0xff]  ;;  %v102_v20 = vld [vmem:[%s7134_s0 + $0x250] sm:$0xff] }
  0x27   :  { %3517 = vmatpush.xpose.msk.msra.mxu1 %vm308_vm0, %v50_v37  ;;  %v119_v17 = vld [vmem:[%s7134_s0 + $0x2d8] sm:$0xff]  ;;  %v118_v21 = vld [vmem:[%s7134_s0 + $0x2d0] sm:$0xff]  ;;  %v101_v24 = vld [vmem:[%s7134_s0 + $0x248] sm:$0xff] }
  0x28   :  { %3537 = vmatpush.xpose.msk.msra.mxu2 %vm308_vm0, %v66_v38  ;;  %v135_v18 = vld [vmem:[%s7134_s0 + $0x358] sm:$0xff]  ;;  %v134_v22 = vld [vmem:[%s7134_s0 + $0x350] sm:$0xff]  ;;  %v117_v25 = vld [vmem:[%s7134_s0 + $0x2c8] sm:$0xff] }
  0x29   :  { %3557 = vmatpush.xpose.msk.msra.mxu3 %vm308_vm0, %v82_v39  ;;  %v151_v19 = vld [vmem:[%s7134_s0 + $0x3d8] sm:$0xff]  ;;  %v150_v23 = vld [vmem:[%s7134_s0 + $0x3d0] sm:$0xff]  ;;  %v133_v26 = vld [vmem:[%s7134_s0 + $0x348] sm:$0xff] }
  0x2a   :  { %3498 = vmatpush.xpose.msk.msra.mxu0 %vm308_vm0, %v33_v40  ;;  %v149_v27 = vld [vmem:[%s7134_s0 + $0x3c8] sm:$0xff]  ;;  %v100_v28 = vld [vmem:[%s7134_s0 + $0x240] sm:$0xff]  ;;  %v99_v32 = vld [vmem:[%s7134_s0 + $0x238] sm:$0xff] }
  0x2b   :  { %3518 = vmatpush.xpose.msk.msra.mxu1 %vm308_vm0, %v49_v41  ;;  %v116_v29 = vld [vmem:[%s7134_s0 + $0x2c0] sm:$0xff]  ;;  %v115_v33 = vld [vmem:[%s7134_s0 + $0x2b8] sm:$0xff]  ;;  %v98_v37 = vld [vmem:[%s7134_s0 + $0x230] sm:$0xff] }
  0x2c   :  { %3538 = vmatpush.xpose.msk.msra.mxu2 %vm308_vm0, %v65_v42  ;;  %v132_v30 = vld [vmem:[%s7134_s0 + $0x340] sm:$0xff]  ;;  %v131_v35 = vld [vmem:[%s7134_s0 + $0x338] sm:$0xff]  ;;  %v114_v38 = vld [vmem:[%s7134_s0 + $0x2b0] sm:$0xff] }
  0x2d   :  { %3558 = vmatpush.xpose.msk.msra.mxu3 %vm308_vm0, %v81_v43  ;;  %v148_v31 = vld [vmem:[%s7134_s0 + $0x3c0] sm:$0xff]  ;;  %v147_v36 = vld [vmem:[%s7134_s0 + $0x3b8] sm:$0xff]  ;;  %v130_v39 = vld [vmem:[%s7134_s0 + $0x330] sm:$0xff] }
  0x2e   :  { %3499 = vmatpush.xpose.msk.msra.mxu0 %vm308_vm0, %v32_v44  ;;  %v4593_v34 = vld [vmem:[%s7136_s2] sm:$0xff]  ;;  %v146_v40 = vld [vmem:[%s7134_s0 + $0x3b0] sm:$0xff]  ;;  %v97_v41 = vld [vmem:[%s7134_s0 + $0x228] sm:$0xff] }
  0x2f   :  { %3519 = vmatpush.xpose.msk.msra.mxu1 %vm308_vm0, %v48_v45  ;;  %v113_v42 = vld [vmem:[%s7134_s0 + $0x2a8] sm:$0xff]  ;;  %v96_v45 = vld [vmem:[%s7134_s0 + $0x220] sm:$0xff] }
  0x30   :  { %3539 = vmatpush.xpose.msk.msra.mxu2 %vm308_vm0, %v64_v46  ;;  %v129_v43 = vld [vmem:[%s7134_s0 + $0x328] sm:$0xff]  ;;  %v112_v46 = vld [vmem:[%s7134_s0 + $0x2a0] sm:$0xff] }
  0x31   :  { %3559 = vmatpush.xpose.msk.msra.mxu3 %vm308_vm0, %v80_v47  ;;  %v145_v44 = vld [vmem:[%s7134_s0 + $0x3a8] sm:$0xff]  ;;  %v128_v47 = vld [vmem:[%s7134_s0 + $0x320] sm:$0xff] }
  0x32   :  { %3500 = vmatpush.xpose.msk.msra.mxu0 %vm308_vm0, %v31_v48  ;;  %v144_v48 = vld [vmem:[%s7134_s0 + $0x3a0] sm:$0xff] }
  0x33   :  { %3520 = vmatpush.xpose.msk.msra.mxu1 %vm308_vm0, %v47_v49  ;;  %v95_v49 = vld [vmem:[%s7134_s0 + $0x218] sm:$0xff] }
  0x34   :  { %3540 = vmatpush.xpose.msk.msra.mxu2 %vm308_vm0, %v63_v50  ;;  %v111_v50 = vld [vmem:[%s7134_s0 + $0x298] sm:$0xff] }
  0x35   :  { %3560 = vmatpush.xpose.msk.msra.mxu3 %vm308_vm0, %v79_v51  ;;  %v127_v51 = vld [vmem:[%s7134_s0 + $0x318] sm:$0xff] }
  0x36   :  { %3501 = vmatpush.xpose.msk.msra.mxu0 %vm308_vm0, %v30_v52  ;;  %v143_v52 = vld [vmem:[%s7134_s0 + $0x398] sm:$0xff] }
  0x37   :  { %3521 = vmatpush.xpose.msk.msra.mxu1 %vm308_vm0, %v46_v53  ;;  %v4163_v53 = vmov 0  }
  0x38   :  { %3541 = vmatpush.xpose.msk.msra.mxu2 %vm308_vm0, %v62_v54  ;;  %4130 = vset.pattern.permute.xlu0 %v4163_v53  ;;  %v284_v54 = vld [vmem:[%s7137_s3] sm:$0xff] }
  0x39   :  { %3561 = vmatpush.xpose.msk.msra.mxu3 %vm308_vm0, %v78_v55  ;;  %4132 = vset.pattern.permute.xlu2 %v4163_v53  ;;  %v94_v55 = vld [vmem:[%s7134_s0 + $0x210] sm:$0xff] }
  0x3a   :  { %3502 = vmatpush.xpose.msk.msra.mxu0 %vm308_vm0, %v29_v56  ;;  %4131 = vset.pattern.permute.xlu1 %v4163_v53  ;;  %v110_v56 = vld [vmem:[%s7134_s0 + $0x290] sm:$0xff]  ;;  %v160_v53 = vld [vmem:[%s7134_s0 + $0x420] sm:$0xff] }
  0x3b   :  { %3522 = vmatpush.xpose.msk.msra.mxu1 %vm308_vm0, %v45_v57  ;;  %v126_v57 = vld [vmem:[%s7134_s0 + $0x310] sm:$0xff]  ;;  %290 = vperm.xlu0 %4130, %v284_v54   ;;  %v176_v54 = vld [vmem:[%s7134_s0 + $0x4a0] sm:$0xff] }
  0x3c   :  { %3542 = vmatpush.xpose.msk.msra.mxu2 %vm308_vm0, %v61_v58  ;;  %v142_v58 = vld [vmem:[%s7134_s0 + $0x390] sm:$0xff] }
  0x3d   :  { %3562 = vmatpush.xpose.msk.msra.mxu3 %vm308_vm0, %v77_v59  ;;  %v93_v59 = vld [vmem:[%s7134_s0 + $0x208] sm:$0xff] }
  0x3e   :  { %3503 = vmatpush.xpose.msk.msra.mxu0 %vm308_vm0, %v28_v60  ;;  %v109_v60 = vld [vmem:[%s7134_s0 + $0x288] sm:$0xff] }
  0x3f   :  { %3523 = vmatpush.xpose.msk.msra.mxu1 %vm308_vm0, %v44_v61  ;;  %v125_v61 = vld [vmem:[%s7134_s0 + $0x308] sm:$0xff] }
  0x40   :  { %3543 = vmatpush.xpose.msk.msra.mxu2 %vm308_vm0, %v60_v62  ;;  %v141_v62 = vld [vmem:[%s7134_s0 + $0x388] sm:$0xff] }
  0x41   :  { %3563 = vmatpush.xpose.msk.msra.mxu3 %vm308_vm0, %v76_v63  ;;  %3504 = vmatmul.msk.f32.vlgmr.msra.gmra.mxu0 %vm308_vm0, %v4593_v34  ;;  %v92_v63 = vld [vmem:[%s7134_s0 + $0x200] sm:$0xff] }
  0x42   :  { %3568 = vmatpush.xpose.msk.msrb.mxu0 %vm308_vm0, %v107_v0  ;;  %3524 = vmatmul.msk.f32.vlgmr.msra.gmra.mxu1 %vm308_vm0, %v4593_v34  ;;  %v108_v0 = vld [vmem:[%s7134_s0 + $0x280] sm:$0xff] }
  0x43   :  { %3588 = vmatpush.xpose.msk.msrb.mxu1 %vm308_vm0, %v123_v1  ;;  %3544 = vmatmul.msk.f32.vlgmr.msra.gmra.mxu2 %vm308_vm0, %v4593_v34  ;;  %v124_v1 = vld [vmem:[%s7134_s0 + $0x300] sm:$0xff] }
  0x44   :  { %3608 = vmatpush.xpose.msk.msrb.mxu2 %vm308_vm0, %v139_v2  ;;  %3564 = vmatmul.msk.f32.vlgmr.msra.gmra.mxu3 %vm308_vm0, %v4593_v34  ;;  %v140_v2 = vld [vmem:[%s7134_s0 + $0x380] sm:$0xff] }
  0x45   :  { %3628 = vmatpush.xpose.msk.msrb.mxu3 %vm308_vm0, %v155_v3  ;;  %v171_v3 = vld [vmem:[%s7134_s0 + $0x478] sm:$0xff] }
  0x46   :  { %3569 = vmatpush.xpose.msk.msrb.mxu0 %vm308_vm0, %v106_v4  ;;  %v187_v4 = vld [vmem:[%s7134_s0 + $0x4f8] sm:$0xff] }
  0x47   :  { %3589 = vmatpush.xpose.msk.msrb.mxu1 %vm308_vm0, %v122_v5  ;;  %v203_v5 = vld [vmem:[%s7134_s0 + $0x578] sm:$0xff] }
  0x48   :  { %3609 = vmatpush.xpose.msk.msrb.mxu2 %vm308_vm0, %v138_v6  ;;  %v219_v6 = vld [vmem:[%s7134_s0 + $0x5f8] sm:$0xff] }
  0x49   :  { %3629 = vmatpush.xpose.msk.msrb.mxu3 %vm308_vm0, %v154_v7  ;;  %v170_v7 = vld [vmem:[%s7134_s0 + $0x470] sm:$0xff] }
  0x4a   :  { %3570 = vmatpush.xpose.msk.msrb.mxu0 %vm308_vm0, %v105_v8  ;;  %v186_v8 = vld [vmem:[%s7134_s0 + $0x4f0] sm:$0xff] }
  0x4b   :  { %3590 = vmatpush.xpose.msk.msrb.mxu1 %vm308_vm0, %v121_v9  ;;  %v202_v9 = vld [vmem:[%s7134_s0 + $0x570] sm:$0xff] }
  0x4c   :  { %3610 = vmatpush.xpose.msk.msrb.mxu2 %vm308_vm0, %v137_v10  ;;  %v218_v10 = vld [vmem:[%s7134_s0 + $0x5f0] sm:$0xff] }
  0x4d   :  { %3630 = vmatpush.xpose.msk.msrb.mxu3 %vm308_vm0, %v153_v11  ;;  %v169_v11 = vld [vmem:[%s7134_s0 + $0x468] sm:$0xff] }
  0x4e   :  { %3571 = vmatpush.xpose.msk.msrb.mxu0 %vm308_vm0, %v104_v12  ;;  %v185_v12 = vld [vmem:[%s7134_s0 + $0x4e8] sm:$0xff] }
  0x4f   :  { %3591 = vmatpush.xpose.msk.msrb.mxu1 %vm308_vm0, %v120_v13  ;;  %v4769_v13 = vld [vmem:[%s7136_s2 + $0x8] sm:$0xff] }
  0x50   :  { %3611 = vmatpush.xpose.msk.msrb.mxu2 %vm308_vm0, %v136_v14  ;;  %v201_v14 = vld [vmem:[%s7134_s0 + $0x568] sm:$0xff]  ;;  %3505 = vmatmul.msk.f32.gmra.mxu0 %vm308_vm0, %v4769_v13 }
  0x51   :  { %3631 = vmatpush.xpose.msk.msrb.mxu3 %vm308_vm0, %v152_v15  ;;  %v217_v15 = vld [vmem:[%s7134_s0 + $0x5e8] sm:$0xff]  ;;  %3525 = vmatmul.msk.f32.gmra.mxu1 %vm308_vm0, %v4769_v13 }
  0x52   :  { %3572 = vmatpush.xpose.msk.msrb.mxu0 %vm308_vm0, %v103_v16  ;;  %3545 = vmatmul.msk.f32.gmra.mxu2 %vm308_vm0, %v4769_v13  ;;  %v168_v16 = vld [vmem:[%s7134_s0 + $0x460] sm:$0xff] }
  0x53   :  { %3592 = vmatpush.xpose.msk.msrb.mxu1 %vm308_vm0, %v119_v17  ;;  %3565 = vmatmul.msk.f32.gmra.mxu3 %vm308_vm0, %v4769_v13  ;;  %v184_v17 = vld [vmem:[%s7134_s0 + $0x4e0] sm:$0xff] }
  0x54   :  { %3612 = vmatpush.xpose.msk.msrb.mxu2 %vm308_vm0, %v135_v18  ;;  %v200_v18 = vld [vmem:[%s7134_s0 + $0x560] sm:$0xff] }
  0x55   :  { %3632 = vmatpush.xpose.msk.msrb.mxu3 %vm308_vm0, %v151_v19  ;;  %v216_v19 = vld [vmem:[%s7134_s0 + $0x5e0] sm:$0xff] }
  0x56   :  { %3573 = vmatpush.xpose.msk.msrb.mxu0 %vm308_vm0, %v102_v20  ;;  %v167_v20 = vld [vmem:[%s7134_s0 + $0x458] sm:$0xff] }
  0x57   :  { %3593 = vmatpush.xpose.msk.msrb.mxu1 %vm308_vm0, %v118_v21  ;;  %v183_v21 = vld [vmem:[%s7134_s0 + $0x4d8] sm:$0xff] }
  0x58   :  { %3613 = vmatpush.xpose.msk.msrb.mxu2 %vm308_vm0, %v134_v22  ;;  %v4814_v22 = vld [vmem:[%s7136_s2 + $0x10] sm:$0xff] }
  0x59   :  { %3633 = vmatpush.xpose.msk.msrb.mxu3 %vm308_vm0, %v150_v23  ;;  %v199_v23 = vld [vmem:[%s7134_s0 + $0x558] sm:$0xff]  ;;  %3506 = vmatmul.msk.f32.gmra.mxu0 %vm308_vm0, %v4814_v22 }
  0x5a   :  { %3574 = vmatpush.xpose.msk.msrb.mxu0 %vm308_vm0, %v101_v24  ;;  %v215_v24 = vld [vmem:[%s7134_s0 + $0x5d8] sm:$0xff]  ;;  %3526 = vmatmul.msk.f32.gmra.mxu1 %vm308_vm0, %v4814_v22 }
  0x5b   :  { %3594 = vmatpush.xpose.msk.msrb.mxu1 %vm308_vm0, %v117_v25  ;;  %3546 = vmatmul.msk.f32.gmra.mxu2 %vm308_vm0, %v4814_v22  ;;  %v166_v25 = vld [vmem:[%s7134_s0 + $0x450] sm:$0xff] }
  0x5c   :  { %3614 = vmatpush.xpose.msk.msrb.mxu2 %vm308_vm0, %v133_v26  ;;  %3566 = vmatmul.msk.f32.gmra.mxu3 %vm308_vm0, %v4814_v22  ;;  %v182_v26 = vld [vmem:[%s7134_s0 + $0x4d0] sm:$0xff] }
  0x5d   :  { %3634 = vmatpush.xpose.msk.msrb.mxu3 %vm308_vm0, %v149_v27  ;;  %v198_v27 = vld [vmem:[%s7134_s0 + $0x550] sm:$0xff] }
  0x5e   :  { %3575 = vmatpush.xpose.msk.msrb.mxu0 %vm308_vm0, %v100_v28  ;;  %v214_v28 = vld [vmem:[%s7134_s0 + $0x5d0] sm:$0xff] }
  0x5f   :  { %3595 = vmatpush.xpose.msk.msrb.mxu1 %vm308_vm0, %v116_v29  ;;  %v165_v29 = vld [vmem:[%s7134_s0 + $0x448] sm:$0xff] }
  0x60   :  { %3615 = vmatpush.xpose.msk.msrb.mxu2 %vm308_vm0, %v132_v30  ;;  %v181_v30 = vld [vmem:[%s7134_s0 + $0x4c8] sm:$0xff] }
  0x61   :  { %3635 = vmatpush.xpose.msk.msrb.mxu3 %vm308_vm0, %v148_v31  ;;  %v4859_v31 = vld [vmem:[%s7136_s2 + $0x18] sm:$0xff] }
  0x62   :  { %3576 = vmatpush.xpose.msk.msrb.mxu0 %vm308_vm0, %v99_v32  ;;  %v197_v32 = vld [vmem:[%s7134_s0 + $0x548] sm:$0xff]  ;;  %3527 = vmatmul.msk.f32.gmra.mxu1 %vm308_vm0, %v4859_v31 }
  0x63   :  { %3596 = vmatpush.xpose.msk.msrb.mxu1 %vm308_vm0, %v115_v33  ;;  %v213_v33 = vld [vmem:[%s7134_s0 + $0x5c8] sm:$0xff]  ;;  %3507 = vmatmul.msk.f32.gmra.mxu0 %vm308_vm0, %v4859_v31 }
  0x64   :  { %3616 = vmatpush.xpose.msk.msrb.mxu2 %vm308_vm0, %v131_v35  ;;  %3567 = vmatmul.msk.f32.gmra.mxu3 %vm308_vm0, %v4859_v31  ;;  %v285_v35 = vld [vmem:[%s7137_s3 + $0x8] sm:$0xff] }
  0x65   :  { %3636 = vmatpush.xpose.msk.msrb.mxu3 %vm308_vm0, %v147_v36  ;;  %3547 = vmatmul.msk.f32.gmra.mxu2 %vm308_vm0, %v4859_v31  ;;  %v164_v36 = vld [vmem:[%s7134_s0 + $0x440] sm:$0xff] }
  0x66   :  { %3577 = vmatpush.xpose.msk.msrb.mxu0 %vm308_vm0, %v98_v37  ;;  %v180_v37 = vld [vmem:[%s7134_s0 + $0x4c0] sm:$0xff]  ;;  %295 = vperm.xlu0 %4130, %v285_v35   ;;  %v246_v35 = vld [vmem:[%s7134_s0 + $0x6d0] sm:$0xff] }
  0x67   :  { %3597 = vmatpush.xpose.msk.msrb.mxu1 %vm308_vm0, %v114_v38  ;;  %v196_v38 = vld [vmem:[%s7134_s0 + $0x540] sm:$0xff] }
  0x68   :  { %3617 = vmatpush.xpose.msk.msrb.mxu2 %vm308_vm0, %v130_v39  ;;  %v212_v39 = vld [vmem:[%s7134_s0 + $0x5c0] sm:$0xff] }
  0x69   :  { %3637 = vmatpush.xpose.msk.msrb.mxu3 %vm308_vm0, %v146_v40  ;;  %v163_v40 = vld [vmem:[%s7134_s0 + $0x438] sm:$0xff] }
  0x6a   :  { %3578 = vmatpush.xpose.msk.msrb.mxu0 %vm308_vm0, %v97_v41  ;;  %v179_v41 = vld [vmem:[%s7134_s0 + $0x4b8] sm:$0xff] }
  0x6b   :  { %3598 = vmatpush.xpose.msk.msrb.mxu1 %vm308_vm0, %v113_v42  ;;  %v195_v42 = vld [vmem:[%s7134_s0 + $0x538] sm:$0xff] }
  0x6c   :  { %3618 = vmatpush.xpose.msk.msrb.mxu2 %vm308_vm0, %v129_v43  ;;  %v211_v43 = vld [vmem:[%s7134_s0 + $0x5b8] sm:$0xff] }
  0x6d   :  { %3638 = vmatpush.xpose.msk.msrb.mxu3 %vm308_vm0, %v145_v44  ;;  %v162_v44 = vld [vmem:[%s7134_s0 + $0x430] sm:$0xff] }
  0x6e   :  { %3579 = vmatpush.xpose.msk.msrb.mxu0 %vm308_vm0, %v96_v45  ;;  %v178_v45 = vld [vmem:[%s7134_s0 + $0x4b0] sm:$0xff] }
  0x6f   :  { %3599 = vmatpush.xpose.msk.msrb.mxu1 %vm308_vm0, %v112_v46  ;;  %v194_v46 = vld [vmem:[%s7134_s0 + $0x530] sm:$0xff] }
  0x70   :  { %3619 = vmatpush.xpose.msk.msrb.mxu2 %vm308_vm0, %v128_v47  ;;  %v210_v47 = vld [vmem:[%s7134_s0 + $0x5b0] sm:$0xff] }
  0x71   :  { %3639 = vmatpush.xpose.msk.msrb.mxu3 %vm308_vm0, %v144_v48  ;;  %v161_v48 = vld [vmem:[%s7134_s0 + $0x428] sm:$0xff] }
  0x72   :  { %3580 = vmatpush.xpose.msk.msrb.mxu0 %vm308_vm0, %v95_v49  ;;  %v177_v49 = vld [vmem:[%s7134_s0 + $0x4a8] sm:$0xff] }
  0x73   :  { %3600 = vmatpush.xpose.msk.msrb.mxu1 %vm308_vm0, %v111_v50  ;;  %v193_v50 = vld [vmem:[%s7134_s0 + $0x528] sm:$0xff] }
  0x74   :  { %3620 = vmatpush.xpose.msk.msrb.mxu2 %vm308_vm0, %v127_v51  ;;  %v209_v51 = vld [vmem:[%s7134_s0 + $0x5a8] sm:$0xff] }
  0x75   :  { %3640 = vmatpush.xpose.msk.msrb.mxu3 %vm308_vm0, %v143_v52  ;;  %v287_v52 = vld [vmem:[%s7137_s3 + $0x18] sm:$0xff] }
  0x76   :  { %3581 = vmatpush.xpose.msk.msrb.mxu0 %vm308_vm0, %v94_v55  ;;  %v192_v55 = vld [vmem:[%s7134_s0 + $0x520] sm:$0xff]  ;;  %305 = vperm.xlu0 %4130, %v287_v52   ;;  %v258_v52 = vld [vmem:[%s7134_s0 + $0x730] sm:$0xff] }
  0x77   :  { %3601 = vmatpush.xpose.msk.msrb.mxu1 %vm308_vm0, %v110_v56  ;;  %v208_v56 = vld [vmem:[%s7134_s0 + $0x5a0] sm:$0xff] }
  0x78   :  { %3621 = vmatpush.xpose.msk.msrb.mxu2 %vm308_vm0, %v126_v57  ;;  %v159_v57 = vld [vmem:[%s7134_s0 + $0x418] sm:$0xff] }
  0x79   :  { %3641 = vmatpush.xpose.msk.msrb.mxu3 %vm308_vm0, %v142_v58  ;;  %v175_v58 = vld [vmem:[%s7134_s0 + $0x498] sm:$0xff] }
  0x7a   :  { %3582 = vmatpush.xpose.msk.msrb.mxu0 %vm308_vm0, %v93_v59  ;;  %v191_v59 = vld [vmem:[%s7134_s0 + $0x518] sm:$0xff] }
  0x7b   :  { %3602 = vmatpush.xpose.msk.msrb.mxu1 %vm308_vm0, %v109_v60  ;;  %v207_v60 = vld [vmem:[%s7134_s0 + $0x598] sm:$0xff] }
  0x7c   :  { %3622 = vmatpush.xpose.msk.msrb.mxu2 %vm308_vm0, %v125_v61  ;;  %v158_v61 = vld [vmem:[%s7134_s0 + $0x410] sm:$0xff] }
  0x7d   :  { %3642 = vmatpush.xpose.msk.msrb.mxu3 %vm308_vm0, %v141_v62  ;;  %v174_v62 = vld [vmem:[%s7134_s0 + $0x490] sm:$0xff] }
  0x7e   :  { %3583 = vmatpush.xpose.msk.msrb.mxu0 %vm308_vm0, %v92_v63  ;;  %v190_v63 = vld [vmem:[%s7134_s0 + $0x510] sm:$0xff] }
  0x7f   :  { %3603 = vmatpush.xpose.msk.msrb.mxu1 %vm308_vm0, %v108_v0  ;;  %v206_v0 = vld [vmem:[%s7134_s0 + $0x590] sm:$0xff] }
  0x80   :  { %3623 = vmatpush.xpose.msk.msrb.mxu2 %vm308_vm0, %v124_v1  ;;  %v157_v1 = vld [vmem:[%s7134_s0 + $0x408] sm:$0xff] }
  0x81   :  { %3643 = vmatpush.xpose.msk.msrb.mxu3 %vm308_vm0, %v140_v2  ;;  %3584 = vmatmul.msk.f32.vlgmr.msrb.gmra.mxu0 %vm308_vm0, %v4593_v34  ;;  %v173_v2 = vld [vmem:[%s7134_s0 + $0x488] sm:$0xff] }
  0x82   :  { %3648 = vmatpush.xpose.msk.msra.mxu0 %vm308_vm0, %v171_v3  ;;  %3604 = vmatmul.msk.f32.vlgmr.msrb.gmra.mxu1 %vm308_vm0, %v4593_v34  ;;  %v189_v3 = vld [vmem:[%s7134_s0 + $0x508] sm:$0xff] }
  0x83   :  { %3668 = vmatpush.xpose.msk.msra.mxu1 %vm308_vm0, %v187_v4  ;;  %3624 = vmatmul.msk.f32.vlgmr.msrb.gmra.mxu2 %vm308_vm0, %v4593_v34  ;;  %v205_v4 = vld [vmem:[%s7134_s0 + $0x588] sm:$0xff] }
  0x84   :  { %3688 = vmatpush.xpose.msk.msra.mxu2 %vm308_vm0, %v203_v5  ;;  %3644 = vmatmul.msk.f32.vlgmr.msrb.gmra.mxu3 %vm308_vm0, %v4593_v34  ;;  %v286_v5 = vld [vmem:[%s7137_s3 + $0x10] sm:$0xff] }
  0x85   :  { %3708 = vmatpush.xpose.msk.msra.mxu3 %vm308_vm0, %v219_v6  ;;  %v156_v6 = vld [vmem:[%s7134_s0 + $0x400] sm:$0xff]  ;;  %300 = vperm.xlu2 %4132, %v286_v5   ;;  %v270_v5 = vld [vmem:[%s7134_s0 + $0x790] sm:$0xff] }
  0x86   :  { %3649 = vmatpush.xpose.msk.msra.mxu0 %vm308_vm0, %v170_v7  ;;  %v172_v7 = vld [vmem:[%s7134_s0 + $0x480] sm:$0xff] }
  0x87   :  { %3669 = vmatpush.xpose.msk.msra.mxu1 %vm308_vm0, %v186_v8  ;;  %v188_v8 = vld [vmem:[%s7134_s0 + $0x500] sm:$0xff] }
  0x88   :  { %3689 = vmatpush.xpose.msk.msra.mxu2 %vm308_vm0, %v202_v9  ;;  %v204_v9 = vld [vmem:[%s7134_s0 + $0x580] sm:$0xff] }
  0x89   :  { %3709 = vmatpush.xpose.msk.msra.mxu3 %vm308_vm0, %v218_v10  ;;  %3585 = vmatmul.msk.f32.gmra.mxu0 %vm308_vm0, %v4769_v13  ;;  %v235_v10 = vld [vmem:[%s7134_s0 + $0x678] sm:$0xff] }
  0x8a   :  { %3650 = vmatpush.xpose.msk.msra.mxu0 %vm308_vm0, %v169_v11  ;;  %3605 = vmatmul.msk.f32.gmra.mxu1 %vm308_vm0, %v4769_v13  ;;  %v251_v11 = vld [vmem:[%s7134_s0 + $0x6f8] sm:$0xff] }
  0x8b   :  { %3670 = vmatpush.xpose.msk.msra.mxu1 %vm308_vm0, %v185_v12  ;;  %3625 = vmatmul.msk.f32.gmra.mxu2 %vm308_vm0, %v4769_v13  ;;  %v267_v12 = vld [vmem:[%s7134_s0 + $0x778] sm:$0xff] }
  0x8c   :  { %3690 = vmatpush.xpose.msk.msra.mxu2 %vm308_vm0, %v201_v14  ;;  %3645 = vmatmul.msk.f32.gmra.mxu3 %vm308_vm0, %v4769_v13  ;;  %v283_v14 = vld [vmem:[%s7134_s0 + $0x7f8] sm:$0xff] }
  0x8d   :  { %3710 = vmatpush.xpose.msk.msra.mxu3 %vm308_vm0, %v217_v15  ;;  %v234_v15 = vld [vmem:[%s7134_s0 + $0x670] sm:$0xff] }
  0x8e   :  { %3651 = vmatpush.xpose.msk.msra.mxu0 %vm308_vm0, %v168_v16  ;;  %v250_v16 = vld [vmem:[%s7134_s0 + $0x6f0] sm:$0xff] }
  0x8f   :  { %3671 = vmatpush.xpose.msk.msra.mxu1 %vm308_vm0, %v184_v17  ;;  %v266_v17 = vld [vmem:[%s7134_s0 + $0x770] sm:$0xff] }
  0x90   :  { %3691 = vmatpush.xpose.msk.msra.mxu2 %vm308_vm0, %v200_v18  ;;  %v282_v18 = vld [vmem:[%s7134_s0 + $0x7f0] sm:$0xff] }
  0x91   :  { %3711 = vmatpush.xpose.msk.msra.mxu3 %vm308_vm0, %v216_v19  ;;  %3586 = vmatmul.msk.f32.gmra.mxu0 %vm308_vm0, %v4814_v22  ;;  %v233_v19 = vld [vmem:[%s7134_s0 + $0x668] sm:$0xff] }
  0x92   :  { %3652 = vmatpush.xpose.msk.msra.mxu0 %vm308_vm0, %v167_v20  ;;  %3606 = vmatmul.msk.f32.gmra.mxu1 %vm308_vm0, %v4814_v22  ;;  %v249_v20 = vld [vmem:[%s7134_s0 + $0x6e8] sm:$0xff] }
  0x93   :  { %3672 = vmatpush.xpose.msk.msra.mxu1 %vm308_vm0, %v183_v21  ;;  %3626 = vmatmul.msk.f32.gmra.mxu2 %vm308_vm0, %v4814_v22  ;;  %v265_v21 = vld [vmem:[%s7134_s0 + $0x768] sm:$0xff] }
  0x94   :  { %3692 = vmatpush.xpose.msk.msra.mxu2 %vm308_vm0, %v199_v23  ;;  %3646 = vmatmul.msk.f32.gmra.mxu3 %vm308_vm0, %v4814_v22  ;;  %v281_v23 = vld [vmem:[%s7134_s0 + $0x7e8] sm:$0xff] }
  0x95   :  { %3712 = vmatpush.xpose.msk.msra.mxu3 %vm308_vm0, %v215_v24  ;;  %v232_v24 = vld [vmem:[%s7134_s0 + $0x660] sm:$0xff] }
  0x96   :  { %3653 = vmatpush.xpose.msk.msra.mxu0 %vm308_vm0, %v166_v25  ;;  %v248_v25 = vld [vmem:[%s7134_s0 + $0x6e0] sm:$0xff] }
  0x97   :  { %3673 = vmatpush.xpose.msk.msra.mxu1 %vm308_vm0, %v182_v26  ;;  %v264_v26 = vld [vmem:[%s7134_s0 + $0x760] sm:$0xff] }
  0x98   :  { %3693 = vmatpush.xpose.msk.msra.mxu2 %vm308_vm0, %v198_v27  ;;  %v280_v27 = vld [vmem:[%s7134_s0 + $0x7e0] sm:$0xff] }
  0x99   :  { %3713 = vmatpush.xpose.msk.msra.mxu3 %vm308_vm0, %v214_v28  ;;  %3587 = vmatmul.msk.f32.gmra.mxu0 %vm308_vm0, %v4859_v31  ;;  %v231_v28 = vld [vmem:[%s7134_s0 + $0x658] sm:$0xff] }
  0x9a   :  { %3654 = vmatpush.xpose.msk.msra.mxu0 %vm308_vm0, %v165_v29  ;;  %3607 = vmatmul.msk.f32.gmra.mxu1 %vm308_vm0, %v4859_v31  ;;  %v247_v29 = vld [vmem:[%s7134_s0 + $0x6d8] sm:$0xff] }
  0x9b   :  { %3674 = vmatpush.xpose.msk.msra.mxu1 %vm308_vm0, %v181_v30  ;;  %3627 = vmatmul.msk.f32.gmra.mxu2 %vm308_vm0, %v4859_v31  ;;  %v263_v30 = vld [vmem:[%s7134_s0 + $0x758] sm:$0xff] }
  0x9c   :  { %3694 = vmatpush.xpose.msk.msra.mxu2 %vm308_vm0, %v197_v32  ;;  %3647 = vmatmul.msk.f32.gmra.mxu3 %vm308_vm0, %v4859_v31  ;;  %v279_v32 = vld [vmem:[%s7134_s0 + $0x7d8] sm:$0xff] }
  0x9d   :  { %3714 = vmatpush.xpose.msk.msra.mxu3 %vm308_vm0, %v213_v33  ;;  %v230_v33 = vld [vmem:[%s7134_s0 + $0x650] sm:$0xff] }
  0x9e   :  { %3655 = vmatpush.xpose.msk.msra.mxu0 %vm308_vm0, %v164_v36  ;;  %v262_v36 = vld [vmem:[%s7134_s0 + $0x750] sm:$0xff] }
  0x9f   :  { %3675 = vmatpush.xpose.msk.msra.mxu1 %vm308_vm0, %v180_v37  ;;  %v278_v37 = vld [vmem:[%s7134_s0 + $0x7d0] sm:$0xff] }
  0xa0   :  { %3695 = vmatpush.xpose.msk.msra.mxu2 %vm308_vm0, %v196_v38  ;;  %v229_v38 = vld [vmem:[%s7134_s0 + $0x648] sm:$0xff] }
  0xa1   :  { %3715 = vmatpush.xpose.msk.msra.mxu3 %vm308_vm0, %v212_v39  ;;  %v245_v39 = vld [vmem:[%s7134_s0 + $0x6c8] sm:$0xff] }
  0xa2   :  { %3656 = vmatpush.xpose.msk.msra.mxu0 %vm308_vm0, %v163_v40  ;;  %v261_v40 = vld [vmem:[%s7134_s0 + $0x748] sm:$0xff] }
  0xa3   :  { %3676 = vmatpush.xpose.msk.msra.mxu1 %vm308_vm0, %v179_v41  ;;  %v277_v41 = vld [vmem:[%s7134_s0 + $0x7c8] sm:$0xff] }
  0xa4   :  { %3696 = vmatpush.xpose.msk.msra.mxu2 %vm308_vm0, %v195_v42  ;;  %v228_v42 = vld [vmem:[%s7134_s0 + $0x640] sm:$0xff] }
  0xa5   :  { %3716 = vmatpush.xpose.msk.msra.mxu3 %vm308_vm0, %v211_v43  ;;  %v244_v43 = vld [vmem:[%s7134_s0 + $0x6c0] sm:$0xff] }
  0xa6   :  { %3657 = vmatpush.xpose.msk.msra.mxu0 %vm308_vm0, %v162_v44  ;;  %v260_v44 = vld [vmem:[%s7134_s0 + $0x740] sm:$0xff] }
  0xa7   :  { %3677 = vmatpush.xpose.msk.msra.mxu1 %vm308_vm0, %v178_v45  ;;  %v276_v45 = vld [vmem:[%s7134_s0 + $0x7c0] sm:$0xff] }
  0xa8   :  { %3697 = vmatpush.xpose.msk.msra.mxu2 %vm308_vm0, %v194_v46  ;;  %v227_v46 = vld [vmem:[%s7134_s0 + $0x638] sm:$0xff] }
  0xa9   :  { %3717 = vmatpush.xpose.msk.msra.mxu3 %vm308_vm0, %v210_v47  ;;  %v243_v47 = vld [vmem:[%s7134_s0 + $0x6b8] sm:$0xff] }
  0xaa   :  { %3658 = vmatpush.xpose.msk.msra.mxu0 %vm308_vm0, %v161_v48  ;;  %v259_v48 = vld [vmem:[%s7134_s0 + $0x738] sm:$0xff] }
  0xab   :  { %3678 = vmatpush.xpose.msk.msra.mxu1 %vm308_vm0, %v177_v49  ;;  %v275_v49 = vld [vmem:[%s7134_s0 + $0x7b8] sm:$0xff] }
  0xac   :  { %3698 = vmatpush.xpose.msk.msra.mxu2 %vm308_vm0, %v193_v50  ;;  %v226_v50 = vld [vmem:[%s7134_s0 + $0x630] sm:$0xff] }
  0xad   :  { %3718 = vmatpush.xpose.msk.msra.mxu3 %vm308_vm0, %v209_v51  ;;  %v242_v51 = vld [vmem:[%s7134_s0 + $0x6b0] sm:$0xff] }
  0xae   :  { %3659 = vmatpush.xpose.msk.msra.mxu0 %vm308_vm0, %v160_v53  ;;  %v274_v53 = vld [vmem:[%s7134_s0 + $0x7b0] sm:$0xff] }
  0xaf   :  { %3679 = vmatpush.xpose.msk.msra.mxu1 %vm308_vm0, %v176_v54  ;;  %v225_v54 = vld [vmem:[%s7134_s0 + $0x628] sm:$0xff] }
  0xb0   :  { %3699 = vmatpush.xpose.msk.msra.mxu2 %vm308_vm0, %v192_v55  ;;  %v241_v55 = vld [vmem:[%s7134_s0 + $0x6a8] sm:$0xff] }
  0xb1   :  { %3719 = vmatpush.xpose.msk.msra.mxu3 %vm308_vm0, %v208_v56  ;;  %v257_v56 = vld [vmem:[%s7134_s0 + $0x728] sm:$0xff] }
  0xb2   :  { %3660 = vmatpush.xpose.msk.msra.mxu0 %vm308_vm0, %v159_v57  ;;  %v273_v57 = vld [vmem:[%s7134_s0 + $0x7a8] sm:$0xff] }
  0xb3   :  { %3680 = vmatpush.xpose.msk.msra.mxu1 %vm308_vm0, %v175_v58  ;;  %v224_v58 = vld [vmem:[%s7134_s0 + $0x620] sm:$0xff] }
  0xb4   :  { %3700 = vmatpush.xpose.msk.msra.mxu2 %vm308_vm0, %v191_v59  ;;  %v240_v59 = vld [vmem:[%s7134_s0 + $0x6a0] sm:$0xff] }
  0xb5   :  { %3720 = vmatpush.xpose.msk.msra.mxu3 %vm308_vm0, %v207_v60  ;;  %v256_v60 = vld [vmem:[%s7134_s0 + $0x720] sm:$0xff] }
  0xb6   :  { %3661 = vmatpush.xpose.msk.msra.mxu0 %vm308_vm0, %v158_v61  ;;  %v272_v61 = vld [vmem:[%s7134_s0 + $0x7a0] sm:$0xff] }
  0xb7   :  { %3681 = vmatpush.xpose.msk.msra.mxu1 %vm308_vm0, %v174_v62  ;;  %v223_v62 = vld [vmem:[%s7134_s0 + $0x618] sm:$0xff] }
  0xb8   :  { %3701 = vmatpush.xpose.msk.msra.mxu2 %vm308_vm0, %v190_v63  ;;  %v239_v63 = vld [vmem:[%s7134_s0 + $0x698] sm:$0xff] }
  0xb9   :  { %3721 = vmatpush.xpose.msk.msra.mxu3 %vm308_vm0, %v206_v0  ;;  %v255_v0 = vld [vmem:[%s7134_s0 + $0x718] sm:$0xff] }
  0xba   :  { %3662 = vmatpush.xpose.msk.msra.mxu0 %vm308_vm0, %v157_v1  ;;  %v271_v1 = vld [vmem:[%s7134_s0 + $0x798] sm:$0xff] }
  0xbb   :  { %3682 = vmatpush.xpose.msk.msra.mxu1 %vm308_vm0, %v173_v2  ;;  %v222_v2 = vld [vmem:[%s7134_s0 + $0x610] sm:$0xff] }
  0xbc   :  { %3702 = vmatpush.xpose.msk.msra.mxu2 %vm308_vm0, %v189_v3  ;;  %v238_v3 = vld [vmem:[%s7134_s0 + $0x690] sm:$0xff] }
  0xbd   :  { %3722 = vmatpush.xpose.msk.msra.mxu3 %vm308_vm0, %v205_v4  ;;  %v254_v4 = vld [vmem:[%s7134_s0 + $0x710] sm:$0xff] }
  0xbe   :  { %3663 = vmatpush.xpose.msk.msra.mxu0 %vm308_vm0, %v156_v6  ;;  %v221_v6 = vld [vmem:[%s7134_s0 + $0x608] sm:$0xff] }
  0xbf   :  { %3683 = vmatpush.xpose.msk.msra.mxu1 %vm308_vm0, %v172_v7  ;;  %v237_v7 = vld [vmem:[%s7134_s0 + $0x688] sm:$0xff] }
  0xc0   :  { %3703 = vmatpush.xpose.msk.msra.mxu2 %vm308_vm0, %v188_v8  ;;  %v253_v8 = vld [vmem:[%s7134_s0 + $0x708] sm:$0xff] }
  0xc1   :  { %3723 = vmatpush.xpose.msk.msra.mxu3 %vm308_vm0, %v204_v9  ;;  %3664 = vmatmul.msk.f32.vlgmr.msra.gmra.mxu0 %vm308_vm0, %v4593_v34  ;;  %v269_v9 = vld [vmem:[%s7134_s0 + $0x788] sm:$0xff] }
  0xc2   :  { %3728 = vmatpush.xpose.msk.msrb.mxu0 %vm308_vm0, %v235_v10  ;;  %3684 = vmatmul.msk.f32.vlgmr.msra.gmra.mxu1 %vm308_vm0, %v4593_v34  ;;  %v220_v10 = vld [vmem:[%s7134_s0 + $0x600] sm:$0xff] }
  0xc3   :  { %3748 = vmatpush.xpose.msk.msrb.mxu1 %vm308_vm0, %v251_v11  ;;  %3704 = vmatmul.msk.f32.vlgmr.msra.gmra.mxu2 %vm308_vm0, %v4593_v34  ;;  %v236_v11 = vld [vmem:[%s7134_s0 + $0x680] sm:$0xff] }
  0xc4   :  { %3768 = vmatpush.xpose.msk.msrb.mxu2 %vm308_vm0, %v267_v12  ;;  %3724 = vmatmul.msk.f32.vlgmr.msra.gmra.mxu3 %vm308_vm0, %v4593_v34  ;;  %v252_v12 = vld [vmem:[%s7134_s0 + $0x700] sm:$0xff] }
  0xc5   :  { %3788 = vmatpush.xpose.msk.msrb.mxu3 %vm308_vm0, %v283_v14  ;;  %v268_v14 = vld [vmem:[%s7134_s0 + $0x780] sm:$0xff] }
  0xc6   :  { %3729 = vmatpush.xpose.msk.msrb.mxu0 %vm308_vm0, %v234_v15  ;;  %v1636_v15 = vld [vmem:[%s7135_s1 + $0x78] sm:$0xff] }
  0xc7   :  { %3749 = vmatpush.xpose.msk.msrb.mxu1 %vm308_vm0, %v250_v16  ;;  %v1652_v16 = vld [vmem:[%s7135_s1 + $0xf8] sm:$0xff] }
  0xc8   :  { %3769 = vmatpush.xpose.msk.msrb.mxu2 %vm308_vm0, %v266_v17  ;;  %v1668_v17 = vld [vmem:[%s7135_s1 + $0x178] sm:$0xff] }
  0xc9   :  { %3789 = vmatpush.xpose.msk.msrb.mxu3 %vm308_vm0, %v282_v18  ;;  %3665 = vmatmul.msk.f32.gmra.mxu0 %vm308_vm0, %v4769_v13  ;;  %v1684_v18 = vld [vmem:[%s7135_s1 + $0x1f8] sm:$0xff] }
  0xca   :  { %3730 = vmatpush.xpose.msk.msrb.mxu0 %vm308_vm0, %v233_v19  ;;  %3685 = vmatmul.msk.f32.gmra.mxu1 %vm308_vm0, %v4769_v13  ;;  %v1635_v19 = vld [vmem:[%s7135_s1 + $0x70] sm:$0xff] }
  0xcb   :  { %3750 = vmatpush.xpose.msk.msrb.mxu1 %vm308_vm0, %v249_v20  ;;  %3705 = vmatmul.msk.f32.gmra.mxu2 %vm308_vm0, %v4769_v13  ;;  %v1651_v20 = vld [vmem:[%s7135_s1 + $0xf0] sm:$0xff] }
  0xcc   :  { %3770 = vmatpush.xpose.msk.msrb.mxu2 %vm308_vm0, %v265_v21  ;;  %3725 = vmatmul.msk.f32.gmra.mxu3 %vm308_vm0, %v4769_v13  ;;  %v1667_v21 = vld [vmem:[%s7135_s1 + $0x170] sm:$0xff] }
  0xcd   :  { %3790 = vmatpush.xpose.msk.msrb.mxu3 %vm308_vm0, %v281_v23  ;;  %v1683_v23 = vld [vmem:[%s7135_s1 + $0x1f0] sm:$0xff] }
  0xce   :  { %3731 = vmatpush.xpose.msk.msrb.mxu0 %vm308_vm0, %v232_v24  ;;  %v1634_v24 = vld [vmem:[%s7135_s1 + $0x68] sm:$0xff] }
  0xcf   :  { %3751 = vmatpush.xpose.msk.msrb.mxu1 %vm308_vm0, %v248_v25  ;;  %v1650_v25 = vld [vmem:[%s7135_s1 + $0xe8] sm:$0xff] }
  0xd0   :  { %3771 = vmatpush.xpose.msk.msrb.mxu2 %vm308_vm0, %v264_v26  ;;  %v1682_v26 = vld [vmem:[%s7135_s1 + $0x1e8] sm:$0xff] }
  0xd1   :  { %3791 = vmatpush.xpose.msk.msrb.mxu3 %vm308_vm0, %v280_v27  ;;  %3666 = vmatmul.msk.f32.gmra.mxu0 %vm308_vm0, %v4814_v22  ;;  %v1633_v27 = vld [vmem:[%s7135_s1 + $0x60] sm:$0xff] }
  0xd2   :  { %3732 = vmatpush.xpose.msk.msrb.mxu0 %vm308_vm0, %v231_v28  ;;  %3686 = vmatmul.msk.f32.gmra.mxu1 %vm308_vm0, %v4814_v22  ;;  %v1649_v28 = vld [vmem:[%s7135_s1 + $0xe0] sm:$0xff] }
  0xd3   :  { %3752 = vmatpush.xpose.msk.msrb.mxu1 %vm308_vm0, %v247_v29  ;;  %3706 = vmatmul.msk.f32.gmra.mxu2 %vm308_vm0, %v4814_v22  ;;  %v1665_v29 = vld [vmem:[%s7135_s1 + $0x160] sm:$0xff] }
  0xd4   :  { %3772 = vmatpush.xpose.msk.msrb.mxu2 %vm308_vm0, %v263_v30  ;;  %3726 = vmatmul.msk.f32.gmra.mxu3 %vm308_vm0, %v4814_v22  ;;  %v1681_v30 = vld [vmem:[%s7135_s1 + $0x1e0] sm:$0xff] }
  0xd5   :  { %3792 = vmatpush.xpose.msk.msrb.mxu3 %vm308_vm0, %v279_v32  ;;  %v1632_v32 = vld [vmem:[%s7135_s1 + $0x58] sm:$0xff] }
  0xd6   :  { %3733 = vmatpush.xpose.msk.msrb.mxu0 %vm308_vm0, %v230_v33  ;;  %v1648_v33 = vld [vmem:[%s7135_s1 + $0xd8] sm:$0xff] }
  0xd7   :  { %3753 = vmatpush.xpose.msk.msrb.mxu1 %vm308_vm0, %v246_v35  ;;  %v1680_v35 = vld [vmem:[%s7135_s1 + $0x1d8] sm:$0xff] }
  0xd8   :  { %3773 = vmatpush.xpose.msk.msrb.mxu2 %vm308_vm0, %v262_v36  ;;  %v1631_v36 = vld [vmem:[%s7135_s1 + $0x50] sm:$0xff] }
  0xd9   :  { %3793 = vmatpush.xpose.msk.msrb.mxu3 %vm308_vm0, %v278_v37  ;;  %3667 = vmatmul.msk.f32.gmra.mxu0 %vm308_vm0, %v4859_v31  ;;  %v1647_v37 = vld [vmem:[%s7135_s1 + $0xd0] sm:$0xff] }
  0xda   :  { %3734 = vmatpush.xpose.msk.msrb.mxu0 %vm308_vm0, %v229_v38  ;;  %3687 = vmatmul.msk.f32.gmra.mxu1 %vm308_vm0, %v4859_v31  ;;  %v1663_v38 = vld [vmem:[%s7135_s1 + $0x150] sm:$0xff] }
  0xdb   :  { %3754 = vmatpush.xpose.msk.msrb.mxu1 %vm308_vm0, %v245_v39  ;;  %3707 = vmatmul.msk.f32.gmra.mxu2 %vm308_vm0, %v4859_v31  ;;  %v1679_v39 = vld [vmem:[%s7135_s1 + $0x1d0] sm:$0xff] }
  0xdc   :  { %3774 = vmatpush.xpose.msk.msrb.mxu2 %vm308_vm0, %v261_v40  ;;  %3727 = vmatmul.msk.f32.gmra.mxu3 %vm308_vm0, %v4859_v31  ;;  %v1630_v40 = vld [vmem:[%s7135_s1 + $0x48] sm:$0xff] }
  0xdd   :  { %3794 = vmatpush.xpose.msk.msrb.mxu3 %vm308_vm0, %v277_v41  ;;  %v1646_v41 = vld [vmem:[%s7135_s1 + $0xc8] sm:$0xff] }
  0xde   :  { %3735 = vmatpush.xpose.msk.msrb.mxu0 %vm308_vm0, %v228_v42  ;;  %v1678_v42 = vld [vmem:[%s7135_s1 + $0x1c8] sm:$0xff] }
  0xdf   :  { %3755 = vmatpush.xpose.msk.msrb.mxu1 %vm308_vm0, %v244_v43  ;;  %v1629_v43 = vld [vmem:[%s7135_s1 + $0x40] sm:$0xff] }
  0xe0   :  { %3775 = vmatpush.xpose.msk.msrb.mxu2 %vm308_vm0, %v260_v44  ;;  %v1645_v44 = vld [vmem:[%s7135_s1 + $0xc0] sm:$0xff] }
  0xe1   :  { %3795 = vmatpush.xpose.msk.msrb.mxu3 %vm308_vm0, %v276_v45  ;;  %v1661_v45 = vld [vmem:[%s7135_s1 + $0x140] sm:$0xff] }
  0xe2   :  { %3736 = vmatpush.xpose.msk.msrb.mxu0 %vm308_vm0, %v227_v46  ;;  %v1677_v46 = vld [vmem:[%s7135_s1 + $0x1c0] sm:$0xff] }
  0xe3   :  { %3756 = vmatpush.xpose.msk.msrb.mxu1 %vm308_vm0, %v243_v47  ;;  %v1628_v47 = vld [vmem:[%s7135_s1 + $0x38] sm:$0xff] }
  0xe4   :  { %3776 = vmatpush.xpose.msk.msrb.mxu2 %vm308_vm0, %v259_v48  ;;  %v1644_v48 = vld [vmem:[%s7135_s1 + $0xb8] sm:$0xff] }
  0xe5   :  { %3796 = vmatpush.xpose.msk.msrb.mxu3 %vm308_vm0, %v275_v49  ;;  %v1676_v49 = vld [vmem:[%s7135_s1 + $0x1b8] sm:$0xff] }
  0xe6   :  { %3737 = vmatpush.xpose.msk.msrb.mxu0 %vm308_vm0, %v226_v50  ;;  %v1627_v50 = vld [vmem:[%s7135_s1 + $0x30] sm:$0xff] }
  0xe7   :  { %3757 = vmatpush.xpose.msk.msrb.mxu1 %vm308_vm0, %v242_v51  ;;  %v1643_v51 = vld [vmem:[%s7135_s1 + $0xb0] sm:$0xff] }
  0xe8   :  { %3777 = vmatpush.xpose.msk.msrb.mxu2 %vm308_vm0, %v258_v52  ;;  %v1659_v52 = vld [vmem:[%s7135_s1 + $0x130] sm:$0xff] }
  0xe9   :  { %3797 = vmatpush.xpose.msk.msrb.mxu3 %vm308_vm0, %v274_v53  ;;  %v1675_v53 = vld [vmem:[%s7135_s1 + $0x1b0] sm:$0xff] }
  0xea   :  { %3738 = vmatpush.xpose.msk.msrb.mxu0 %vm308_vm0, %v225_v54  ;;  %v1626_v54 = vld [vmem:[%s7135_s1 + $0x28] sm:$0xff] }
  0xeb   :  { %3758 = vmatpush.xpose.msk.msrb.mxu1 %vm308_vm0, %v241_v55  ;;  %v1642_v55 = vld [vmem:[%s7135_s1 + $0xa8] sm:$0xff] }
  0xec   :  { %3778 = vmatpush.xpose.msk.msrb.mxu2 %vm308_vm0, %v257_v56  ;;  %v1658_v56 = vld [vmem:[%s7135_s1 + $0x128] sm:$0xff] }
  0xed   :  { %3798 = vmatpush.xpose.msk.msrb.mxu3 %vm308_vm0, %v273_v57  ;;  %v1674_v57 = vld [vmem:[%s7135_s1 + $0x1a8] sm:$0xff] }
  0xee   :  { %3739 = vmatpush.xpose.msk.msrb.mxu0 %vm308_vm0, %v224_v58  ;;  %v1625_v58 = vld [vmem:[%s7135_s1 + $0x20] sm:$0xff] }
  0xef   :  { %3759 = vmatpush.xpose.msk.msrb.mxu1 %vm308_vm0, %v240_v59  ;;  %v1641_v59 = vld [vmem:[%s7135_s1 + $0xa0] sm:$0xff] }
  0xf0   :  { %3779 = vmatpush.xpose.msk.msrb.mxu2 %vm308_vm0, %v256_v60  ;;  %v1657_v60 = vld [vmem:[%s7135_s1 + $0x120] sm:$0xff] }
  0xf1   :  { %3799 = vmatpush.xpose.msk.msrb.mxu3 %vm308_vm0, %v272_v61  ;;  %v1673_v61 = vld [vmem:[%s7135_s1 + $0x1a0] sm:$0xff] }
  0xf2   :  { %3740 = vmatpush.xpose.msk.msrb.mxu0 %vm308_vm0, %v223_v62  ;;  %v1877_v62 = vld [vmem:[%s7139_s5] sm:$0xff] }
  0xf3   :  { %3760 = vmatpush.xpose.msk.msrb.mxu1 %vm308_vm0, %v239_v63  ;;  %v1624_v63 = vld [vmem:[%s7135_s1 + $0x18] sm:$0xff]  ;;  %1883 = vperm.xlu1 %4131, %v1877_v62  }
  0xf4   :  { %3780 = vmatpush.xpose.msk.msrb.mxu2 %vm308_vm0, %v255_v0  ;;  %v1640_v0 = vld [vmem:[%s7135_s1 + $0x98] sm:$0xff] }
  0xf5   :  { %3800 = vmatpush.xpose.msk.msrb.mxu3 %vm308_vm0, %v271_v1  ;;  %v1656_v1 = vld [vmem:[%s7135_s1 + $0x118] sm:$0xff] }
  0xf6   :  { %3741 = vmatpush.xpose.msk.msrb.mxu0 %vm308_vm0, %v222_v2  ;;  %v1672_v2 = vld [vmem:[%s7135_s1 + $0x198] sm:$0xff] }
  0xf7   :  { %3761 = vmatpush.xpose.msk.msrb.mxu1 %vm308_vm0, %v238_v3  ;;  %v1623_v3 = vld [vmem:[%s7135_s1 + $0x10] sm:$0xff] }
  0xf8   :  { %3781 = vmatpush.xpose.msk.msrb.mxu2 %vm308_vm0, %v254_v4  ;;  %v1639_v4 = vld [vmem:[%s7135_s1 + $0x90] sm:$0xff] }
  0xf9   :  { %3801 = vmatpush.xpose.msk.msrb.mxu3 %vm308_vm0, %v270_v5  ;;  %v1655_v5 = vld [vmem:[%s7135_s1 + $0x110] sm:$0xff] }
  0xfa   :  { %3742 = vmatpush.xpose.msk.msrb.mxu0 %vm308_vm0, %v221_v6  ;;  %v1671_v6 = vld [vmem:[%s7135_s1 + $0x190] sm:$0xff] }
  0xfb   :  { %3762 = vmatpush.xpose.msk.msrb.mxu1 %vm308_vm0, %v237_v7  ;;  %v1878_v7 = vld [vmem:[%s7139_s5 + $0x8] sm:$0xff] }
  0xfc   :  { %3782 = vmatpush.xpose.msk.msrb.mxu2 %vm308_vm0, %v253_v8  ;;  %v1622_v8 = vld [vmem:[%s7135_s1 + $0x8] sm:$0xff]  ;;  %1888 = vperm.xlu1 %4131, %v1878_v7  }
  0xfd   :  { %3802 = vmatpush.xpose.msk.msrb.mxu3 %vm308_vm0, %v269_v9  ;;  %v1638_v9 = vld [vmem:[%s7135_s1 + $0x88] sm:$0xff] }
  0xfe   :  { %3743 = vmatpush.xpose.msk.msrb.mxu0 %vm308_vm0, %v220_v10  ;;  %v1654_v10 = vld [vmem:[%s7135_s1 + $0x108] sm:$0xff] }
  0xff   :  { %3763 = vmatpush.xpose.msk.msrb.mxu1 %vm308_vm0, %v236_v11  ;;  %v1670_v11 = vld [vmem:[%s7135_s1 + $0x188] sm:$0xff] }
 0x100   :  { %3783 = vmatpush.xpose.msk.msrb.mxu2 %vm308_vm0, %v252_v12  ;;  %v5628_v12 = vpop.f32.mrf.mxu0 }
 0x101   :  { %3803 = vmatpush.xpose.msk.msrb.mxu3 %vm308_vm0, %v268_v14  ;;  %3744 = vmatmul.msk.f32.vlgmr.msrb.gmra.mxu0 %vm308_vm0, %v4593_v34  ;;  %v5630_v14 = vpop.f32.mrf.mxu1 }
 0x102   :  { %3808 = vmatpush.xpose.msk.msra.mxu0 %vm308_vm0, %v1636_v15  ;;  %3764 = vmatmul.msk.f32.vlgmr.msrb.gmra.mxu1 %vm308_vm0, %v4593_v34  ;;  %v1621_v15 = vld [vmem:[%s7135_s1] sm:$0xff] }
 0x103   :  { %3828 = vmatpush.xpose.msk.msra.mxu1 %vm308_vm0, %v1652_v16  ;;  %3784 = vmatmul.msk.f32.vlgmr.msrb.gmra.mxu2 %vm308_vm0, %v4593_v34  ;;  %v1637_v16 = vld [vmem:[%s7135_s1 + $0x80] sm:$0xff] }
 0x104   :  { %3848 = vmatpush.xpose.msk.msra.mxu2 %vm308_vm0, %v1668_v17  ;;  %3804 = vmatmul.msk.f32.vlgmr.msrb.gmra.mxu3 %vm308_vm0, %v4593_v34  ;;  %v1666_v34 = vld [vmem:[%s7135_s1 + $0x168] sm:$0xff]  ;;  %v1653_v17 = vld [vmem:[%s7135_s1 + $0x100] sm:$0xff] }
 0x105   :  { %3868 = vmatpush.xpose.msk.msra.mxu3 %vm308_vm0, %v1684_v18  ;;  %v1669_v18 = vld [vmem:[%s7135_s1 + $0x180] sm:$0xff] }
 0x106   :  { %3809 = vmatpush.xpose.msk.msra.mxu0 %vm308_vm0, %v1635_v19  ;;  %v1700_v19 = vld [vmem:[%s7135_s1 + $0x278] sm:$0xff] }
 0x107   :  { %3829 = vmatpush.xpose.msk.msra.mxu1 %vm308_vm0, %v1651_v20  ;;  %v1716_v20 = vld [vmem:[%s7135_s1 + $0x2f8] sm:$0xff] }
 0x108   :  { %3849 = vmatpush.xpose.msk.msra.mxu2 %vm308_vm0, %v1667_v21  ;;  %v1732_v21 = vld [vmem:[%s7135_s1 + $0x378] sm:$0xff] }
 0x109   :  { %3869 = vmatpush.xpose.msk.msra.mxu3 %vm308_vm0, %v1683_v23  ;;  %3745 = vmatmul.msk.f32.gmra.mxu0 %vm308_vm0, %v4769_v13  ;;  %v1748_v23 = vld [vmem:[%s7135_s1 + $0x3f8] sm:$0xff] }
 0x10a   :  { %3810 = vmatpush.xpose.msk.msra.mxu0 %vm308_vm0, %v1634_v24  ;;  %3765 = vmatmul.msk.f32.gmra.mxu1 %vm308_vm0, %v4769_v13  ;;  %v5665_v24 = vld [vmem:[%s7138_s4] sm:$0xff] }
 0x10b   :  { %3830 = vmatpush.xpose.msk.msra.mxu1 %vm308_vm0, %v1650_v25  ;;  %3785 = vmatmul.msk.f32.gmra.mxu2 %vm308_vm0, %v4769_v13  ;;  %v5669_v25 = vpop.f32.mrf.mxu2 }
 0x10c   :  { %3850 = vmatpush.xpose.msk.msra.mxu2 %vm308_vm0, %v1666_v34  ;;  %3805 = vmatmul.msk.f32.gmra.mxu3 %vm308_vm0, %v4769_v13  ;;  %v1664_v13 = vld [vmem:[%s7135_s1 + $0x158] sm:$0xff]  ;;  %v1699_v34 = vld [vmem:[%s7135_s1 + $0x270] sm:$0xff] }
 0x10d   :  { %3870 = vmatpush.xpose.msk.msra.mxu3 %vm308_vm0, %v1682_v26  ;;  %v1715_v26 = vld [vmem:[%s7135_s1 + $0x2f0] sm:$0xff] }
 0x10e   :  { %3811 = vmatpush.xpose.msk.msra.mxu0 %vm308_vm0, %v1633_v27  ;;  %v5679_v27 = vpop.f32.mrf.mxu3 }
 0x10f   :  { %3831 = vmatpush.xpose.msk.msra.mxu1 %vm308_vm0, %v1649_v28  ;;  %v1731_v28 = vld [vmem:[%s7135_s1 + $0x370] sm:$0xff] }
 0x110   :  { %3851 = vmatpush.xpose.msk.msra.mxu2 %vm308_vm0, %v1665_v29  ;;  %v1747_v29 = vld [vmem:[%s7135_s1 + $0x3f0] sm:$0xff] }
 0x111   :  { %3871 = vmatpush.xpose.msk.msra.mxu3 %vm308_vm0, %v1681_v30  ;;  %3746 = vmatmul.msk.f32.gmra.mxu0 %vm308_vm0, %v4814_v22  ;;  %v5691_v30 = vpop.f32.mrf.mxu0 }
 0x112   :  { %3812 = vmatpush.xpose.msk.msra.mxu0 %vm308_vm0, %v1632_v32  ;;  %3766 = vmatmul.msk.f32.gmra.mxu1 %vm308_vm0, %v4814_v22  ;;  %v5693_v32 = vpop.f32.mrf.mxu1 }
 0x113   :  { %3832 = vmatpush.xpose.msk.msra.mxu1 %vm308_vm0, %v1648_v33  ;;  %3786 = vmatmul.msk.f32.gmra.mxu2 %vm308_vm0, %v4814_v22  ;;  %v1698_v33 = vld [vmem:[%s7135_s1 + $0x268] sm:$0xff] }
 0x114   :  { %3852 = vmatpush.xpose.msk.msra.mxu2 %vm308_vm0, %v1664_v13  ;;  %3806 = vmatmul.msk.f32.gmra.mxu3 %vm308_vm0, %v4814_v22  ;;  %v1662_v22 = vld [vmem:[%s7135_s1 + $0x148] sm:$0xff] }
 0x115   :  { %3872 = vmatpush.xpose.msk.msra.mxu3 %vm308_vm0, %v1680_v35  ;;  %v1714_v13 = vld [vmem:[%s7135_s1 + $0x2e8] sm:$0xff]  ;;  %v1880_v35 = vld [vmem:[%s7139_s5 + $0x18] sm:$0xff] }
 0x116   :  { %3813 = vmatpush.xpose.msk.msra.mxu0 %vm308_vm0, %v1631_v36  ;;  %v1730_v36 = vld [vmem:[%s7135_s1 + $0x368] sm:$0xff]  ;;  %1898 = vperm.xlu1 %4131, %v1880_v35   ;;  %v1721_v35 = vld [vmem:[%s7135_s1 + $0x320] sm:$0xff] }
 0x117   :  { %3833 = vmatpush.xpose.msk.msra.mxu1 %vm308_vm0, %v1647_v37  ;;  %v1746_v37 = vld [vmem:[%s7135_s1 + $0x3e8] sm:$0xff] }
 0x118   :  { %3853 = vmatpush.xpose.msk.msra.mxu2 %vm308_vm0, %v1663_v38  ;;  %v5721_v38 = vld [vmem:[%s7138_s4 + $0x8] sm:$0xff] }
 0x119   :  { %3873 = vmatpush.xpose.msk.msra.mxu3 %vm308_vm0, %v1679_v39  ;;  %3747 = vmatmul.msk.f32.gmra.mxu0 %vm308_vm0, %v4859_v31  ;;  %v5725_v39 = vpop.f32.mrf.mxu2 }
 0x11a   :  { %3814 = vmatpush.xpose.msk.msra.mxu0 %vm308_vm0, %v1630_v40  ;;  %3767 = vmatmul.msk.f32.gmra.mxu1 %vm308_vm0, %v4859_v31  ;;  %v1697_v40 = vld [vmem:[%s7135_s1 + $0x260] sm:$0xff] }
 0x11b   :  { %3834 = vmatpush.xpose.msk.msra.mxu1 %vm308_vm0, %v1646_v41  ;;  %3787 = vmatmul.msk.f32.gmra.mxu2 %vm308_vm0, %v4859_v31  ;;  %v1713_v41 = vld [vmem:[%s7135_s1 + $0x2e0] sm:$0xff] }
 0x11c   :  { %3854 = vmatpush.xpose.msk.msra.mxu2 %vm308_vm0, %v1662_v22  ;;  %3807 = vmatmul.msk.f32.gmra.mxu3 %vm308_vm0, %v4859_v31  ;;  %v1660_v31 = vld [vmem:[%s7135_s1 + $0x138] sm:$0xff]  ;;  %v5735_v22 = vpop.f32.mrf.mxu3 }
 0x11d   :  { %3874 = vmatpush.xpose.msk.msra.mxu3 %vm308_vm0, %v1678_v42  ;;  %v1729_v42 = vld [vmem:[%s7135_s1 + $0x360] sm:$0xff] }
 0x11e   :  { %3815 = vmatpush.xpose.msk.msra.mxu0 %vm308_vm0, %v1629_v43  ;;  %v1745_v43 = vld [vmem:[%s7135_s1 + $0x3e0] sm:$0xff] }
 0x11f   :  { %3835 = vmatpush.xpose.msk.msra.mxu1 %vm308_vm0, %v1645_v44  ;;  %v5753_v44 = vpop.f32.mrf.mxu0 }
 0x120   :  { %3855 = vmatpush.xpose.msk.msra.mxu2 %vm308_vm0, %v1661_v45  ;;  %v5755_v45 = vpop.f32.mrf.mxu1 }
 0x121   :  { %3875 = vmatpush.xpose.msk.msra.mxu3 %vm308_vm0, %v1677_v46  ;;  %v1696_v46 = vld [vmem:[%s7135_s1 + $0x258] sm:$0xff] }
 0x122   :  { %3816 = vmatpush.xpose.msk.msra.mxu0 %vm308_vm0, %v1628_v47  ;;  %v1712_v47 = vld [vmem:[%s7135_s1 + $0x2d8] sm:$0xff] }
 0x123   :  { %3836 = vmatpush.xpose.msk.msra.mxu1 %vm308_vm0, %v1644_v48  ;;  %v1728_v48 = vld [vmem:[%s7135_s1 + $0x358] sm:$0xff] }
 0x124   :  { %3856 = vmatpush.xpose.msk.msra.mxu2 %vm308_vm0, %v1660_v31  ;;  %v1744_v31 = vld [vmem:[%s7135_s1 + $0x3d8] sm:$0xff] }
 0x125   :  { %3876 = vmatpush.xpose.msk.msra.mxu3 %vm308_vm0, %v1676_v49  ;;  %v5774_v49 = vld [vmem:[%s7138_s4 + $0x10] sm:$0xff] }
 0x126   :  { %3817 = vmatpush.xpose.msk.msra.mxu0 %vm308_vm0, %v1627_v50  ;;  %v1695_v50 = vld [vmem:[%s7135_s1 + $0x250] sm:$0xff] }
 0x127   :  { %3837 = vmatpush.xpose.msk.msra.mxu1 %vm308_vm0, %v1643_v51  ;;  %v1711_v51 = vld [vmem:[%s7135_s1 + $0x2d0] sm:$0xff] }
 0x128   :  { %3857 = vmatpush.xpose.msk.msra.mxu2 %vm308_vm0, %v1659_v52  ;;  %v1727_v52 = vld [vmem:[%s7135_s1 + $0x350] sm:$0xff]  ;;  %v5825_v62 = vpop.f32.mrf.mxu1 }
 0x129   :  { %3877 = vmatpush.xpose.msk.msra.mxu3 %vm308_vm0, %v1675_v53  ;;  %v1743_v53 = vld [vmem:[%s7135_s1 + $0x3d0] sm:$0xff] }
 0x12a   :  { %3818 = vmatpush.xpose.msk.msra.mxu0 %vm308_vm0, %v1626_v54  ;;  %v5796_v54 = vpop.f32.mrf.mxu2 }
 0x12b   :  { %3838 = vmatpush.xpose.msk.msra.mxu1 %vm308_vm0, %v1642_v55  ;;  %v5802_v55 = vpop.f32.mrf.mxu3 }
 0x12c   :  { %3858 = vmatpush.xpose.msk.msra.mxu2 %vm308_vm0, %v1658_v56  ;;  %v1694_v56 = vld [vmem:[%s7135_s1 + $0x248] sm:$0xff] }
 0x12d   :  { %3878 = vmatpush.xpose.msk.msra.mxu3 %vm308_vm0, %v1674_v57  ;;  %v1710_v57 = vld [vmem:[%s7135_s1 + $0x2c8] sm:$0xff] }
 0x12e   :  { %3819 = vmatpush.xpose.msk.msra.mxu0 %vm308_vm0, %v1625_v58  ;;  %v1879_v58 = vld [vmem:[%s7139_s5 + $0x10] sm:$0xff] }
 0x12f   :  { %3839 = vmatpush.xpose.msk.msra.mxu1 %vm308_vm0, %v1641_v59  ;;  %v1726_v59 = vld [vmem:[%s7135_s1 + $0x348] sm:$0xff]  ;;  %1893 = vperm.xlu2 %4132, %v1879_v58  }
 0x130   :  { %3859 = vmatpush.xpose.msk.msra.mxu2 %vm308_vm0, %v1657_v60  ;;  %v1742_v60 = vld [vmem:[%s7135_s1 + $0x3c8] sm:$0xff] }
 0x131   :  { %3879 = vmatpush.xpose.msk.msra.mxu3 %vm308_vm0, %v1673_v61  ;;  %v5823_v61 = vpop.f32.mrf.mxu0  ;;  %v1734_v58 = vld [vmem:[%s7135_s1 + $0x388] sm:$0xff] }
 0x132   :  { %3820 = vmatpush.xpose.msk.msra.mxu0 %vm308_vm0, %v1624_v63  ;;  %v5830_v63 = vld [vmem:[%s7138_s4 + $0x18] sm:$0xff] }
 0x133   :  { %3840 = vmatpush.xpose.msk.msra.mxu1 %vm308_vm0, %v1640_v0  ;;  %v1693_v0 = vld [vmem:[%s7135_s1 + $0x240] sm:$0xff]  ;;  %v5868_v7 = vpop.f32.mrf.mxu3 }
 0x134   :  { %3860 = vmatpush.xpose.msk.msra.mxu2 %vm308_vm0, %v1656_v1  ;;  %v1709_v1 = vld [vmem:[%s7135_s1 + $0x2c0] sm:$0xff] }
 0x135   :  { %3880 = vmatpush.xpose.msk.msra.mxu3 %vm308_vm0, %v1672_v2  ;;  %v1725_v2 = vld [vmem:[%s7135_s1 + $0x340] sm:$0xff] }
 0x136   :  { %3821 = vmatpush.xpose.msk.msra.mxu0 %vm308_vm0, %v1623_v3  ;;  %v1741_v3 = vld [vmem:[%s7135_s1 + $0x3c0] sm:$0xff] }
 0x137   :  { %3841 = vmatpush.xpose.msk.msra.mxu1 %vm308_vm0, %v1639_v4  ;;  %v5858_v4 = vpop.f32.mrf.mxu2 }
 0x138   :  { %3861 = vmatpush.xpose.msk.msra.mxu2 %vm308_vm0, %v1655_v5  ;;  %v1692_v5 = vld [vmem:[%s7135_s1 + $0x238] sm:$0xff] }
 0x139   :  { %3881 = vmatpush.xpose.msk.msra.mxu3 %vm308_vm0, %v1671_v6  ;;  %v1708_v6 = vld [vmem:[%s7135_s1 + $0x2b8] sm:$0xff] }
 0x13a   :  { %3822 = vmatpush.xpose.msk.msra.mxu0 %vm308_vm0, %v1622_v8  ;;  %v1724_v8 = vld [vmem:[%s7135_s1 + $0x338] sm:$0xff] }
 0x13b   :  { %3842 = vmatpush.xpose.msk.msra.mxu1 %vm308_vm0, %v1638_v9  ;;  %v1740_v9 = vld [vmem:[%s7135_s1 + $0x3b8] sm:$0xff] }
 0x13c   :  { %3862 = vmatpush.xpose.msk.msra.mxu2 %vm308_vm0, %v1654_v10  ;;  %v5878_v10 = vpop.f32.mrf.mxu0 }
 0x13d   :  { %3882 = vmatpush.xpose.msk.msra.mxu3 %vm308_vm0, %v1670_v11  ;;  %v5880_v11 = vpop.f32.mrf.mxu1 }
 0x13e   :  { %3823 = vmatpush.xpose.msk.msra.mxu0 %vm308_vm0, %v1621_v15  ;;  %v1691_v15 = vld [vmem:[%s7135_s1 + $0x230] sm:$0xff] }
 0x13f   :  { %3843 = vmatpush.xpose.msk.msra.mxu1 %vm308_vm0, %v1637_v16  ;;  %v1707_v16 = vld [vmem:[%s7135_s1 + $0x2b0] sm:$0xff] }
 0x140   :  { %3863 = vmatpush.xpose.msk.msra.mxu2 %vm308_vm0, %v1653_v17  ;;  %v1723_v17 = vld [vmem:[%s7135_s1 + $0x330] sm:$0xff] }
 0x141   :  { %3883 = vmatpush.xpose.msk.msra.mxu3 %vm308_vm0, %v1669_v18  ;;  %3824 = vmatmul.msk.f32.vlgmr.msra.gmra.mxu0 %vm308_vm0, %v5665_v24  ;;  %v1739_v18 = vld [vmem:[%s7135_s1 + $0x3b0] sm:$0xff] }
 0x142   :  { %3888 = vmatpush.xpose.msk.msrb.mxu0 %vm308_vm0, %v1700_v19  ;;  %3844 = vmatmul.msk.f32.vlgmr.msra.gmra.mxu1 %vm308_vm0, %v5665_v24  ;;  %v1690_v19 = vld [vmem:[%s7135_s1 + $0x228] sm:$0xff] }
 0x143   :  { %3908 = vmatpush.xpose.msk.msrb.mxu1 %vm308_vm0, %v1716_v20  ;;  %3864 = vmatmul.msk.f32.vlgmr.msra.gmra.mxu2 %vm308_vm0, %v5665_v24  ;;  %v1706_v20 = vld [vmem:[%s7135_s1 + $0x2a8] sm:$0xff] }
 0x144   :  { %3928 = vmatpush.xpose.msk.msrb.mxu2 %vm308_vm0, %v1732_v21  ;;  %3884 = vmatmul.msk.f32.vlgmr.msra.gmra.mxu3 %vm308_vm0, %v5665_v24  ;;  %v1722_v21 = vld [vmem:[%s7135_s1 + $0x328] sm:$0xff] }
 0x145   :  { %3948 = vmatpush.xpose.msk.msrb.mxu3 %vm308_vm0, %v1748_v23  ;;  %v1738_v23 = vld [vmem:[%s7135_s1 + $0x3a8] sm:$0xff] }
 0x146   :  { %3889 = vmatpush.xpose.msk.msrb.mxu0 %vm308_vm0, %v1699_v34  ;;  %v5912_v34 = vpop.f32.mrf.mxu2 }
 0x147   :  { %3909 = vmatpush.xpose.msk.msrb.mxu1 %vm308_vm0, %v1715_v26  ;;  %v5914_v26 = vpop.f32.mrf.mxu3 }
 0x148   :  { %3929 = vmatpush.xpose.msk.msrb.mxu2 %vm308_vm0, %v1731_v28  ;;  %v5918_v28 = vpop.f32.mrf.mxu0 }
 0x149   :  { %3949 = vmatpush.xpose.msk.msrb.mxu3 %vm308_vm0, %v1747_v29  ;;  %3825 = vmatmul.msk.f32.gmra.mxu0 %vm308_vm0, %v5721_v38  ;;  %v5920_v29 = vpop.f32.mrf.mxu1 }
 0x14a   :  { %3890 = vmatpush.xpose.msk.msrb.mxu0 %vm308_vm0, %v1698_v33  ;;  %3845 = vmatmul.msk.f32.gmra.mxu1 %vm308_vm0, %v5721_v38  ;;  %v1689_v33 = vld [vmem:[%s7135_s1 + $0x220] sm:$0xff] }
 0x14b   :  { %3910 = vmatpush.xpose.msk.msrb.mxu1 %vm308_vm0, %v1714_v13  ;;  %3865 = vmatmul.msk.f32.gmra.mxu2 %vm308_vm0, %v5721_v38  ;;  %v1705_v13 = vld [vmem:[%s7135_s1 + $0x2a0] sm:$0xff] }
 0x14c   :  { %3930 = vmatpush.xpose.msk.msrb.mxu2 %vm308_vm0, %v1730_v36  ;;  %3885 = vmatmul.msk.f32.gmra.mxu3 %vm308_vm0, %v5721_v38  ;;  %v1737_v36 = vld [vmem:[%s7135_s1 + $0x3a0] sm:$0xff] }
 0x14d   :  { %3950 = vmatpush.xpose.msk.msrb.mxu3 %vm308_vm0, %v1746_v37  ;;  %v1688_v37 = vld [vmem:[%s7135_s1 + $0x218] sm:$0xff] }
 0x14e   :  { %3891 = vmatpush.xpose.msk.msrb.mxu0 %vm308_vm0, %v1697_v40  ;;  %v1704_v40 = vld [vmem:[%s7135_s1 + $0x298] sm:$0xff] }
 0x14f   :  { %3911 = vmatpush.xpose.msk.msrb.mxu1 %vm308_vm0, %v1713_v41  ;;  %v1720_v41 = vld [vmem:[%s7135_s1 + $0x318] sm:$0xff] }
 0x150   :  { %3931 = vmatpush.xpose.msk.msrb.mxu2 %vm308_vm0, %v1729_v42  ;;  %v1736_v42 = vld [vmem:[%s7135_s1 + $0x398] sm:$0xff] }
 0x151   :  { %3951 = vmatpush.xpose.msk.msrb.mxu3 %vm308_vm0, %v1745_v43  ;;  %3826 = vmatmul.msk.f32.gmra.mxu0 %vm308_vm0, %v5774_v49  ;;  %v5952_v43 = vpop.f32.mrf.mxu2 }
 0x152   :  { %3892 = vmatpush.xpose.msk.msrb.mxu0 %vm308_vm0, %v1696_v46  ;;  %3846 = vmatmul.msk.f32.gmra.mxu1 %vm308_vm0, %v5774_v49  ;;  %v5954_v46 = vpop.f32.mrf.mxu3 }
 0x153   :  { %3912 = vmatpush.xpose.msk.msrb.mxu1 %vm308_vm0, %v1712_v47  ;;  %3866 = vmatmul.msk.f32.gmra.mxu2 %vm308_vm0, %v5774_v49  ;;  %v1687_v47 = vld [vmem:[%s7135_s1 + $0x210] sm:$0xff] }
 0x154   :  { %3932 = vmatpush.xpose.msk.msrb.mxu2 %vm308_vm0, %v1728_v48  ;;  %3886 = vmatmul.msk.f32.gmra.mxu3 %vm308_vm0, %v5774_v49  ;;  %v1703_v48 = vld [vmem:[%s7135_s1 + $0x290] sm:$0xff] }
 0x155   :  { %3952 = vmatpush.xpose.msk.msrb.mxu3 %vm308_vm0, %v1744_v31  ;;  %v1719_v31 = vld [vmem:[%s7135_s1 + $0x310] sm:$0xff] }
 0x156   :  { %3893 = vmatpush.xpose.msk.msrb.mxu0 %vm308_vm0, %v1695_v50  ;;  %v1735_v50 = vld [vmem:[%s7135_s1 + $0x390] sm:$0xff] }
 0x157   :  { %3913 = vmatpush.xpose.msk.msrb.mxu1 %vm308_vm0, %v1711_v51  ;;  %v5972_v51 = vpop.f32.mrf.mxu0 }
 0x158   :  { %3933 = vmatpush.xpose.msk.msrb.mxu2 %vm308_vm0, %v1727_v52  ;;  %v5974_v52 = vpop.f32.mrf.mxu1 }
 0x159   :  { %3953 = vmatpush.xpose.msk.msrb.mxu3 %vm308_vm0, %v1743_v53  ;;  %3827 = vmatmul.msk.f32.gmra.mxu0 %vm308_vm0, %v5830_v63  ;;  %v1686_v53 = vld [vmem:[%s7135_s1 + $0x208] sm:$0xff] }
 0x15a   :  { %3894 = vmatpush.xpose.msk.msrb.mxu0 %vm308_vm0, %v1694_v56  ;;  %3847 = vmatmul.msk.f32.gmra.mxu1 %vm308_vm0, %v5830_v63  ;;  %v1702_v56 = vld [vmem:[%s7135_s1 + $0x288] sm:$0xff] }
 0x15b   :  { %3914 = vmatpush.xpose.msk.msrb.mxu1 %vm308_vm0, %v1710_v57  ;;  %3867 = vmatmul.msk.f32.gmra.mxu2 %vm308_vm0, %v5830_v63  ;;  %v1718_v57 = vld [vmem:[%s7135_s1 + $0x308] sm:$0xff] }
 0x15c   :  { %3934 = vmatpush.xpose.msk.msrb.mxu2 %vm308_vm0, %v1726_v59  ;;  %3887 = vmatmul.msk.f32.gmra.mxu3 %vm308_vm0, %v5830_v63  ;;  %v5994_v59 = vpop.f32.mrf.mxu2 }
 0x15d   :  { %3954 = vmatpush.xpose.msk.msrb.mxu3 %vm308_vm0, %v1742_v60  ;;  %v1685_v60 = vld [vmem:[%s7135_s1 + $0x200] sm:$0xff] }
 0x15e   :  { %3895 = vmatpush.xpose.msk.msrb.mxu0 %vm308_vm0, %v1693_v0  ;;  %v1701_v0 = vld [vmem:[%s7135_s1 + $0x280] sm:$0xff] }
 0x15f   :  { %3915 = vmatpush.xpose.msk.msrb.mxu1 %vm308_vm0, %v1709_v1  ;;  %v6004_v1 = vpop.f32.mrf.mxu3 }
 0x160   :  { %3935 = vmatpush.xpose.msk.msrb.mxu2 %vm308_vm0, %v1725_v2  ;;  %v1717_v2 = vld [vmem:[%s7135_s1 + $0x300] sm:$0xff] }
 0x161   :  { %3955 = vmatpush.xpose.msk.msrb.mxu3 %vm308_vm0, %v1741_v3  ;;  %v1733_v3 = vld [vmem:[%s7135_s1 + $0x380] sm:$0xff] }
 0x162   :  { %3896 = vmatpush.xpose.msk.msrb.mxu0 %vm308_vm0, %v1692_v5  ;;  %v1764_v5 = vld [vmem:[%s7135_s1 + $0x478] sm:$0xff] }
 0x163   :  { %3916 = vmatpush.xpose.msk.msrb.mxu1 %vm308_vm0, %v1708_v6  ;;  %v1780_v6 = vld [vmem:[%s7135_s1 + $0x4f8] sm:$0xff] }
 0x164   :  { %3936 = vmatpush.xpose.msk.msrb.mxu2 %vm308_vm0, %v1724_v8  ;;  %v1796_v8 = vld [vmem:[%s7135_s1 + $0x578] sm:$0xff] }
 0x165   :  { %3956 = vmatpush.xpose.msk.msrb.mxu3 %vm308_vm0, %v1740_v9  ;;  %v1812_v9 = vld [vmem:[%s7135_s1 + $0x5f8] sm:$0xff] }
 0x166   :  { %3897 = vmatpush.xpose.msk.msrb.mxu0 %vm308_vm0, %v1691_v15  ;;  %v6026_v15 = vpop.f32.mrf.mxu0 }
 0x167   :  { %3917 = vmatpush.xpose.msk.msrb.mxu1 %vm308_vm0, %v1707_v16  ;;  %v6028_v16 = vpop.f32.mrf.mxu1 }
 0x168   :  { %3937 = vmatpush.xpose.msk.msrb.mxu2 %vm308_vm0, %v1723_v17  ;;  %v1763_v17 = vld [vmem:[%s7135_s1 + $0x470] sm:$0xff] }
 0x169   :  { %3957 = vmatpush.xpose.msk.msrb.mxu3 %vm308_vm0, %v1739_v18  ;;  %v1779_v18 = vld [vmem:[%s7135_s1 + $0x4f0] sm:$0xff] }
 0x16a   :  { %3898 = vmatpush.xpose.msk.msrb.mxu0 %vm308_vm0, %v1690_v19  ;;  %v1795_v19 = vld [vmem:[%s7135_s1 + $0x570] sm:$0xff] }
 0x16b   :  { %3918 = vmatpush.xpose.msk.msrb.mxu1 %vm308_vm0, %v1706_v20  ;;  %v1811_v20 = vld [vmem:[%s7135_s1 + $0x5f0] sm:$0xff] }
 0x16c   :  { %3938 = vmatpush.xpose.msk.msrb.mxu2 %vm308_vm0, %v1722_v21  ;;  %v6058_v21 = vpop.f32.mrf.mxu2 }
 0x16d   :  { %3958 = vmatpush.xpose.msk.msrb.mxu3 %vm308_vm0, %v1738_v23  ;;  %v1762_v23 = vld [vmem:[%s7135_s1 + $0x468] sm:$0xff] }
 0x16e   :  { %3899 = vmatpush.xpose.msk.msrb.mxu0 %vm308_vm0, %v1689_v33  ;;  %v1778_v33 = vld [vmem:[%s7135_s1 + $0x4e8] sm:$0xff] }
 0x16f   :  { %3919 = vmatpush.xpose.msk.msrb.mxu1 %vm308_vm0, %v1705_v13  ;;  %v6068_v13 = vpop.f32.mrf.mxu3 }
 0x170   :  { %3939 = vmatpush.xpose.msk.msrb.mxu2 %vm308_vm0, %v1721_v35  ;;  %v1794_v35 = vld [vmem:[%s7135_s1 + $0x568] sm:$0xff] }
 0x171   :  { %3959 = vmatpush.xpose.msk.msrb.mxu3 %vm308_vm0, %v1737_v36  ;;  %v1810_v36 = vld [vmem:[%s7135_s1 + $0x5e8] sm:$0xff] }
 0x172   :  { %3900 = vmatpush.xpose.msk.msrb.mxu0 %vm308_vm0, %v1688_v37  ;;  %v6078_v37 = vpop.f32.mrf.mxu0 }
 0x173   :  { %3920 = vmatpush.xpose.msk.msrb.mxu1 %vm308_vm0, %v1704_v40  ;;  %7148 = vst [vmem:[#allocation5_spill] sm:$0xff] %v6078_v37  ;;  %v6080_v40 = vpop.f32.mrf.mxu1 }
 0x174   :  { %3940 = vmatpush.xpose.msk.msrb.mxu2 %vm308_vm0, %v1720_v41  ;;  %7149 = vst [vmem:[#allocation6_spill] sm:$0xff] %v6080_v40  ;;  %v1761_v41 = vld [vmem:[%s7135_s1 + $0x460] sm:$0xff] }
 0x175   :  { %3960 = vmatpush.xpose.msk.msrb.mxu3 %vm308_vm0, %v1736_v42  ;;  %v1777_v42 = vld [vmem:[%s7135_s1 + $0x4e0] sm:$0xff] }
 0x176   :  { %3901 = vmatpush.xpose.msk.msrb.mxu0 %vm308_vm0, %v1687_v47  ;;  %v1793_v47 = vld [vmem:[%s7135_s1 + $0x560] sm:$0xff] }
 0x177   :  { %3921 = vmatpush.xpose.msk.msrb.mxu1 %vm308_vm0, %v1703_v48  ;;  %v1809_v48 = vld [vmem:[%s7135_s1 + $0x5e0] sm:$0xff] }
 0x178   :  { %3941 = vmatpush.xpose.msk.msrb.mxu2 %vm308_vm0, %v1719_v31  ;;  %v1760_v31 = vld [vmem:[%s7135_s1 + $0x458] sm:$0xff] }
 0x179   :  { %3961 = vmatpush.xpose.msk.msrb.mxu3 %vm308_vm0, %v1735_v50  ;;  %v1776_v50 = vld [vmem:[%s7135_s1 + $0x4d8] sm:$0xff] }
 0x17a   :  { %3902 = vmatpush.xpose.msk.msrb.mxu0 %vm308_vm0, %v1686_v53  ;;  %v1792_v53 = vld [vmem:[%s7135_s1 + $0x558] sm:$0xff] }
 0x17b   :  { %3922 = vmatpush.xpose.msk.msrb.mxu1 %vm308_vm0, %v1702_v56  ;;  %v1808_v56 = vld [vmem:[%s7135_s1 + $0x5d8] sm:$0xff] }
 0x17c   :  { %3942 = vmatpush.xpose.msk.msrb.mxu2 %vm308_vm0, %v1718_v57  ;;  %v6120_v57 = vpop.f32.mrf.mxu2 }
 0x17d   :  { %3962 = vmatpush.xpose.msk.msrb.mxu3 %vm308_vm0, %v1734_v58  ;;  %7150 = vst [vmem:[#allocation7_spill] sm:$0xff] %v6120_v57  ;;  %v6122_v58 = vpop.f32.mrf.mxu3 }
 0x17e   :  { %3903 = vmatpush.xpose.msk.msrb.mxu0 %vm308_vm0, %v1685_v60  ;;  %7151 = vst [vmem:[#allocation8_spill] sm:$0xff] %v6122_v58  ;;  %v1759_v60 = vld [vmem:[%s7135_s1 + $0x450] sm:$0xff] }
 0x17f   :  { %3923 = vmatpush.xpose.msk.msrb.mxu1 %vm308_vm0, %v1701_v0  ;;  %v1775_v0 = vld [vmem:[%s7135_s1 + $0x4d0] sm:$0xff] }
 0x180   :  { %3943 = vmatpush.xpose.msk.msrb.mxu2 %vm308_vm0, %v1717_v2  ;;  %v1791_v2 = vld [vmem:[%s7135_s1 + $0x550] sm:$0xff] }
 0x181   :  { %3963 = vmatpush.xpose.msk.msrb.mxu3 %vm308_vm0, %v1733_v3  ;;  %3904 = vmatmul.msk.f32.vlgmr.msrb.gmra.mxu0 %vm308_vm0, %v5665_v24  ;;  %v1807_v3 = vld [vmem:[%s7135_s1 + $0x5d0] sm:$0xff] }
 0x182   :  { %3968 = vmatpush.xpose.msk.msra.mxu0 %vm308_vm0, %v1764_v5  ;;  %3924 = vmatmul.msk.f32.vlgmr.msrb.gmra.mxu1 %vm308_vm0, %v5665_v24  ;;  %v6144_v5 = vpop.f32.mrf.mxu0 }
 0x183   :  { %3988 = vmatpush.xpose.msk.msra.mxu1 %vm308_vm0, %v1780_v6  ;;  %3944 = vmatmul.msk.f32.vlgmr.msrb.gmra.mxu2 %vm308_vm0, %v5665_v24  ;;  %7152 = vst [vmem:[#allocation9_spill] sm:$0xff] %v6144_v5  ;;  %v6146_v6 = vpop.f32.mrf.mxu1 }
 0x184   :  { %4008 = vmatpush.xpose.msk.msra.mxu2 %vm308_vm0, %v1796_v8  ;;  %3964 = vmatmul.msk.f32.vlgmr.msrb.gmra.mxu3 %vm308_vm0, %v5665_v24  ;;  %7153 = vst [vmem:[#allocation10_spill] sm:$0xff] %v6146_v6  ;;  %v1758_v8 = vld [vmem:[%s7135_s1 + $0x448] sm:$0xff] }
 0x185   :  { %4028 = vmatpush.xpose.msk.msra.mxu3 %vm308_vm0, %v1812_v9  ;;  %v1774_v9 = vld [vmem:[%s7135_s1 + $0x4c8] sm:$0xff] }
 0x186   :  { %3969 = vmatpush.xpose.msk.msra.mxu0 %vm308_vm0, %v1763_v17  ;;  %v1790_v17 = vld [vmem:[%s7135_s1 + $0x548] sm:$0xff] }
 0x187   :  { %3989 = vmatpush.xpose.msk.msra.mxu1 %vm308_vm0, %v1779_v18  ;;  %v1806_v18 = vld [vmem:[%s7135_s1 + $0x5c8] sm:$0xff] }
 0x188   :  { %4009 = vmatpush.xpose.msk.msra.mxu2 %vm308_vm0, %v1795_v19  ;;  %v6170_v19 = vpop.f32.mrf.mxu2 }
 0x189   :  { %4029 = vmatpush.xpose.msk.msra.mxu3 %vm308_vm0, %v1811_v20  ;;  %3905 = vmatmul.msk.f32.gmra.mxu0 %vm308_vm0, %v5721_v38  ;;  %7154 = vst [vmem:[#allocation11_spill] sm:$0xff] %v6170_v19  ;;  %v1757_v20 = vld [vmem:[%s7135_s1 + $0x440] sm:$0xff] }
 0x18a   :  { %3970 = vmatpush.xpose.msk.msra.mxu0 %vm308_vm0, %v1762_v23  ;;  %3925 = vmatmul.msk.f32.gmra.mxu1 %vm308_vm0, %v5721_v38  ;;  %v1773_v23 = vld [vmem:[%s7135_s1 + $0x4c0] sm:$0xff] }
 0x18b   :  { %3990 = vmatpush.xpose.msk.msra.mxu1 %vm308_vm0, %v1778_v33  ;;  %3945 = vmatmul.msk.f32.gmra.mxu2 %vm308_vm0, %v5721_v38  ;;  %v6180_v33 = vpop.f32.mrf.mxu3  ;;  %v1861_v19 = vld [vmem:[%s7135_s1 + $0x780] sm:$0xff] }
 0x18c   :  { %4010 = vmatpush.xpose.msk.msra.mxu2 %vm308_vm0, %v1794_v35  ;;  %3965 = vmatmul.msk.f32.gmra.mxu3 %vm308_vm0, %v5721_v38  ;;  %7155 = vst [vmem:[#allocation12_spill] sm:$0xff] %v6180_v33  ;;  %v1789_v35 = vld [vmem:[%s7135_s1 + $0x540] sm:$0xff] }
 0x18d   :  { %4030 = vmatpush.xpose.msk.msra.mxu3 %vm308_vm0, %v1810_v36  ;;  %v1805_v36 = vld [vmem:[%s7135_s1 + $0x5c0] sm:$0xff] }
 0x18e   :  { %3971 = vmatpush.xpose.msk.msra.mxu0 %vm308_vm0, %v1761_v41  ;;  %v6198_v41 = vpop.f32.mrf.mxu0 }
 0x18f   :  { %3991 = vmatpush.xpose.msk.msra.mxu1 %vm308_vm0, %v1777_v42  ;;  %7156 = vst [vmem:[#allocation13_spill] sm:$0xff] %v6198_v41  ;;  %v6200_v42 = vpop.f32.mrf.mxu1  ;;  %v1862_v41 = vld [vmem:[%s7135_s1 + $0x788] sm:$0xff] }
 0x190   :  { %4011 = vmatpush.xpose.msk.msra.mxu2 %vm308_vm0, %v1793_v47  ;;  %7157 = vst [vmem:[#allocation14_spill] sm:$0xff] %v6200_v42  ;;  %v1756_v47 = vld [vmem:[%s7135_s1 + $0x438] sm:$0xff] }
 0x191   :  { %4031 = vmatpush.xpose.msk.msra.mxu3 %vm308_vm0, %v1809_v48  ;;  %3906 = vmatmul.msk.f32.gmra.mxu0 %vm308_vm0, %v5774_v49  ;;  %v1772_v48 = vld [vmem:[%s7135_s1 + $0x4b8] sm:$0xff] }
 0x192   :  { %3972 = vmatpush.xpose.msk.msra.mxu0 %vm308_vm0, %v1760_v31  ;;  %3926 = vmatmul.msk.f32.gmra.mxu1 %vm308_vm0, %v5774_v49  ;;  %v1788_v31 = vld [vmem:[%s7135_s1 + $0x538] sm:$0xff] }
 0x193   :  { %3992 = vmatpush.xpose.msk.msra.mxu1 %vm308_vm0, %v1776_v50  ;;  %3946 = vmatmul.msk.f32.gmra.mxu2 %vm308_vm0, %v5774_v49  ;;  %v1804_v50 = vld [vmem:[%s7135_s1 + $0x5b8] sm:$0xff] }
 0x194   :  { %4012 = vmatpush.xpose.msk.msra.mxu2 %vm308_vm0, %v1792_v53  ;;  %3966 = vmatmul.msk.f32.gmra.mxu3 %vm308_vm0, %v5774_v49  ;;  %v1755_v53 = vld [vmem:[%s7135_s1 + $0x430] sm:$0xff] }
 0x195   :  { %4032 = vmatpush.xpose.msk.msra.mxu3 %vm308_vm0, %v1808_v56  ;;  %v1771_v56 = vld [vmem:[%s7135_s1 + $0x4b0] sm:$0xff] }
 0x196   :  { %3973 = vmatpush.xpose.msk.msra.mxu0 %vm308_vm0, %v1759_v60  ;;  %v1787_v60 = vld [vmem:[%s7135_s1 + $0x530] sm:$0xff] }
 0x197   :  { %3993 = vmatpush.xpose.msk.msra.mxu1 %vm308_vm0, %v1775_v0  ;;  %v1803_v0 = vld [vmem:[%s7135_s1 + $0x5b0] sm:$0xff] }
 0x198   :  { %4013 = vmatpush.xpose.msk.msra.mxu2 %vm308_vm0, %v1791_v2  ;;  %v6232_v2 = vpop.f32.mrf.mxu2 }
 0x199   :  { %4033 = vmatpush.xpose.msk.msra.mxu3 %vm308_vm0, %v1807_v3  ;;  %3907 = vmatmul.msk.f32.gmra.mxu0 %vm308_vm0, %v5830_v63  ;;  %7158 = vst [vmem:[#allocation15_spill] sm:$0xff] %v6232_v2  ;;  %v6234_v3 = vpop.f32.mrf.mxu3 }
 0x19a   :  { %3974 = vmatpush.xpose.msk.msra.mxu0 %vm308_vm0, %v1758_v8  ;;  %3927 = vmatmul.msk.f32.gmra.mxu1 %vm308_vm0, %v5830_v63  ;;  %7159 = vst [vmem:[#allocation16_spill] sm:$0xff] %v6234_v3  ;;  %v1754_v8 = vld [vmem:[%s7135_s1 + $0x428] sm:$0xff]  ;;  %v6670_v3 = vpop.permute.xlu2 %300 }
 0x19b   :  { %3994 = vmatpush.xpose.msk.msra.mxu1 %vm308_vm0, %v1774_v9  ;;  %3947 = vmatmul.msk.f32.gmra.mxu2 %vm308_vm0, %v5830_v63  ;;  %v1770_v9 = vld [vmem:[%s7135_s1 + $0x4a8] sm:$0xff]  ;;  %v6729_v58 = vadd.f32 %v5802_v55, %v6670_v3  ;;  %v6864_v6 = vadd.f32 %v5994_v59, %v6670_v3 }
 0x19c   :  { %4014 = vmatpush.xpose.msk.msra.mxu2 %vm308_vm0, %v1790_v17  ;;  %3967 = vmatmul.msk.f32.gmra.mxu3 %vm308_vm0, %v5830_v63  ;;  %v1786_v17 = vld [vmem:[%s7135_s1 + $0x528] sm:$0xff] }
 0x19d   :  { %4034 = vmatpush.xpose.msk.msra.mxu3 %vm308_vm0, %v1806_v18  ;;  %v1802_v18 = vld [vmem:[%s7135_s1 + $0x5a8] sm:$0xff] }
 0x19e   :  { %3975 = vmatpush.xpose.msk.msra.mxu0 %vm308_vm0, %v1757_v20  ;;  %v6252_v20 = vpop.f32.mrf.mxu0 }
 0x19f   :  { %3995 = vmatpush.xpose.msk.msra.mxu1 %vm308_vm0, %v1773_v23  ;;  %7160 = vst [vmem:[#allocation17_spill] sm:$0xff] %v6252_v20  ;;  %v6254_v23 = vpop.f32.mrf.mxu1 }
 0x1a0   :  { %4015 = vmatpush.xpose.msk.msra.mxu2 %vm308_vm0, %v1789_v35  ;;  %7161 = vst [vmem:[#allocation18_spill] sm:$0xff] %v6254_v23  ;;  %v1753_v35 = vld [vmem:[%s7135_s1 + $0x420] sm:$0xff]  ;;  %v1831_v23 = vld [vmem:[%s7135_s1 + $0x690] sm:$0xff] }
 0x1a1   :  { %4035 = vmatpush.xpose.msk.msra.mxu3 %vm308_vm0, %v1805_v36  ;;  %v1769_v36 = vld [vmem:[%s7135_s1 + $0x4a0] sm:$0xff] }
 0x1a2   :  { %3976 = vmatpush.xpose.msk.msra.mxu0 %vm308_vm0, %v1756_v47  ;;  %v1785_v47 = vld [vmem:[%s7135_s1 + $0x520] sm:$0xff] }
 0x1a3   :  { %3996 = vmatpush.xpose.msk.msra.mxu1 %vm308_vm0, %v1772_v48  ;;  %v1801_v48 = vld [vmem:[%s7135_s1 + $0x5a0] sm:$0xff] }
 0x1a4   :  { %4016 = vmatpush.xpose.msk.msra.mxu2 %vm308_vm0, %v1788_v31  ;;  %v6274_v31 = vpop.f32.mrf.mxu2 }
 0x1a5   :  { %4036 = vmatpush.xpose.msk.msra.mxu3 %vm308_vm0, %v1804_v50  ;;  %7162 = vst [vmem:[#allocation19_spill] sm:$0xff] %v6274_v31  ;;  %v1752_v50 = vld [vmem:[%s7135_s1 + $0x418] sm:$0xff]  ;;  %v1815_v31 = vld [vmem:[%s7135_s1 + $0x610] sm:$0xff] }
 0x1a6   :  { %3977 = vmatpush.xpose.msk.msra.mxu0 %vm308_vm0, %v1755_v53  ;;  %v1768_v53 = vld [vmem:[%s7135_s1 + $0x498] sm:$0xff] }
 0x1a7   :  { %3997 = vmatpush.xpose.msk.msra.mxu1 %vm308_vm0, %v1771_v56  ;;  %v6284_v56 = vpop.f32.mrf.mxu3 }
 0x1a8   :  { %4017 = vmatpush.xpose.msk.msra.mxu2 %vm308_vm0, %v1787_v60  ;;  %7163 = vst [vmem:[#allocation20_spill] sm:$0xff] %v6284_v56  ;;  %v1784_v60 = vld [vmem:[%s7135_s1 + $0x518] sm:$0xff]  ;;  %v6626_v56 = vpop.permute.xlu1 %1883 }
 0x1a9   :  { %4037 = vmatpush.xpose.msk.msra.mxu3 %vm308_vm0, %v1803_v0  ;;  %v1800_v0 = vld [vmem:[%s7135_s1 + $0x598] sm:$0xff] }
 0x1aa   :  { %3978 = vmatpush.xpose.msk.msra.mxu0 %vm308_vm0, %v1754_v8  ;;  %v6294_v8 = vpop.f32.mrf.mxu0 }
 0x1ab   :  { %3998 = vmatpush.xpose.msk.msra.mxu1 %vm308_vm0, %v1770_v9  ;;  %7164 = vst [vmem:[#allocation21_spill] sm:$0xff] %v6294_v8  ;;  %v6296_v9 = vpop.f32.mrf.mxu1  ;;  %v1832_v8 = vld [vmem:[%s7135_s1 + $0x698] sm:$0xff] }
 0x1ac   :  { %4018 = vmatpush.xpose.msk.msra.mxu2 %vm308_vm0, %v1786_v17  ;;  %7165 = vst [vmem:[#allocation22_spill] sm:$0xff] %v6296_v9  ;;  %v1751_v17 = vld [vmem:[%s7135_s1 + $0x410] sm:$0xff]  ;;  %v1816_v9 = vld [vmem:[%s7135_s1 + $0x618] sm:$0xff] }
 0x1ad   :  { %4038 = vmatpush.xpose.msk.msra.mxu3 %vm308_vm0, %v1802_v18  ;;  %v1767_v18 = vld [vmem:[%s7135_s1 + $0x490] sm:$0xff] }
 0x1ae   :  { %3979 = vmatpush.xpose.msk.msra.mxu0 %vm308_vm0, %v1753_v35  ;;  %v1783_v35 = vld [vmem:[%s7135_s1 + $0x510] sm:$0xff] }
 0x1af   :  { %3999 = vmatpush.xpose.msk.msra.mxu1 %vm308_vm0, %v1769_v36  ;;  %v1799_v36 = vld [vmem:[%s7135_s1 + $0x590] sm:$0xff] }
 0x1b0   :  { %4019 = vmatpush.xpose.msk.msra.mxu2 %vm308_vm0, %v1785_v47  ;;  %v1750_v47 = vld [vmem:[%s7135_s1 + $0x408] sm:$0xff]  ;;  %v6739_v33 = vpop.permute.xlu1 %1888 }
 0x1b1   :  { %4039 = vmatpush.xpose.msk.msra.mxu3 %vm308_vm0, %v1801_v48  ;;  %v1766_v48 = vld [vmem:[%s7135_s1 + $0x488] sm:$0xff] }
 0x1b2   :  { %3980 = vmatpush.xpose.msk.msra.mxu0 %vm308_vm0, %v1752_v50  ;;  %v1782_v50 = vld [vmem:[%s7135_s1 + $0x508] sm:$0xff] }
 0x1b3   :  { %4000 = vmatpush.xpose.msk.msra.mxu1 %vm308_vm0, %v1768_v53  ;;  %v1798_v53 = vld [vmem:[%s7135_s1 + $0x588] sm:$0xff] }
 0x1b4   :  { %4020 = vmatpush.xpose.msk.msra.mxu2 %vm308_vm0, %v1784_v60  ;;  %v6328_v60 = vpop.f32.mrf.mxu2 }
 0x1b5   :  { %4040 = vmatpush.xpose.msk.msra.mxu3 %vm308_vm0, %v1800_v0  ;;  %7166 = vst [vmem:[#allocation23_spill] sm:$0xff] %v6328_v60  ;;  %v6330_v0 = vpop.f32.mrf.mxu3  ;;  %v1876_v60 = vld [vmem:[%s7135_s1 + $0x7f8] sm:$0xff] }
 0x1b6   :  { %3981 = vmatpush.xpose.msk.msra.mxu0 %vm308_vm0, %v1751_v17  ;;  %7167 = vst [vmem:[#allocation24_spill] sm:$0xff] %v6330_v0  ;;  %v1749_v17 = vld [vmem:[%s7135_s1 + $0x400] sm:$0xff]  ;;  %v1860_v0 = vld [vmem:[%s7135_s1 + $0x778] sm:$0xff] }
 0x1b7   :  { %4001 = vmatpush.xpose.msk.msra.mxu1 %vm308_vm0, %v1767_v18  ;;  %v1765_v18 = vld [vmem:[%s7135_s1 + $0x480] sm:$0xff] }
 0x1b8   :  { %4021 = vmatpush.xpose.msk.msra.mxu2 %vm308_vm0, %v1783_v35  ;;  %v1781_v35 = vld [vmem:[%s7135_s1 + $0x500] sm:$0xff] }
 0x1b9   :  { %4041 = vmatpush.xpose.msk.msra.mxu3 %vm308_vm0, %v1799_v36  ;;  %v1797_v36 = vld [vmem:[%s7135_s1 + $0x580] sm:$0xff] }
 0x1ba   :  { %3982 = vmatpush.xpose.msk.msra.mxu0 %vm308_vm0, %v1750_v47  ;;  %v6348_v47 = vpop.f32.mrf.mxu0 }
 0x1bb   :  { %4002 = vmatpush.xpose.msk.msra.mxu1 %vm308_vm0, %v1766_v48  ;;  %7168 = vst [vmem:[#allocation25_spill] sm:$0xff] %v6348_v47  ;;  %v6350_v48 = vpop.f32.mrf.mxu1  ;;  %v1849_v47 = vld [vmem:[%s7135_s1 + $0x720] sm:$0xff] }
 0x1bc   :  { %4022 = vmatpush.xpose.msk.msra.mxu2 %vm308_vm0, %v1782_v50  ;;  %7169 = vst [vmem:[#allocation26_spill] sm:$0xff] %v6350_v48  ;;  %v1828_v50 = vld [vmem:[%s7135_s1 + $0x678] sm:$0xff]  ;;  %v1834_v48 = vld [vmem:[%s7135_s1 + $0x6a8] sm:$0xff] }
 0x1bd   :  { %4042 = vmatpush.xpose.msk.msra.mxu3 %vm308_vm0, %v1798_v53  ;;  %v1844_v53 = vld [vmem:[%s7135_s1 + $0x6f8] sm:$0xff] }
 0x1be   :  { %3983 = vmatpush.xpose.msk.msra.mxu0 %vm308_vm0, %v1749_v17  ;;  %v1827_v17 = vld [vmem:[%s7135_s1 + $0x670] sm:$0xff] }
 0x1bf   :  { %4003 = vmatpush.xpose.msk.msra.mxu1 %vm308_vm0, %v1765_v18  ;;  %v1843_v18 = vld [vmem:[%s7135_s1 + $0x6f0] sm:$0xff] }
 0x1c0   :  { %4023 = vmatpush.xpose.msk.msra.mxu2 %vm308_vm0, %v1781_v35  ;;  %v6388_v35 = vpop.f32.mrf.mxu2 }
 0x1c1   :  { %4043 = vmatpush.xpose.msk.msra.mxu3 %vm308_vm0, %v1797_v36  ;;  %3984 = vmatmul.msk.f32.vlgmr.msra.gmra.mxu0 %vm308_vm0, %v5665_v24  ;;  %7170 = vst [vmem:[#allocation27_spill] sm:$0xff] %v6388_v35  ;;  %v6394_v36 = vpop.f32.mrf.mxu3  ;;  %v1818_v35 = vld [vmem:[%s7135_s1 + $0x628] sm:$0xff] }
 0x1c2   :  { %4048 = vmatpush.xpose.msk.msrb.mxu0 %vm308_vm0, %v1828_v50  ;;  %4004 = vmatmul.msk.f32.vlgmr.msra.gmra.mxu1 %vm308_vm0, %v5665_v24  ;;  %7171 = vst [vmem:[#allocation28_spill] sm:$0xff] %v6394_v36  ;;  %v1826_v50 = vld [vmem:[%s7135_s1 + $0x668] sm:$0xff]  ;;  %v1841_v36 = vld [vmem:[%s7135_s1 + $0x6e0] sm:$0xff] }
 0x1c3   :  { %4068 = vmatpush.xpose.msk.msrb.mxu1 %vm308_vm0, %v1844_v53  ;;  %4024 = vmatmul.msk.f32.vlgmr.msra.gmra.mxu2 %vm308_vm0, %v5665_v24  ;;  %v1842_v53 = vld [vmem:[%s7135_s1 + $0x6e8] sm:$0xff] }
 0x1c4   :  { %4088 = vmatpush.xpose.msk.msrb.mxu2 %vm308_vm0, %v1860_v0  ;;  %v1859_v0 = vld [vmem:[%s7135_s1 + $0x770] sm:$0xff]  ;;  %4044 = vmatmul.msk.f32.vlgmr.msra.gmra.mxu3 %vm308_vm0, %v5665_v24  ;;  %v1858_v24 = vld [vmem:[%s7135_s1 + $0x768] sm:$0xff] }
 0x1c5   :  { %4108 = vmatpush.xpose.msk.msrb.mxu3 %vm308_vm0, %v1876_v60  ;;  %v1875_v60 = vld [vmem:[%s7135_s1 + $0x7f0] sm:$0xff] }
 0x1c6   :  { %4049 = vmatpush.xpose.msk.msrb.mxu0 %vm308_vm0, %v1827_v17  ;;  %v1874_v17 = vld [vmem:[%s7135_s1 + $0x7e8] sm:$0xff] }
 0x1c7   :  { %4069 = vmatpush.xpose.msk.msrb.mxu1 %vm308_vm0, %v1843_v18  ;;  %v6412_v18 = vpop.f32.mrf.mxu0 }
 0x1c8   :  { %4089 = vmatpush.xpose.msk.msrb.mxu2 %vm308_vm0, %v1859_v0  ;;  %7172 = vst [vmem:[#allocation29_spill] sm:$0xff] %v6412_v18  ;;  %v6414_v0 = vpop.f32.mrf.mxu1 }
 0x1c9   :  { %4109 = vmatpush.xpose.msk.msrb.mxu3 %vm308_vm0, %v1875_v60  ;;  %7173 = vst [vmem:[#allocation30_spill] sm:$0xff] %v6414_v0  ;;  %v1825_v60 = vld [vmem:[%s7135_s1 + $0x660] sm:$0xff]  ;;  %3985 = vmatmul.msk.f32.gmra.mxu0 %vm308_vm0, %v5721_v38  ;;  %v1840_v0 = vld [vmem:[%s7135_s1 + $0x6d8] sm:$0xff]  ;;  %v6452_v18 = vpop.f32.mrf.mxu3 }
 0x1ca   :  { %4050 = vmatpush.xpose.msk.msrb.mxu0 %vm308_vm0, %v1826_v50  ;;  %4005 = vmatmul.msk.f32.gmra.mxu1 %vm308_vm0, %v5721_v38  ;;  %v1857_v50 = vld [vmem:[%s7135_s1 + $0x760] sm:$0xff]  ;;  %7175 = vst [vmem:[#allocation32_spill] sm:$0xff] %v6452_v18  ;;  %v1839_v18 = vld [vmem:[%s7135_s1 + $0x6d0] sm:$0xff] }
 0x1cb   :  { %4070 = vmatpush.xpose.msk.msrb.mxu1 %vm308_vm0, %v1842_v53  ;;  %v1873_v53 = vld [vmem:[%s7135_s1 + $0x7e0] sm:$0xff]  ;;  %4025 = vmatmul.msk.f32.gmra.mxu2 %vm308_vm0, %v5721_v38 }
 0x1cc   :  { %4090 = vmatpush.xpose.msk.msrb.mxu2 %vm308_vm0, %v1858_v24  ;;  %4045 = vmatmul.msk.f32.gmra.mxu3 %vm308_vm0, %v5721_v38  ;;  %v6442_v24 = vpop.f32.mrf.mxu2  ;;  %v1856_v38 = vld [vmem:[%s7135_s1 + $0x758] sm:$0xff] }
 0x1cd   :  { %4110 = vmatpush.xpose.msk.msrb.mxu3 %vm308_vm0, %v1874_v17  ;;  %7174 = vst [vmem:[#allocation31_spill] sm:$0xff] %v6442_v24  ;;  %v1824_v17 = vld [vmem:[%s7135_s1 + $0x658] sm:$0xff] }
 0x1ce   :  { %4051 = vmatpush.xpose.msk.msrb.mxu0 %vm308_vm0, %v1825_v60 }
 0x1cf   :  { %4071 = vmatpush.xpose.msk.msrb.mxu1 %vm308_vm0, %v1841_v36  ;;  %v1872_v36 = vld [vmem:[%s7135_s1 + $0x7d8] sm:$0xff]  ;;  %v6462_v60 = vpop.f32.mrf.mxu0 }
 0x1d0   :  { %4091 = vmatpush.xpose.msk.msrb.mxu2 %vm308_vm0, %v1857_v50  ;;  %7176 = vst [vmem:[#allocation33_spill] sm:$0xff] %v6462_v60  ;;  %v6464_v50 = vpop.f32.mrf.mxu1 }
 0x1d1   :  { %4111 = vmatpush.xpose.msk.msrb.mxu3 %vm308_vm0, %v1873_v53  ;;  %7177 = vst [vmem:[#allocation34_spill] sm:$0xff] %v6464_v50  ;;  %v1823_v53 = vld [vmem:[%s7135_s1 + $0x650] sm:$0xff]  ;;  %3986 = vmatmul.msk.f32.gmra.mxu0 %vm308_vm0, %v5774_v49  ;;  %v1837_v50 = vld [vmem:[%s7135_s1 + $0x6c0] sm:$0xff] }
 0x1d2   :  { %4052 = vmatpush.xpose.msk.msrb.mxu0 %vm308_vm0, %v1824_v17  ;;  %4006 = vmatmul.msk.f32.gmra.mxu1 %vm308_vm0, %v5774_v49  ;;  %v1871_v17 = vld [vmem:[%s7135_s1 + $0x7d0] sm:$0xff] }
 0x1d3   :  { %4072 = vmatpush.xpose.msk.msrb.mxu1 %vm308_vm0, %v1840_v0  ;;  %v1855_v0 = vld [vmem:[%s7135_s1 + $0x750] sm:$0xff]  ;;  %4026 = vmatmul.msk.f32.gmra.mxu2 %vm308_vm0, %v5774_v49 }
 0x1d4   :  { %4092 = vmatpush.xpose.msk.msrb.mxu2 %vm308_vm0, %v1856_v38  ;;  %4046 = vmatmul.msk.f32.gmra.mxu3 %vm308_vm0, %v5774_v49  ;;  %v1822_v38 = vld [vmem:[%s7135_s1 + $0x648] sm:$0xff] }
 0x1d5   :  { %4112 = vmatpush.xpose.msk.msrb.mxu3 %vm308_vm0, %v1872_v36  ;;  %v1838_v36 = vld [vmem:[%s7135_s1 + $0x6c8] sm:$0xff] }
 0x1d6   :  { %4053 = vmatpush.xpose.msk.msrb.mxu0 %vm308_vm0, %v1823_v53  ;;  %v1854_v49 = vld [vmem:[%s7135_s1 + $0x748] sm:$0xff]  ;;  %v6504_v53 = vpop.f32.mrf.mxu2 }
 0x1d7   :  { %4073 = vmatpush.xpose.msk.msrb.mxu1 %vm308_vm0, %v1839_v18  ;;  %v1870_v18 = vld [vmem:[%s7135_s1 + $0x7c8] sm:$0xff]  ;;  %7178 = vst [vmem:[#allocation35_spill] sm:$0xff] %v6504_v53  ;;  %v1836_v53 = vld [vmem:[%s7135_s1 + $0x6b8] sm:$0xff] }
 0x1d8   :  { %4093 = vmatpush.xpose.msk.msrb.mxu2 %vm308_vm0, %v1855_v0  ;;  %v6506_v0 = vpop.f32.mrf.mxu3 }
 0x1d9   :  { %4113 = vmatpush.xpose.msk.msrb.mxu3 %vm308_vm0, %v1871_v17  ;;  %7179 = vst [vmem:[#allocation36_spill] sm:$0xff] %v6506_v0  ;;  %v1821_v17 = vld [vmem:[%s7135_s1 + $0x640] sm:$0xff]  ;;  %3987 = vmatmul.msk.f32.gmra.mxu0 %vm308_vm0, %v5830_v63  ;;  %v1820_v0 = vld [vmem:[%s7135_s1 + $0x638] sm:$0xff] }
 0x1da   :  { %4054 = vmatpush.xpose.msk.msrb.mxu0 %vm308_vm0, %v1822_v38  ;;  %4007 = vmatmul.msk.f32.gmra.mxu1 %vm308_vm0, %v5830_v63  ;;  %v1853_v38 = vld [vmem:[%s7135_s1 + $0x740] sm:$0xff] }
 0x1db   :  { %4074 = vmatpush.xpose.msk.msrb.mxu1 %vm308_vm0, %v1838_v36  ;;  %v1869_v36 = vld [vmem:[%s7135_s1 + $0x7c0] sm:$0xff]  ;;  %4027 = vmatmul.msk.f32.gmra.mxu2 %vm308_vm0, %v5830_v63 }
 0x1dc   :  { %4094 = vmatpush.xpose.msk.msrb.mxu2 %vm308_vm0, %v1854_v49  ;;  %v6528_v49 = vpop.f32.mrf.mxu0  ;;  %4047 = vmatmul.msk.f32.gmra.mxu3 %vm308_vm0, %v5830_v63  ;;  %v1852_v63 = vld [vmem:[%s7135_s1 + $0x738] sm:$0xff] }
 0x1dd   :  { %4114 = vmatpush.xpose.msk.msrb.mxu3 %vm308_vm0, %v1870_v18  ;;  %v6530_v18 = vpop.f32.mrf.mxu1 }
 0x1de   :  { %4055 = vmatpush.xpose.msk.msrb.mxu0 %vm308_vm0, %v1821_v17  ;;  %v6554_v17 = vpop.f32.mrf.mxu2 }
 0x1df   :  { %4075 = vmatpush.xpose.msk.msrb.mxu1 %vm308_vm0, %v1837_v50  ;;  %v1868_v50 = vld [vmem:[%s7135_s1 + $0x7b8] sm:$0xff]  ;;  %v2757_v40 = vadd.f32 %v6554_v17, %v6626_v56 }
 0x1e0   :  { %4095 = vmatpush.xpose.msk.msrb.mxu2 %vm308_vm0, %v1853_v38  ;;  %v1819_v38 = vld [vmem:[%s7135_s1 + $0x630] sm:$0xff]  ;;  %v6564_v60 = vpop.f32.mrf.mxu3 }
 0x1e1   :  { %4115 = vmatpush.xpose.msk.msrb.mxu3 %vm308_vm0, %v1869_v36  ;;  %v1835_v36 = vld [vmem:[%s7135_s1 + $0x6b0] sm:$0xff]  ;;  %v2786_v17 = vadd.f32 %v6564_v60, %v6626_v56  ;;  %v2699_v60 = vadd.f32 %v6528_v49, %v6626_v56 }
 0x1e2   :  { %4056 = vmatpush.xpose.msk.msrb.mxu0 %vm308_vm0, %v1820_v0  ;;  %v1867_v0 = vld [vmem:[%s7135_s1 + $0x7b0] sm:$0xff] }
 0x1e3   :  { %4076 = vmatpush.xpose.msk.msrb.mxu1 %vm308_vm0, %v1836_v53  ;;  %v1851_v53 = vld [vmem:[%s7135_s1 + $0x730] sm:$0xff]  ;;  %v3148_v59 = vmax.f32 %v2786_v17, 0.0 }
 0x1e4   :  { %4096 = vmatpush.xpose.msk.msrb.mxu2 %vm308_vm0, %v1852_v63  ;;  %v6572_v63 = vpop.permute.xlu0 %290 }
 0x1e5   :  { %4116 = vmatpush.xpose.msk.msrb.mxu3 %vm308_vm0, %v1868_v50  ;;  %7180 = vst [vmem:[#allocation37_spill] sm:$0xff] %v6572_v63  ;;  %v6576_v50 = vpop.f32.mrf.mxu0  ;;  %v6578_v24 = vpop.f32.mrf.mxu1  ;;  %v6650_v20 = vadd.f32 %v5628_v12, %v6572_v63  ;;  %v6668_v12 = vadd.f32 %v5679_v27, %v6572_v63 }
 0x1e6   :  { %4057 = vmatpush.xpose.msk.msrb.mxu0 %vm308_vm0, %v1819_v38  ;;  %v1850_v38 = vld [vmem:[%s7135_s1 + $0x728] sm:$0xff] }
 0x1e7   :  { %4077 = vmatpush.xpose.msk.msrb.mxu1 %vm308_vm0, %v1835_v36  ;;  %v1866_v36 = vld [vmem:[%s7135_s1 + $0x7a8] sm:$0xff] }
 0x1e8   :  { %4097 = vmatpush.xpose.msk.msrb.mxu2 %vm308_vm0, %v1851_v53  ;;  %v1817_v53 = vld [vmem:[%s7135_s1 + $0x620] sm:$0xff] }
 0x1e9   :  { %4117 = vmatpush.xpose.msk.msrb.mxu3 %vm308_vm0, %v1867_v0  ;;  %v1833_v0 = vld [vmem:[%s7135_s1 + $0x6a0] sm:$0xff] }
 0x1ea   :  { %4058 = vmatpush.xpose.msk.msrb.mxu0 %vm308_vm0, %v1818_v35  ;;  %v6610_v35 = vpop.f32.mrf.mxu2 }
 0x1eb   :  { %4078 = vmatpush.xpose.msk.msrb.mxu1 %vm308_vm0, %v1834_v48  ;;  %v1865_v48 = vld [vmem:[%s7135_s1 + $0x7a0] sm:$0xff] }
 0x1ec   :  { %4098 = vmatpush.xpose.msk.msrb.mxu2 %vm308_vm0, %v1850_v38  ;;  %v6612_v38 = vpop.f32.mrf.mxu3 }
 0x1ed   :  { %4118 = vmatpush.xpose.msk.msrb.mxu3 %vm308_vm0, %v1866_v36  ;;  %v6616_v36 = vpop.permute.xlu0 %295 }
 0x1ee   :  { %4059 = vmatpush.xpose.msk.msrb.mxu0 %vm308_vm0, %v1817_v53  ;;  %7181 = vst [vmem:[#allocation38_spill] sm:$0xff] %v6616_v36  ;;  %v1848_v53 = vld [vmem:[%s7135_s1 + $0x718] sm:$0xff]  ;;  %v6674_v2 = vadd.f32 %v5691_v30, %v6616_v36  ;;  %v6688_v27 = vadd.f32 %v5735_v22, %v6616_v36  ;;  %v6705_v22 = vadd.f32 %v5753_v44, %v6670_v3 }
 0x1ef   :  { %4079 = vmatpush.xpose.msk.msrb.mxu1 %vm308_vm0, %v1833_v0  ;;  %v6634_v0 = vpop.f32.mrf.mxu0  ;;  %v6811_v5 = vadd.f32 %v5954_v46, %v6616_v36 }
 0x1f0   :  { %4099 = vmatpush.xpose.msk.msrb.mxu2 %vm308_vm0, %v1849_v47  ;;  %v1864_v47 = vld [vmem:[%s7135_s1 + $0x798] sm:$0xff] }
 0x1f1   :  { %4119 = vmatpush.xpose.msk.msrb.mxu3 %vm308_vm0, %v1865_v48  ;;  %v6636_v48 = vpop.f32.mrf.mxu1  ;;  %7184 = vst [vmem:[#allocation41_spill] sm:$0xff] %v6811_v5 }
 0x1f2   :  { %4060 = vmatpush.xpose.msk.msrb.mxu0 %vm308_vm0, %v1816_v9  ;;  %v1863_v9 = vld [vmem:[%s7135_s1 + $0x790] sm:$0xff]  ;;  %v6692_v30 = vpop.f32.mrf.mxu2 }
 0x1f3   :  { %4080 = vmatpush.xpose.msk.msrb.mxu1 %vm308_vm0, %v1832_v8  ;;  %v1847_v8 = vld [vmem:[%s7135_s1 + $0x710] sm:$0xff] }
 0x1f4   :  { %4100 = vmatpush.xpose.msk.msrb.mxu2 %vm308_vm0, %v1848_v53  ;;  %v6660_v53 = vadd.f32 %v5630_v14, %v6572_v63  ;;  %v6680_v14 = vadd.f32 %v5693_v32, %v6616_v36  ;;  %v1814_v32 = vld [vmem:[%s7135_s1 + $0x608] sm:$0xff] }
 0x1f5   :  { %4120 = vmatpush.xpose.msk.msrb.mxu3 %vm308_vm0, %v1864_v47  ;;  %v6664_v47 = vadd.f32 %v5669_v25, %v6572_v63  ;;  %v6684_v25 = vadd.f32 %v5725_v39, %v6616_v36  ;;  %v6690_v42 = vpop.permute.xlu0 %305  ;;  %v1830_v39 = vld [vmem:[%s7135_s1 + $0x688] sm:$0xff] }
 0x1f6   :  { %4061 = vmatpush.xpose.msk.msrb.mxu0 %vm308_vm0, %v1815_v31  ;;  %v6709_v31 = vadd.f32 %v5755_v45, %v6670_v3  ;;  %v6724_v45 = vadd.f32 %v5796_v54, %v6670_v3  ;;  %v6733_v57 = vadd.f32 %v5823_v61, %v6690_v42  ;;  %v6748_v61 = vadd.f32 %v5858_v4, %v6690_v42 }
 0x1f7   :  { %4081 = vmatpush.xpose.msk.msrb.mxu1 %vm308_vm0, %v1831_v23  ;;  %v6737_v23 = vadd.f32 %v5825_v62, %v6690_v42  ;;  %v6750_v44 = vpop.f32.mrf.mxu0  ;;  %v6766_v55 = vadd.f32 %v5868_v7, %v6690_v42  ;;  %v6781_v4 = vadd.f32 %v5880_v11, %v6572_v63  ;;  %v6785_v7 = vadd.f32 %v5912_v34, %v6572_v63 }
 0x1f8   :  { %4101 = vmatpush.xpose.msk.msrb.mxu2 %vm308_vm0, %v1847_v8  ;;  %v6711_v8 = vpop.f32.mrf.mxu3  ;;  %v6796_v54 = vadd.f32 %v5918_v28, %v6616_v36  ;;  %v6803_v34 = vadd.f32 %v5920_v29, %v6616_v36  ;;  %v6819_v29 = vadd.f32 %v5972_v51, %v6670_v3  ;;  %v4133_v51 = vld [vmem:[%s7138_s4] sm:$0xff]  ;;  %v2702_v11 = vadd.f32 %v6576_v50, %v6739_v33  ;;  %v4134_v50 = vld [vmem:[%s7138_s4 + $0x8] sm:$0xff] }
 0x1f9   :  { %4121 = vmatpush.xpose.msk.msrb.mxu3 %vm308_vm0, %v1863_v9  ;;  %v1846_v9 = vld [vmem:[%s7135_s1 + $0x708] sm:$0xff]  ;;  %v6752_v62 = vpop.f32.mrf.mxu1  ;;  %7182 = vst [vmem:[#allocation39_spill] sm:$0xff] %v6785_v7  ;;  %v7185_v49 = vmax.f32 %v6684_v25, 0.0 }
 0x1fa   :  { %4062 = vmatpush.xpose.msk.msrb.mxu0 %vm308_vm0, %v1814_v32  ;;  %v1813_v32 = vld [vmem:[%s7135_s1 + $0x600] sm:$0xff] }
 0x1fb   :  { %4082 = vmatpush.xpose.msk.msrb.mxu1 %vm308_vm0, %v1830_v39  ;;  %v1829_v39 = vld [vmem:[%s7135_s1 + $0x680] sm:$0xff] }
 0x1fc   :  { %4102 = vmatpush.xpose.msk.msrb.mxu2 %vm308_vm0, %v1846_v9  ;;  %v6770_v9 = vadd.f32 %v5878_v10, %v6572_v63  ;;  %v6789_v10 = vadd.f32 %v5914_v26, %v6572_v63  ;;  %v6807_v26 = vadd.f32 %v5952_v43, %v6616_v36  ;;  %v2760_v43 = vadd.f32 %v6610_v35, %v6739_v33 }
 0x1fd   :  { %4122 = vmatpush.xpose.msk.msrb.mxu3 %vm308_vm0, %v1862_v41  ;;  %v1845_v41 = vld [vmem:[%s7135_s1 + $0x700] sm:$0xff]  ;;  %v2731_v35 = vadd.f32 %v6578_v24, %v6739_v33 }
 0x1fe   :  { %7183 = vst [vmem:[#allocation40_spill] sm:$0xff] %v6789_v10  ;;  %4063 = vmatpush.xpose.msk.msrb.mxu0 %vm308_vm0, %v1813_v32  ;;  %v2765_v32 = vpop.f32.mrf.mxu2  ;;  %v3163_v37 = vmax.f32 %v2760_v43, 0.0  ;;  %v3147_v10 = vmax.f32 %v2757_v40, 0.0 }
 0x1ff   :  { %4083 = vmatpush.xpose.msk.msrb.mxu1 %vm308_vm0, %v1829_v39  ;;  %v6844_v39 = vpop.permute.xlu1 %1898 }
 0x200   :  { %4103 = vmatpush.xpose.msk.msrb.mxu2 %vm308_vm0, %v1845_v41  ;;  %v6830_v41 = vpop.permute.xlu2 %1893  ;;  %v2794_v28 = vpop.f32.mrf.mxu3  ;;  %v3227_v5 = vmul.f32 %v3163_v37, %v7185_v49  ;;  %v7186_v37 = vmax.f32 %v6664_v47, 0.0  ;;  %v7189_v49 = vmax.f32 %v6668_v12, 0.0  ;;  %v7192_v12 = vmax.f32 %v6680_v14, 0.0 }
 0x201   :  { %4123 = vmatpush.xpose.msk.msrb.mxu3 %vm308_vm0, %v1861_v19  ;;  %v6828_v19 = vadd.f32 %v5974_v52, %v6670_v3  ;;  %4064 = vmatmul.msk.f32.vlgmr.msrb.gmra.mxu0 %vm308_vm0, %v4133_v51  ;;  %v2789_v52 = vadd.f32 %v6612_v38, %v6739_v33  ;;  %v2763_v46 = vadd.f32 %v6692_v30, %v6830_v41  ;;  %v6853_v38 = vpop.f32.mrf.mxu0  ;;  %v6855_v36 = vpop.f32.mrf.mxu1  ;;  %v7195_v14 = vmax.f32 %v6674_v2, 0.0  ;;  %v4135_v2 = vld [vmem:[%s7138_s4 + $0x10] sm:$0xff] }
 0x202   :  { %4084 = vmatmul.msk.f32.vlgmr.msrb.gmra.mxu1 %vm308_vm0, %v4133_v51  ;;  %v2792_v63 = vadd.f32 %v6711_v8, %v6830_v41  ;;  %v2795_v7 = vadd.f32 %v2794_v28, %v6844_v39  ;;  %v6873_v8 = vadd.f32 %v6004_v1, %v6670_v3  ;;  %v2734_v40 = vadd.f32 %v6636_v48, %v6830_v41 }
 0x203   :  { %4104 = vmatmul.msk.f32.vlgmr.msrb.gmra.mxu2 %vm308_vm0, %v4133_v51  ;;  %v3164_v30 = vmax.f32 %v2789_v52, 0.0  ;;  %v3179_v43 = vmax.f32 %v2763_v46, 0.0  ;;  %v3145_v28 = vmax.f32 %v2699_v60, 0.0  ;;  %v3162_v52 = vmax.f32 %v2731_v35, 0.0 }
 0x204   :  { %4124 = vmatmul.msk.f32.vlgmr.msrb.gmra.mxu3 %vm308_vm0, %v4133_v51  ;;  %v2766_v51 = vadd.f32 %v2765_v32, %v6844_v39  ;;  %v2728_v32 = vadd.f32 %v6530_v18, %v6626_v56  ;;  %v3180_v24 = vmax.f32 %v2792_v63, 0.0  ;;  %v2705_v1 = vadd.f32 %v6634_v0, %v6830_v41 }
 0x205   :  { %v2737_v18 = vadd.f32 %v6752_v62, %v6844_v39  ;;  %v3211_v63 = vmul.f32 %v3147_v10, %v7186_v37  ;;  %v7187_v48 = vmax.f32 %v6688_v27, 0.0  ;;  %v7188_v35 = vmax.f32 %v6724_v45, 0.0 }
 0x206   :  { %v3195_v46 = vmax.f32 %v2766_v51, 0.0  ;;  %v3196_v17 = vmax.f32 %v2795_v7, 0.0  ;;  %v6900_v62 = vpop.f32.mrf.mxu2  ;;  %v3146_v60 = vmax.f32 %v2728_v32, 0.0  ;;  %v3212_v47 = vmul.f32 %v3148_v59, %v7189_v49 }
 0x207   :  { %v3228_v25 = vmul.f32 %v3164_v30, %v7187_v48  ;;  %v3243_v0 = vmul.f32 %v3179_v43, %v7188_v35  ;;  %v3161_v10 = vmax.f32 %v2702_v11, 0.0  ;;  %v2708_v27 = vadd.f32 %v6750_v44, %v6844_v39 }
 0x208   :  { %v6902_v51 = vpop.f32.mrf.mxu3  ;;  %v3291_v43 = vadd.f32 %v3227_v5, %v3211_v63  ;;  %v3178_v7 = vmax.f32 %v2734_v40, 0.0  ;;  %v7190_v37 = vmax.f32 %v6729_v58, 0.0  ;;  %v6914_v32 = vadd.f32 %v6026_v15, %v6690_v42 }
 0x209   :  { %4065 = vmatmul.msk.f32.gmra.mxu0 %vm308_vm0, %v4134_v50  ;;  %v2817_v30 = vpop.f32.mrf.mxu0  ;;  %v2846_v45 = vpop.f32.mrf.mxu1  ;;  %v3226_v11 = vmul.f32 %v3162_v52, %v7192_v12  ;;  %v3177_v59 = vmax.f32 %v2705_v1, 0.0  ;;  %v3194_v49 = vmax.f32 %v2737_v18, 0.0  ;;  %v6920_v44 = vadd.f32 %v6028_v16, %v6690_v42 }
 0x20a   :  { %4085 = vmatmul.msk.f32.gmra.mxu1 %vm308_vm0, %v4134_v50  ;;  %v3244_v48 = vmul.f32 %v3180_v24, %v7190_v37  ;;  %v3300_v5 = vadd.f32 %v3228_v25, %v3212_v47  ;;  %v3292_v40 = vadd.f32 %v3291_v43, %v3243_v0  ;;  %v7193_v58 = vmax.f32 %v6766_v55, 0.0 }
 0x20b   :  { %4105 = vmatmul.msk.f32.gmra.mxu2 %vm308_vm0, %v4134_v50  ;;  %v7194_v15 = vmax.f32 %v6660_v53, 0.0  ;;  %v3225_v52 = vmul.f32 %v3161_v10, %v7195_v14  ;;  %v3193_v1 = vmax.f32 %v2708_v27, 0.0  ;;  %v7196_v18 = vmax.f32 %v6650_v20, 0.0 }
 0x20c   :  { %4125 = vmatmul.msk.f32.gmra.mxu3 %vm308_vm0, %v4134_v50  ;;  %v7191_v50 = vmax.f32 %v6748_v61, 0.0  ;;  %v3260_v24 = vmul.f32 %v3196_v17, %v7193_v58  ;;  %v6926_v61 = vadd.f32 %v6058_v21, %v6690_v42  ;;  %v7197_v63 = vmax.f32 %v6709_v31, 0.0 }
 0x20d   :  { %v3209_v16 = vmul.f32 %v3145_v28, %v7196_v18  ;;  %v3301_v0 = vadd.f32 %v3300_v5, %v3244_v48  ;;  %v1591_v17 = vmax.f32 %v6864_v6, 0.0  ;;  %v7198_v21 = vmax.f32 %v6705_v22, 0.0 }
 0x20e   :  { %v3259_v35 = vmul.f32 %v3195_v46, %v7191_v50  ;;  %v3210_v46 = vmul.f32 %v3146_v60, %v7194_v15  ;;  %v3242_v25 = vmul.f32 %v3178_v7, %v7197_v63  ;;  %v7199_v53 = vmax.f32 %v6737_v23, 0.0  ;;  %v2875_v23 = vpop.f32.mrf.mxu2 }
 0x20f   :  { %v3241_v43 = vmul.f32 %v3177_v59, %v7198_v21  ;;  %v1592_v20 = vmax.f32 %v6873_v8, 0.0  ;;  %v3302_v31 = vadd.f32 %v3301_v0, %v3260_v24  ;;  %v2818_v28 = vadd.f32 %v2817_v30, %v6739_v33  ;;  %v4136_v0 = vld [vmem:[%s7138_s4 + $0x18] sm:$0xff]  ;;  %s4164_s4 = smov [#allocation2]  }
 0x210   :  { %v3293_v55 = vadd.f32 %v3292_v40, %v3259_v35  ;;  %v3282_v47 = vadd.f32 %v3226_v11, %v3210_v46  ;;  %v3258_v60 = vmul.f32 %v3194_v49, %v7199_v53  ;;  %v2847_v10 = vadd.f32 %v2846_v45, %v6739_v33  ;;  %v2904_v22 = vpop.f32.mrf.mxu3  ;;  %s3477_s15 = sshll.u32 %s4164_s4, 4  ;;  %s3478_s15 = int_to_ptr.vmem [resolvable:$true] %s3477_s15 }
 0x211   :  { %4066 = vmatmul.msk.f32.gmra.mxu0 %vm308_vm0, %v4135_v2  ;;  %v3273_v27 = vadd.f32 %v3225_v52, %v3209_v16  ;;  %v7200_v7 = vmax.f32 %v6733_v57, 0.0  ;;  %v2815_v48 = vadd.f32 %v6853_v38, %v6626_v56  ;;  %v2844_v50 = vadd.f32 %v6855_v36, %v6626_v56  ;;  %v2820_v35 = vpop.f32.mrf.mxu0  ;;  %v2849_v30 = vpop.f32.mrf.mxu1 }
 0x212   :  { %4086 = vmatmul.msk.f32.gmra.mxu1 %vm308_vm0, %v4135_v2  ;;  %v3283_v12 = vadd.f32 %v3282_v47, %v3242_v25  ;;  %v3294_v45 = vrot.slane %v3293_v55, 4  ;;  %v2821_v11 = vadd.f32 %v2820_v35, %v6830_v41  ;;  %v2850_v59 = vadd.f32 %v2849_v30, %v6830_v41 }
 0x213   :  { %4106 = vmatmul.msk.f32.gmra.mxu2 %vm308_vm0, %v4135_v2  ;;  %v3257_v37 = vmul.f32 %v3193_v1, %v7200_v7  ;;  %v1605_v49 = vmax.f32 %v6914_v32, 0.0  ;;  %v1606_v5 = vmax.f32 %v6920_v44, 0.0  ;;  %v6963_v57 = vadd.f32 %v6068_v13, %v6690_v42 }
 0x214   :  { %4126 = vmatmul.msk.f32.gmra.mxu3 %vm308_vm0, %v4135_v2  ;;  %v3274_v38 = vadd.f32 %v3273_v27, %v3241_v43  ;;  %v3284_v40 = vadd.f32 %v3283_v12, %v3258_v60  ;;  %v3303_v58 = vrot.slane %v3302_v31, 4  ;;  %v3165_v36 = vmax.f32 %v2818_v28, 0.0 }
 0x215   :  { %v3166_v24 = vmax.f32 %v2847_v10, 0.0  ;;  %v1607_v15 = vmax.f32 %v6926_v61, 0.0  ;;  %v3149_v14 = vmax.f32 %v2815_v48, 0.0  ;;  %v3150_v52 = vmax.f32 %v2844_v50, 0.0 }
 0x216   :  { %v3275_v46 = vadd.f32 %v3274_v38, %v3257_v37  ;;  %v6966_v1 = vadd.f32 %v3294_v45, %v3293_v55  ;;  %v2873_v32 = vadd.f32 %v6900_v62, %v6626_v56  ;;  %v3181_v44 = vmax.f32 %v2821_v11, 0.0  ;;  %v2878_v53 = vpop.f32.mrf.mxu2 }
 0x217   :  { %v3182_v18 = vmax.f32 %v2850_v59, 0.0  ;;  %v1608_v13 = vmax.f32 %v6963_v57, 0.0  ;;  %v2902_v16 = vadd.f32 %v6902_v51, %v6626_v56  ;;  %v2876_v63 = vadd.f32 %v2875_v23, %v6739_v33 }
 0x218   :  { %v2905_v25 = vadd.f32 %v2904_v22, %v6739_v33  ;;  %v3285_v62 = vrot.slane %v3284_v40, 4  ;;  %v3304_v55 = vadd.f32 %v3303_v58, %v3302_v31  ;;  %v7201_v47 = vmax.f32 %v6796_v54, 0.0  ;;  %v2907_v60 = vpop.f32.mrf.mxu3 }
 0x219   :  { %4067 = vmatmul.msk.f32.gmra.mxu0 %vm308_vm0, %v4136_v0  ;;  %v7202_v43 = vmax.f32 %v6803_v34, 0.0  ;;  %v7203_v2 = vmax.f32 %v6770_v9, 0.0  ;;  %v7204_v10 = vmax.f32 %v6781_v4, 0.0  ;;  %v2879_v31 = vadd.f32 %v2878_v53, %v6830_v41  ;;  %v2823_v22 = vpop.f32.mrf.mxu0  ;;  %v2852_v27 = vpop.f32.mrf.mxu1  ;;  %v7212_v53 = vld [vmem:[#allocation40_spill] sm:$0xff] }
 0x21a   :  { %4087 = vmatmul.msk.f32.gmra.mxu1 %vm308_vm0, %v4136_v0  ;;  %v3229_v21 = vmul.f32 %v3165_v36, %v7201_v47  ;;  %v2908_v54 = vadd.f32 %v2907_v60, %v6830_v41  ;;  %v7205_v34 = vmax.f32 %v6819_v29, 0.0  ;;  %v7206_v37 = vmax.f32 %v6828_v19, 0.0 }
 0x21b   :  { %v3230_v51 = vmul.f32 %v3166_v24, %v7202_v43  ;;  %4107 = vmatmul.msk.f32.gmra.mxu2 %vm308_vm0, %v4136_v0  ;;  %v3213_v28 = vmul.f32 %v3149_v14, %v7203_v2  ;;  %v3214_v23 = vmul.f32 %v3150_v52, %v7204_v10  ;;  %v2824_v50 = vadd.f32 %v2823_v22, %v6844_v39 }
 0x21c   :  { %4127 = vmatmul.msk.f32.gmra.mxu3 %vm308_vm0, %v4136_v0  ;;  %v3245_v7 = vmul.f32 %v3181_v44, %v7205_v34  ;;  %v3246_v48 = vmul.f32 %v3182_v18, %v7206_v37  ;;  %v2853_v9 = vadd.f32 %v2852_v27, %v6844_v39  ;;  %v3151_v35 = vmax.f32 %v2873_v32, 0.0 }
 0x21d   :  { %v3152_v30 = vmax.f32 %v2902_v16, 0.0  ;;  %v3167_v4 = vmax.f32 %v2876_v63, 0.0  ;;  %v3168_v12 = vmax.f32 %v2905_v25, 0.0  ;;  %v3309_v45 = vadd.f32 %v3229_v21, %v3213_v28  ;;  %v7208_v63 = vld [vmem:[#allocation41_spill] sm:$0xff]  ;;  %v7210_v21 = vld [vmem:[#allocation39_spill] sm:$0xff] }
 0x21e   :  { %v3318_v11 = vadd.f32 %v3230_v51, %v3214_v23  ;;  %v3197_v59 = vmax.f32 %v2824_v50, 0.0  ;;  %v3198_v38 = vmax.f32 %v2853_v9, 0.0  ;;  %v3276_v58 = vrot.slane %v3275_v46, 4  ;;  %v2881_v28 = vpop.f32.mrf.mxu2 }
 0x21f   :  { %v3286_v36 = vadd.f32 %v3285_v62, %v3284_v40  ;;  %v3183_v24 = vmax.f32 %v2879_v31, 0.0  ;;  %v3184_v29 = vmax.f32 %v2908_v54, 0.0  ;;  %v3310_v14 = vadd.f32 %v3309_v45, %v3245_v7 }
 0x220   :  { %v3319_v52 = vadd.f32 %v3318_v11, %v3246_v48  ;;  %v3261_v19 = vmul.f32 %v3197_v59, %v1605_v49  ;;  %v3262_v44 = vmul.f32 %v3198_v38, %v1606_v5  ;;  %v3296_v18 = vrot.slane %v6966_v1, 2  ;;  %v2910_v49 = vpop.f32.mrf.mxu3 }
 0x221   :  { %v3305_v0 = vrot.slane %v3304_v55, 2  ;;  %v7207_v32 = vmax.f32 %v6807_v26, 0.0  ;;  %v7209_v25 = vmax.f32 %v7208_v63, 0.0  ;;  %v7211_v43 = vmax.f32 %v7210_v21, 0.0 }
 0x222   :  { %v7213_v40 = vmax.f32 %v7212_v53, 0.0  ;;  %v3311_v60 = vadd.f32 %v3310_v14, %v3261_v19  ;;  %v3320_v2 = vadd.f32 %v3319_v52, %v3262_v44  ;;  %v3247_v5 = vmul.f32 %v3183_v24, %v1591_v17 }
 0x223   :  { %v3231_v16 = vmul.f32 %v3167_v4, %v7207_v32  ;;  %v3232_v47 = vmul.f32 %v3168_v12, %v7209_v25  ;;  %v3215_v51 = vmul.f32 %v3151_v35, %v7211_v43  ;;  %v3248_v26 = vmul.f32 %v3184_v29, %v1592_v20 }
 0x224   :  { %v3216_v62 = vmul.f32 %v3152_v30, %v7213_v40  ;;  %v2882_v10 = vadd.f32 %v2881_v28, %v6844_v39  ;;  %v2911_v23 = vadd.f32 %v2910_v49, %v6844_v39  ;;  %v3277_v31 = vadd.f32 %v3276_v58, %v3275_v46 }
 0x225   :  { %v3287_v54 = vrot.slane %v3286_v36, 2  ;;  %v3312_v22 = vrot.slane %v3311_v60, 4  ;;  %v3321_v27 = vrot.slane %v3320_v2, 4  ;;  %v3327_v34 = vadd.f32 %v3231_v16, %v3215_v51 }
 0x226   :  { %v3336_v7 = vadd.f32 %v3232_v47, %v3216_v62  ;;  %v3199_v37 = vmax.f32 %v2882_v10, 0.0  ;;  %v3200_v48 = vmax.f32 %v2911_v23, 0.0  ;;  %v3297_v50 = vadd.f32 %v3296_v18, %v6966_v1 }
 0x227   :  { %v3306_v9 = vadd.f32 %v3305_v0, %v3304_v55  ;;  %v3313_v6 = vadd.f32 %v3312_v22, %v3311_v60  ;;  %v3322_v17 = vadd.f32 %v3321_v27, %v3320_v2  ;;  %v3328_v35 = vadd.f32 %v3327_v34, %v3247_v5 }
 0x228   :  { %v3337_v8 = vadd.f32 %v3336_v7, %v3248_v26  ;;  %v3263_v20 = vmul.f32 %v3199_v37, %v1607_v15  ;;  %v3264_v46 = vmul.f32 %v3200_v48, %v1608_v13  ;;  %v3288_v30 = vadd.f32 %v3287_v54, %v3286_v36 }
 0x229   :  { %v3314_v4 = vrot.slane %v3313_v6, 2  ;;  %v3323_v12 = vrot.slane %v3322_v17, 2  ;;  %v3278_v59 = vrot.slane %v3277_v31, 2  ;;  %v3298_v1 = vrot.slane %v3297_v50, 1 }
 0x22a   :  { %v3329_v45 = vadd.f32 %v3328_v35, %v3263_v20  ;;  %v3338_v11 = vadd.f32 %v3337_v8, %v3264_v46  ;;  %v3307_v55 = vrot.slane %v3306_v9, 1  ;;  %v3289_v14 = vrot.slane %v3288_v30, 1  ;;  %v7216_v35 = vld [vmem:[#allocation6_spill] sm:$0xff]  ;;  %v7218_v46 = vld [vmem:[#allocation9_spill] sm:$0xff] }
 0x22b   :  { %v3315_v38 = vadd.f32 %v3314_v4, %v3313_v6  ;;  %v3324_v58 = vadd.f32 %v3323_v12, %v3322_v17  ;;  %v3279_v44 = vadd.f32 %v3278_v59, %v3277_v31  ;;  %v3299_v57 = vadd.f32 %v3298_v1, %v3297_v50  ;;  %v7215_v6 = vld [vmem:[#allocation5_spill] sm:$0xff]  ;;  %v7217_v20 = vld [vmem:[#allocation38_spill] sm:$0xff] }
 0x22c   :  { %v3330_v24 = vrot.slane %v3329_v45, 4  ;;  %v3339_v29 = vrot.slane %v3338_v11, 4  ;;  %v3308_v13 = vadd.f32 %v3307_v55, %v3306_v9  ;;  %v3290_v0 = vadd.f32 %v3289_v14, %v3288_v30  ;;  %v7214_v9 = vld [vmem:[#allocation37_spill] sm:$0xff]  ;;  %v7219_v4 = vld [vmem:[#allocation10_spill] sm:$0xff] }
 0x22d   :  { %v3316_v52 = vrot.slane %v3315_v38, 1  ;;  %v3325_v19 = vrot.slane %v3324_v58, 1  ;;  %v3280_v47 = vrot.slane %v3279_v44, 1  ;;  %v3434_v21 = vrot.slane %v3299_v57, 6 }
 0x22e   :  { %v3331_v61 = vadd.f32 %v3330_v24, %v3329_v45  ;;  %v3340_v15 = vadd.f32 %v3339_v29, %v3338_v11  ;;  %v3435_v43 = vrot.slane %v3308_v13, 5  ;;  %v3433_v40 = vrot.slane %v3290_v0, 7  ;;  %v7221_v13 = vld [vmem:[#allocation8_spill] sm:$0xff] }
 0x22f   :  { %v3317_v32 = vadd.f32 %v3316_v52, %v3315_v38  ;;  %v3326_v16 = vadd.f32 %v3325_v19, %v3324_v58  ;;  %v3281_v49 = vadd.f32 %v3280_v47, %v3279_v44  ;;  %v1339_v17 = vadd.f32 %v7215_v6, %v7214_v9  ;;  %v7220_v44 = vld [vmem:[#allocation7_spill] sm:$0xff] }
 0x230   :  { %v3332_v36 = vrot.slane %v3331_v61, 2  ;;  %v3341_v18 = vrot.slane %v3340_v15, 2  ;;  %v3450_v10 = vsel %vm3449_vm2, %v3434_v21, %v3435_v43  ;;  %v1368_v8 = vadd.f32 %v7216_v35, %v7214_v9  ;;  %v7222_v47 = vld [vmem:[#allocation11_spill] sm:$0xff]  ;;  %v7223_v43 = vld [vmem:[#allocation12_spill] sm:$0xff] }
 0x231   :  { %v3436_v62 = vrot.slane %v3317_v32, 4  ;;  %v3437_v60 = vrot.slane %v3326_v16, 3  ;;  %v3448_v23 = vsel %vm3447_vm1, %v3281_v49, %v3433_v40  ;;  %v1342_v30 = vadd.f32 %v7218_v46, %v7217_v20 }
 0x232   :  { %v3333_v63 = vadd.f32 %v3332_v36, %v3331_v61  ;;  %v3342_v25 = vadd.f32 %v3341_v18, %v3340_v15  ;;  %v3452_v22 = vsel %vm3451_vm3, %v3448_v23, %v3450_v10  ;;  %v1371_v12 = vadd.f32 %v7219_v4, %v7217_v20 }
 0x233   :  { %v3454_v31 = vsel %vm3453_vm4, %v3436_v62, %v3437_v60  ;;  %v1561_v29 = vmax.f32 %v1339_v17, 0.0  ;;  %v1562_v14 = vmax.f32 %v1368_v8, 0.0  ;;  %v1577_v52 = vmax.f32 %v1342_v30, 0.0  ;;  %v7225_v62 = vld [vmem:[#allocation14_spill] sm:$0xff] }
 0x234   :  { %v3334_v51 = vrot.slane %v3333_v63, 1  ;;  %v3343_v53 = vrot.slane %v3342_v25, 1  ;;  %v1578_v19 = vmax.f32 %v1371_v12, 0.0  ;;  %v1397_v57 = vadd.f32 %v7220_v44, %v7214_v9 }
 0x235   :  { %v1426_v36 = vadd.f32 %v7221_v13, %v7214_v9  ;;  %v1400_v21 = vadd.f32 %v7222_v47, %v7217_v20  ;;  %v1374_v60 = vadd.f32 %v7225_v62, %v6670_v3 }
 0x236   :  { %v3335_v2 = vadd.f32 %v3334_v51, %v3333_v63  ;;  %v3344_v28 = vadd.f32 %v3343_v53, %v3342_v25  ;;  %v1429_v51 = vadd.f32 %v7223_v43, %v7217_v20  ;;  %v7224_v53 = vld [vmem:[#allocation13_spill] sm:$0xff] }
 0x237   :  { %v1345_v40 = vadd.f32 %v7224_v53, %v6670_v3  ;;  %v1594_v8 = vmax.f32 %v1374_v60, 0.0 }
 0x238   :  { %v3438_v5 = vrot.slane %v3335_v2, 2  ;;  %v3439_v26 = vrot.slane %v3344_v28, 1 }
 0x239   :  { %v1593_v35 = vmax.f32 %v1345_v40, 0.0 }
 0x23a   :  { %v3456_v54 = vsel %vm3455_vm5, %v3438_v5, %v3439_v26 }
 0x23b   :  { %v3458_v27 = vsel %vm3457_vm6, %v3454_v31, %v3456_v54 }
 0x23c   :  { %v3460_v34 = vsel %vm3459_vm7, %v3452_v22, %v3458_v27  ;;  %v1563_v27 = vmax.f32 %v1397_v57, 0.0 }
 0x23d   :  { %3470 = vst [vmem:[#allocation2] sm:$0xff] %v3460_v34  ;;  %v1564_v34 = vmax.f32 %v1426_v36, 0.0 }
 0x23e   :  { %v2930_v7 = vpop.f32.mrf.mxu0 }
 0x23f   :  { %v2959_v37 = vpop.f32.mrf.mxu1  ;;  %v2931_v48 = vadd.f32 %v2930_v7, %v6626_v56 }
 0x240   :  { %v2960_v50 = vadd.f32 %v2959_v37, %v6626_v56 }
 0x241   :  { %v3153_v58 = vmax.f32 %v2931_v48, 0.0  ;;  %v1579_v48 = vmax.f32 %v1400_v21, 0.0 }
 0x242   :  { %v3154_v1 = vmax.f32 %v2960_v50, 0.0  ;;  %v1580_v50 = vmax.f32 %v1429_v51, 0.0 }
 0x243   :  { %v3217_v32 = vmul.f32 %v3153_v58, %v1561_v29  ;;  %v7226_v58 = vld [vmem:[#allocation15_spill] sm:$0xff] }
 0x244   :  { %v3218_v16 = vmul.f32 %v3154_v1, %v1562_v14  ;;  %v1403_v1 = vadd.f32 %v7226_v58, %v6670_v3 }
 0x246   :  { %v2988_v45 = vpop.f32.mrf.mxu2  ;;  %v2933_v59 = vpop.f32.mrf.mxu0  ;;  %v1595_v47 = vmax.f32 %v1403_v1, 0.0 }
 0x247   :  { %v3017_v11 = vpop.f32.mrf.mxu3  ;;  %v2962_v38 = vpop.f32.mrf.mxu1  ;;  %v2934_v55 = vadd.f32 %v2933_v59, %v6739_v33  ;;  %v2989_v18 = vadd.f32 %v2988_v45, %v6626_v56 }
 0x248   :  { %v2963_v24 = vadd.f32 %v2962_v38, %v6739_v33  ;;  %v3018_v0 = vadd.f32 %v3017_v11, %v6626_v56 }
 0x249   :  { %v3169_v61 = vmax.f32 %v2934_v55, 0.0  ;;  %v3155_v26 = vmax.f32 %v2989_v18, 0.0  ;;  %v7227_v55 = vld [vmem:[#allocation16_spill] sm:$0xff] }
 0x24a   :  { %v3170_v15 = vmax.f32 %v2963_v24, 0.0  ;;  %v3156_v10 = vmax.f32 %v3018_v0, 0.0  ;;  %v1432_v24 = vadd.f32 %v7227_v55, %v6670_v3 }
 0x24b   :  { %v3233_v63 = vmul.f32 %v3169_v61, %v1577_v52  ;;  %v3219_v4 = vmul.f32 %v3155_v26, %v1563_v27  ;;  %v7228_v52 = vld [vmem:[#allocation17_spill] sm:$0xff]  ;;  %v7229_v61 = vld [vmem:[#allocation18_spill] sm:$0xff]  ;;  %v7230_v26 = vld [vmem:[#allocation19_spill] sm:$0xff] }
 0x24c   :  { %v3234_v25 = vmul.f32 %v3170_v15, %v1578_v19  ;;  %v3220_v12 = vmul.f32 %v3156_v10, %v1564_v34  ;;  %v1348_v19 = vadd.f32 %v7228_v52, %v6690_v42  ;;  %v1377_v15 = vadd.f32 %v7229_v61, %v6690_v42 }
 0x24d   :  { %v3345_v2 = vadd.f32 %v3233_v63, %v3217_v32  ;;  %v1596_v21 = vmax.f32 %v1432_v24, 0.0  ;;  %v1406_v10 = vadd.f32 %v7230_v26, %v6690_v42  ;;  %v7233_v26 = vld [vmem:[#allocation22_spill] sm:$0xff] }
 0x24e   :  { %v3354_v28 = vadd.f32 %v3234_v25, %v3218_v16  ;;  %v2991_v49 = vpop.f32.mrf.mxu2  ;;  %v2936_v54 = vpop.f32.mrf.mxu0  ;;  %v1609_v53 = vmax.f32 %v1348_v19, 0.0  ;;  %v1610_v40 = vmax.f32 %v1377_v15, 0.0 }
 0x24f   :  { %v3020_v5 = vpop.f32.mrf.mxu3  ;;  %v2992_v23 = vadd.f32 %v2991_v49, %v6739_v33  ;;  %v2965_v22 = vpop.f32.mrf.mxu1  ;;  %v2937_v7 = vadd.f32 %v2936_v54, %v6830_v41 }
 0x250   :  { %v3021_v31 = vadd.f32 %v3020_v5, %v6739_v33  ;;  %v2966_v37 = vadd.f32 %v2965_v22, %v6830_v41 }
 0x251   :  { %v3171_v6 = vmax.f32 %v2992_v23, 0.0  ;;  %v3185_v46 = vmax.f32 %v2937_v7, 0.0  ;;  %v7231_v23 = vld [vmem:[#allocation20_spill] sm:$0xff] }
 0x252   :  { %v3172_v17 = vmax.f32 %v3021_v31, 0.0  ;;  %v3186_v30 = vmax.f32 %v2966_v37, 0.0  ;;  %v1435_v31 = vadd.f32 %v7231_v23, %v6690_v42  ;;  %v7234_v23 = vld [vmem:[#allocation25_spill] sm:$0xff] }
 0x253   :  { %v3235_v45 = vmul.f32 %v3171_v6, %v1579_v48  ;;  %v3249_v59 = vmul.f32 %v3185_v46, %v1593_v35  ;;  %v1611_v35 = vmax.f32 %v1406_v10, 0.0  ;;  %v1484_v10 = vadd.f32 %v7233_v26, %v7214_v9 }
 0x254   :  { %v3236_v11 = vmul.f32 %v3172_v17, %v1580_v50  ;;  %v3250_v38 = vmul.f32 %v3186_v30, %v1594_v8  ;;  %v1612_v8 = vmax.f32 %v1435_v31, 0.0  ;;  %v1458_v31 = vadd.f32 %v7234_v23, %v7217_v20 }
 0x255   :  { %v3363_v29 = vadd.f32 %v3235_v45, %v3219_v4  ;;  %v3346_v44 = vadd.f32 %v3345_v2, %v3249_v59 }
 0x256   :  { %v3372_v14 = vadd.f32 %v3236_v11, %v3220_v12  ;;  %v3355_v57 = vadd.f32 %v3354_v28, %v3250_v38  ;;  %v2994_v13 = vpop.f32.mrf.mxu2  ;;  %v2939_v32 = vpop.f32.mrf.mxu0 }
 0x257   :  { %v3023_v36 = vpop.f32.mrf.mxu3  ;;  %v2995_v18 = vadd.f32 %v2994_v13, %v6830_v41  ;;  %v2968_v16 = vpop.f32.mrf.mxu1  ;;  %v2940_v63 = vadd.f32 %v2939_v32, %v6844_v39 }
 0x258   :  { %v3024_v0 = vadd.f32 %v3023_v36, %v6830_v41  ;;  %v2969_v25 = vadd.f32 %v2968_v16, %v6844_v39 }
 0x259   :  { %v3187_v43 = vmax.f32 %v2995_v18, 0.0  ;;  %v3201_v62 = vmax.f32 %v2940_v63, 0.0 }
 0x25a   :  { %v3188_v51 = vmax.f32 %v3024_v0, 0.0  ;;  %v3202_v60 = vmax.f32 %v2969_v25, 0.0 }
 0x25b   :  { %v3251_v2 = vmul.f32 %v3187_v43, %v1595_v47  ;;  %v3265_v49 = vmul.f32 %v3201_v62, %v1609_v53 }
 0x25c   :  { %v3252_v28 = vmul.f32 %v3188_v51, %v1596_v21  ;;  %v3266_v5 = vmul.f32 %v3202_v60, %v1610_v40 }
 0x25d   :  { %v3364_v54 = vadd.f32 %v3363_v29, %v3251_v2  ;;  %v3347_v27 = vadd.f32 %v3346_v44, %v3265_v49  ;;  %v7232_v49 = vld [vmem:[#allocation21_spill] sm:$0xff] }
 0x25e   :  { %v3373_v22 = vadd.f32 %v3372_v14, %v3252_v28  ;;  %v3356_v34 = vadd.f32 %v3355_v57, %v3266_v5  ;;  %v2997_v7 = vpop.f32.mrf.mxu2  ;;  %v1455_v5 = vadd.f32 %v7232_v49, %v7214_v9 }
 0x25f   :  { %v3026_v37 = vpop.f32.mrf.mxu3  ;;  %v2998_v48 = vadd.f32 %v2997_v7, %v6844_v39  ;;  %v3348_v6 = vrot.slane %v3347_v27, 4 }
 0x260   :  { %v3027_v50 = vadd.f32 %v3026_v37, %v6844_v39  ;;  %v3357_v17 = vrot.slane %v3356_v34, 4 }
 0x261   :  { %v3203_v46 = vmax.f32 %v2998_v48, 0.0  ;;  %v3349_v4 = vadd.f32 %v3348_v6, %v3347_v27 }
 0x262   :  { %v3204_v30 = vmax.f32 %v3027_v50, 0.0  ;;  %v3358_v12 = vadd.f32 %v3357_v17, %v3356_v34 }
 0x263   :  { %v3267_v45 = vmul.f32 %v3203_v46, %v1611_v35  ;;  %v3350_v59 = vrot.slane %v3349_v4, 2  ;;  %v1565_v35 = vmax.f32 %v1455_v5, 0.0  ;;  %v1581_v46 = vmax.f32 %v1458_v31, 0.0 }
 0x264   :  { %v3268_v11 = vmul.f32 %v3204_v30, %v1612_v8  ;;  %v3359_v38 = vrot.slane %v3358_v12, 2  ;;  %v1566_v8 = vmax.f32 %v1484_v10, 0.0 }
 0x265   :  { %v3365_v58 = vadd.f32 %v3364_v54, %v3267_v45  ;;  %v3351_v55 = vadd.f32 %v3350_v59, %v3349_v4  ;;  %v7235_v54 = vld [vmem:[#allocation26_spill] sm:$0xff]  ;;  %v7236_v45 = vld [vmem:[#allocation23_spill] sm:$0xff]  ;;  %v7237_v59 = vld [vmem:[#allocation24_spill] sm:$0xff] }
 0x266   :  { %v3374_v1 = vadd.f32 %v3373_v22, %v3268_v11  ;;  %v3360_v24 = vadd.f32 %v3359_v38, %v3358_v12  ;;  %v1487_v22 = vadd.f32 %v7235_v54, %v7217_v20  ;;  %v1513_v11 = vadd.f32 %v7236_v45, %v7214_v9 }
 0x267   :  { %v3366_v29 = vrot.slane %v3365_v58, 4  ;;  %v3352_v52 = vrot.slane %v3351_v55, 1  ;;  %v1542_v38 = vadd.f32 %v7237_v59, %v7214_v9 }
 0x268   :  { %v3375_v14 = vrot.slane %v3374_v1, 4  ;;  %v3361_v19 = vrot.slane %v3360_v24, 1  ;;  %v1582_v30 = vmax.f32 %v1487_v22, 0.0 }
 0x269   :  { %v3367_v61 = vadd.f32 %v3366_v29, %v3365_v58  ;;  %v3353_v36 = vadd.f32 %v3352_v52, %v3351_v55  ;;  %v7238_v52 = vld [vmem:[#allocation27_spill] sm:$0xff] }
 0x26a   :  { %v3376_v15 = vadd.f32 %v3375_v14, %v3374_v1  ;;  %v3362_v44 = vadd.f32 %v3361_v19, %v3360_v24  ;;  %v1516_v19 = vadd.f32 %v7238_v52, %v7217_v20 }
 0x26b   :  { %v3368_v57 = vrot.slane %v3367_v61, 2 }
 0x26c   :  { %v3377_v13 = vrot.slane %v3376_v15, 2  ;;  %v3440_v18 = vrot.slane %v3362_v44, 7  ;;  %v7240_v44 = vld [vmem:[#allocation29_spill] sm:$0xff] }
 0x26d   :  { %v3369_v0 = vadd.f32 %v3368_v57, %v3367_v61  ;;  %v7239_v61 = vld [vmem:[#allocation28_spill] sm:$0xff]  ;;  %v1461_v57 = vadd.f32 %v7240_v44, %v6670_v3 }
 0x26e   :  { %v3378_v32 = vadd.f32 %v3377_v13, %v3376_v15  ;;  %v3461_v16 = vsel %vm3447_vm1, %v3353_v36, %v3440_v18  ;;  %v1545_v15 = vadd.f32 %v7239_v61, %v7217_v20  ;;  %v7241_v13 = vld [vmem:[#allocation30_spill] sm:$0xff]  ;;  %v1568_v20 = vmax.f32 %v1542_v38, 0.0 }
 0x26f   :  { %v3370_v63 = vrot.slane %v3369_v0, 1  ;;  %v1490_v9 = vadd.f32 %v7241_v13, %v6670_v3  ;;  %v1597_v49 = vmax.f32 %v1461_v57, 0.0 }
 0x270   :  { %v3379_v25 = vrot.slane %v3378_v32, 1 }
 0x271   :  { %v3371_v47 = vadd.f32 %v3370_v63, %v3369_v0  ;;  %v1598_v5 = vmax.f32 %v1490_v9, 0.0 }
 0x272   :  { %v3380_v21 = vadd.f32 %v3379_v25, %v3378_v32 }
 0x273   :  { %v3441_v43 = vrot.slane %v3371_v47, 6 }
 0x274   :  { %v3442_v51 = vrot.slane %v3380_v21, 5 }
 0x276   :  { %v3462_v53 = vsel %vm3449_vm2, %v3441_v43, %v3442_v51  ;;  %v1567_v43 = vmax.f32 %v1513_v11, 0.0 }
 0x277   :  { %v7076_v40 = vsel %vm3451_vm3, %v3461_v16, %v3462_v53 }
 0x27e   :  { %v3046_v62 = vpop.f32.mrf.mxu0 }
 0x27f   :  { %v3075_v60 = vpop.f32.mrf.mxu1  ;;  %v3047_v2 = vadd.f32 %v3046_v62, %v6626_v56  ;;  %v1583_v62 = vmax.f32 %v1516_v19, 0.0 }
 0x280   :  { %v3076_v28 = vadd.f32 %v3075_v60, %v6626_v56  ;;  %v1584_v60 = vmax.f32 %v1545_v15, 0.0 }
 0x281   :  { %v3157_v48 = vmax.f32 %v3047_v2, 0.0 }
 0x282   :  { %v3158_v50 = vmax.f32 %v3076_v28, 0.0 }
 0x283   :  { %v3221_v55 = vmul.f32 %v3157_v48, %v1565_v35 }
 0x284   :  { %v3222_v24 = vmul.f32 %v3158_v50, %v1566_v8  ;;  %v7245_v8 = vld [vmem:[#allocation34_spill] sm:$0xff] }
 0x286   :  { %v3104_v27 = vpop.f32.mrf.mxu2  ;;  %v3049_v7 = vpop.f32.mrf.mxu0 }
 0x287   :  { %v3133_v34 = vpop.f32.mrf.mxu3  ;;  %v3078_v37 = vpop.f32.mrf.mxu1  ;;  %v3050_v6 = vadd.f32 %v3049_v7, %v6739_v33  ;;  %v3105_v58 = vadd.f32 %v3104_v27, %v6626_v56 }
 0x288   :  { %v3079_v17 = vadd.f32 %v3078_v37, %v6739_v33  ;;  %v3134_v1 = vadd.f32 %v3133_v34, %v6626_v56  ;;  %v7242_v34 = vld [vmem:[#allocation31_spill] sm:$0xff]  ;;  %v7243_v37 = vld [vmem:[#allocation32_spill] sm:$0xff] }
 0x289   :  { %v3173_v4 = vmax.f32 %v3050_v6, 0.0  ;;  %v3159_v32 = vmax.f32 %v3105_v58, 0.0  ;;  %v1519_v7 = vadd.f32 %v7242_v34, %v6670_v3  ;;  %v1548_v48 = vadd.f32 %v7243_v37, %v6670_v3 }
 0x28a   :  { %v3174_v12 = vmax.f32 %v3079_v17, 0.0  ;;  %v3160_v16 = vmax.f32 %v3134_v1, 0.0  ;;  %v7244_v17 = vld [vmem:[#allocation33_spill] sm:$0xff] }
 0x28b   :  { %v3237_v29 = vmul.f32 %v3173_v4, %v1581_v46  ;;  %v3223_v23 = vmul.f32 %v3159_v32, %v1567_v43  ;;  %v1464_v35 = vadd.f32 %v7244_v17, %v6690_v42  ;;  %v1493_v46 = vadd.f32 %v7245_v8, %v6690_v42 }
 0x28c   :  { %v3238_v14 = vmul.f32 %v3174_v12, %v1582_v30  ;;  %v3224_v31 = vmul.f32 %v3160_v16, %v1568_v20 }
 0x28d   :  { %v3381_v36 = vadd.f32 %v3237_v29, %v3221_v55  ;;  %v1599_v55 = vmax.f32 %v1519_v7, 0.0  ;;  %v1613_v52 = vmax.f32 %v1464_v35, 0.0  ;;  %v1614_v19 = vmax.f32 %v1493_v46, 0.0 }
 0x28e   :  { %v3390_v18 = vadd.f32 %v3238_v14, %v3222_v24  ;;  %v3107_v0 = vpop.f32.mrf.mxu2  ;;  %v3052_v47 = vpop.f32.mrf.mxu0  ;;  %v1600_v24 = vmax.f32 %v1548_v48, 0.0 }
 0x28f   :  { %v3136_v56 = vpop.f32.mrf.mxu3  ;;  %v3108_v63 = vadd.f32 %v3107_v0, %v6739_v33  ;;  %v3081_v21 = vpop.f32.mrf.mxu1  ;;  %v3053_v51 = vadd.f32 %v3052_v47, %v6830_v41 }
 0x290   :  { %v3137_v25 = vadd.f32 %v3136_v56, %v6739_v33  ;;  %v3082_v53 = vadd.f32 %v3081_v21, %v6830_v41 }
 0x291   :  { %v3175_v2 = vmax.f32 %v3108_v63, 0.0  ;;  %v3189_v26 = vmax.f32 %v3053_v51, 0.0 }
 0x292   :  { %v3176_v28 = vmax.f32 %v3137_v25, 0.0  ;;  %v3190_v10 = vmax.f32 %v3082_v53, 0.0 }
 0x293   :  { %v3239_v54 = vmul.f32 %v3175_v2, %v1583_v62  ;;  %v3253_v22 = vmul.f32 %v3189_v26, %v1597_v49 }
 0x294   :  { %v3240_v33 = vmul.f32 %v3176_v28, %v1584_v60  ;;  %v3254_v27 = vmul.f32 %v3190_v10, %v1598_v5 }
 0x295   :  { %v3399_v50 = vadd.f32 %v3239_v54, %v3223_v23  ;;  %v3382_v30 = vadd.f32 %v3381_v36, %v3253_v22 }
 0x296   :  { %v3408_v6 = vadd.f32 %v3240_v33, %v3224_v31  ;;  %v3391_v4 = vadd.f32 %v3390_v18, %v3254_v27  ;;  %v3110_v12 = vpop.f32.mrf.mxu2  ;;  %v3055_v38 = vpop.f32.mrf.mxu0  ;;  %v7247_v18 = vld [vmem:[#allocation36_spill] sm:$0xff] }
 0x297   :  { %v3139_v45 = vpop.f32.mrf.mxu3  ;;  %v3111_v11 = vadd.f32 %v3110_v12, %v6830_v41  ;;  %v3084_v58 = vpop.f32.mrf.mxu1  ;;  %v3056_v3 = vadd.f32 %v3055_v38, %v6844_v39  ;;  %v1551_v0 = vadd.f32 %v7247_v18, %v6690_v42 }
 0x298   :  { %v3140_v59 = vadd.f32 %v3139_v45, %v6830_v41  ;;  %v3085_v1 = vadd.f32 %v3084_v58, %v6844_v39  ;;  %v7246_v41 = vld [vmem:[#allocation35_spill] sm:$0xff] }
 0x299   :  { %v3191_v29 = vmax.f32 %v3111_v11, 0.0  ;;  %v3205_v61 = vmax.f32 %v3056_v3, 0.0  ;;  %v1522_v36 = vadd.f32 %v7246_v41, %v6690_v42  ;;  %v1616_v62 = vmax.f32 %v1551_v0, 0.0 }
 0x29a   :  { %v3192_v14 = vmax.f32 %v3140_v59, 0.0  ;;  %v3206_v15 = vmax.f32 %v3085_v1, 0.0 }
 0x29b   :  { %v3255_v44 = vmul.f32 %v3191_v29, %v1599_v55  ;;  %v3269_v13 = vmul.f32 %v3205_v61, %v1613_v52  ;;  %v1615_v53 = vmax.f32 %v1522_v36, 0.0 }
 0x29c   :  { %v3256_v57 = vmul.f32 %v3192_v14, %v1600_v24  ;;  %v3270_v9 = vmul.f32 %v3206_v15, %v1614_v19 }
 0x29d   :  { %v3400_v56 = vadd.f32 %v3399_v50, %v3255_v44  ;;  %v3383_v16 = vadd.f32 %v3382_v30, %v3269_v13 }
 0x29e   :  { %v3409_v32 = vadd.f32 %v3408_v6, %v3256_v57  ;;  %v3392_v63 = vadd.f32 %v3391_v4, %v3270_v9  ;;  %v3113_v25 = vpop.f32.mrf.mxu2 }
 0x29f   :  { %v3142_v47 = vpop.f32.mrf.mxu3  ;;  %v3114_v21 = vadd.f32 %v3113_v25, %v6844_v39  ;;  %v3384_v20 = vrot.slane %v3383_v16, 4 }
 0x2a0   :  { %v3143_v43 = vadd.f32 %v3142_v47, %v6844_v39  ;;  %v3393_v51 = vrot.slane %v3392_v63, 4 }
 0x2a1   :  { %v3207_v60 = vmax.f32 %v3114_v21, 0.0  ;;  %v3385_v28 = vadd.f32 %v3384_v20, %v3383_v16 }
 0x2a2   :  { %v3208_v2 = vmax.f32 %v3143_v43, 0.0  ;;  %v3394_v49 = vadd.f32 %v3393_v51, %v3392_v63 }
 0x2a3   :  { %v3271_v5 = vmul.f32 %v3207_v60, %v1615_v53  ;;  %v3386_v26 = vrot.slane %v3385_v28, 2 }
 0x2a4   :  { %v3272_v42 = vmul.f32 %v3208_v2, %v1616_v62  ;;  %v3395_v10 = vrot.slane %v3394_v49, 2 }
 0x2a5   :  { %v3401_v23 = vadd.f32 %v3400_v56, %v3271_v5  ;;  %v3387_v54 = vadd.f32 %v3386_v26, %v3385_v28 }
 0x2a6   :  { %v3410_v31 = vadd.f32 %v3409_v32, %v3272_v42  ;;  %v3396_v33 = vadd.f32 %v3395_v10, %v3394_v49 }
 0x2a7   :  { %v3402_v22 = vrot.slane %v3401_v23, 4  ;;  %v3388_v34 = vrot.slane %v3387_v54, 1 }
 0x2a8   :  { %v3411_v27 = vrot.slane %v3410_v31, 4  ;;  %v3397_v39 = vrot.slane %v3396_v33, 1 }
 0x2a9   :  { %v3403_v7 = vadd.f32 %v3402_v22, %v3401_v23  ;;  %v3389_v48 = vadd.f32 %v3388_v34, %v3387_v54 }
 0x2aa   :  { %v3412_v37 = vadd.f32 %v3411_v27, %v3410_v31  ;;  %v3398_v50 = vadd.f32 %v3397_v39, %v3396_v33 }
 0x2ab   :  { %v3404_v6 = vrot.slane %v3403_v7, 2  ;;  %v3443_v35 = vrot.slane %v3389_v48, 4 }
 0x2ac   :  { %v3413_v17 = vrot.slane %v3412_v37, 2  ;;  %v3444_v8 = vrot.slane %v3398_v50, 3 }
 0x2ad   :  { %v3405_v46 = vadd.f32 %v3404_v6, %v3403_v7 }
 0x2ae   :  { %v3414_v30 = vadd.f32 %v3413_v17, %v3412_v37  ;;  %v3464_v4 = vsel %vm3453_vm4, %v3443_v35, %v3444_v8 }
 0x2af   :  { %v3406_v12 = vrot.slane %v3405_v46, 1 }
 0x2b0   :  { %v3415_v45 = vrot.slane %v3414_v30, 1 }
 0x2b1   :  { %v3407_v11 = vadd.f32 %v3406_v12, %v3405_v46 }
 0x2b2   :  { %v3416_v59 = vadd.f32 %v3415_v45, %v3414_v30 }
 0x2b3   :  { %v3445_v38 = vrot.slane %v3407_v11, 2 }
 0x2b4   :  { %v3446_v58 = vrot.slane %v3416_v59, 1 }
 0x2b6   :  { %v3465_v3 = vsel %vm3455_vm5, %v3445_v38, %v3446_v58 }
 0x2b7   :  { %v3466_v1 = vsel %vm3457_vm6, %v3464_v4, %v3465_v3 }
 0x2b8   :  { %v3467_v55 = vsel %vm3459_vm7, %v7076_v40, %v3466_v1 }
 0x2b9   :  { %3471 = vst [vmem:[#allocation2 + $0x8] sm:$0xff] %v3467_v55 }
 0x2ba   :  { %3482 = dma.vmem_to_hbm [thread:$0]  %s3478_s15, 256, %s3480_s17, [#allocation3]  }
 0x2bb   :  { %4161 = dma.done.wait [#allocation3], 256  }
 0x2bc   :  { %4162 = vsyncadd [#allocation3], 4294967040 }
 0x2bd   :  { %3487 = vsyncpa [#allocation3], 1 }

</bundles_post_ra>
